<compile_context>
chip_gen: v7x
topology: tpu7x:2x2x1
jax: 0.10.0
libtpu: 0.0.40
codegen_flags: <defaults>
</compile_context>

<pallas_src>
import math

import jax
import jax.numpy as jnp
from jax.experimental import pallas as pl
from jax.experimental.pallas import tpu as pltpu

LANE = 128          # TPU lane width: channel (last) dims padded to multiples
NEG_SLOPE = 0.05    # LeakyReLU slope from the reference module


def _round_up(x, m):
    return (x + m - 1) // m * m


def _pad_last(a, target):
    pad = target - a.shape[-1]
    if pad == 0:
        return a
    return jnp.pad(a, [(0, 0)] * (a.ndim - 1) + [(0, pad)])


def _fold_bn(conv_b, gamma, beta, mean, var, eps=1e-5):
    scale = gamma / jnp.sqrt(var + eps)
    shift = beta + (conv_b - mean) * scale
    return scale, shift


# ---------------------------------------------------------------------------
# Wrapper: parameter packing (lane-dense, bf16 MXU operands) + fused kernel.
# ---------------------------------------------------------------------------
def up_forward(x1, x2, params, eps=1e-5):
    """Pallas implementation of Up.forward (NHWC layout)."""
    N, H1, W1, Cin = x1.shape
    deconv_w = params["deconv_w"]                      # (Cin, Cout, 2, 2)
    Cout = deconv_w.shape[1]
    H, W = 2 * H1, 2 * W1
    assert x2.shape == (N, H, W, Cout)

    Cinp = _round_up(Cin, LANE)
    Cp = _round_up(Cout, LANE)

    aligned = (Cout % LANE == 0)
    if aligned:
        Kp = 2 * Cout      # concat width (lane dense, no padding at all)
        Gw = Cout          # deconv matmul group width (no wasted columns)
        Cx2 = Cout         # x2 needs no lane padding
    else:
        Kp = _round_up(2 * Cout, LANE)
        Gw = Kp            # deconv outputs placed at [Cout, 2*Cout) of each group
        Cx2 = Kp           # x2 zero-padded to Kp so concat = x2 + up (aligned add)
    mode_add = not aligned
    out_dtype = x2.dtype

    # ---- ConvTranspose2d weight/bias -> one (Cinp, 4*Gw) matmul -------------
    # column groups ordered (kh, kw); within a group the deconv output sits at
    # lane offset `off` (0 when aligned, Cout otherwise).
    off = Cout if mode_add else 0
    wdt = jnp.transpose(deconv_w, (0, 2, 3, 1))        # (Cin, 2, 2, Cout)
    wd = jnp.zeros((Cinp, 2, 2, Gw), jnp.float32)
    wd = wd.at[:Cin, :, :, off:off + Cout].set(wdt)
    wd = wd.reshape(Cinp, 4 * Gw).astype(jnp.bfloat16)
    bd = jnp.zeros((4, Gw), jnp.float32)
    bd = bd.at[:, off:off + Cout].set(jnp.broadcast_to(params["deconv_b"], (4, Cout)))
    bd = bd.reshape(1, 4 * Gw)

    # ---- conv weights: HWIO padded, reshaped to (kh, kw*K + ci, co) ----------
    # (the kernel packs the [left | center | right] W-shifted taps along the
    #  lane axis, so the contraction index is kw*K + ci).
    w1 = params["conv1_w"]                             # (3, 3, 2*Cout, Cout)
    w1p = jnp.zeros((3, 3, Kp, Cp), jnp.float32).at[:, :, :2 * Cout, :Cout].set(w1)
    w1f = w1p.reshape(3, 3 * Kp, Cp).astype(jnp.bfloat16)
    w2 = params["conv2_w"]                             # (3, 3, Cout, Cout)
    w2p = jnp.zeros((3, 3, Cp, Cp), jnp.float32).at[:, :, :Cout, :Cout].set(w2)
    w2f = w2p.reshape(3, 3 * Cp, Cp).astype(jnp.bfloat16)

    s1, t1 = _fold_bn(params["conv1_b"], params["bn1_gamma"], params["bn1_beta"],
                      params["bn1_mean"], params["bn1_var"], eps)
    s2, t2 = _fold_bn(params["conv2_b"], params["bn2_gamma"], params["bn2_beta"],
                      params["bn2_mean"], params["bn2_var"], eps)
    s1 = _pad_last(s1, Cp)[None, :]
    t1 = _pad_last(t1, Cp)[None, :]
    s2 = _pad_last(s2, Cp)[None, :]
    t2 = _pad_last(t2, Cp)[None, :]

    x1p = _pad_last(x1, Cinp)
    x2p = _pad_last(x2, Cx2)

    # ---- row-chunk size: keep the f32 accumulator in vregs (<= 128 KiB) -----
    ACC_BYTES = 128 * 1024
    TH = 1
    for t in range(min(H, 256), 0, -1):
        if H % t == 0 and t * W * Cp * 4 <= ACC_BYTES:
            TH = t
            break

    # -----------------------------------------------------------------------
    # Fused kernel: one grid step == one batch element, intermediates in VMEM.
    # -----------------------------------------------------------------------
    def kernel(x1_ref, x2_ref, wd_ref, bd_ref, w1_ref, s1_ref, t1_ref,
               w2_ref, s2_ref, t2_ref, o_ref, cat_scr, h_scr):
        bf16 = jnp.bfloat16

        # -- zero only the two H-halo rows (interior fully overwritten below) -
        cat_scr[0:1, :, :] = jnp.zeros((1, W, Kp), bf16)
        cat_scr[H + 1:H + 2, :, :] = jnp.zeros((1, W, Kp), bf16)
        h_scr[0:1, :, :] = jnp.zeros((1, W, Cp), bf16)
        h_scr[H + 1:H + 2, :, :] = jnp.zeros((1, W, Cp), bf16)

        # -- stage 1: ConvTranspose2d(kernel=2, stride=2) as one MXU matmul ---
        x1f = x1_ref[0].reshape(H1 * W1, Cinp).astype(bf16)
        y = jnp.dot(x1f, wd_ref[...], preferred_element_type=jnp.float32)
        y = y + bd_ref[...]                                # (H1*W1, 4*Gw) f32
        # columns ordered (kh, kw, co): kw interleave falls out of a reshape,
        # kh interleave out of a bf16 stack (half the bytes of an f32 one).
        y0 = y[:, :2 * Gw].reshape(H1, W, Gw).astype(bf16)     # output rows 2i
        y1 = y[:, 2 * Gw:].reshape(H1, W, Gw).astype(bf16)     # output rows 2i+1
        up = jnp.stack([y0, y1], axis=1).reshape(H, W, Gw)

        # -- stage 2: channel concat [x2 | up(x1)] built directly in VMEM -----
        if mode_add:
            # up already occupies lanes [Cout, 2*Cout) of the Kp-wide groups and
            # x2p is zero beyond Cout, so a single aligned full-lane add+store
            # builds the concat (no masked / unaligned stores for small Cout).
            cat_scr[1:H + 1, :, :] = up + x2_ref[0].astype(bf16)
        else:
            cat_scr[1:H + 1, :, :Cout] = x2_ref[0].astype(bf16)
            cat_scr[1:H + 1, :, Cout:] = up

        # -- 3x3 conv (pad=1) + folded BN + LeakyReLU, row-chunked ------------
        def conv3x3_bn_lrelu(src_scr, w_ref, s_ref, t_ref, K, store):
            scale = s_ref[...]                             # (1, Cp) f32
            shift = t_ref[...]
            for c in range(H // TH):
                r0 = c * TH
                slab = src_scr[r0:r0 + TH + 2, :, :]       # (TH+2, W, K) bf16
                zcol = jnp.zeros((TH + 2, 1, K), bf16)
                left = jnp.concatenate([zcol, slab[:, :W - 1, :]], axis=1)
                right = jnp.concatenate([slab[:, 1:, :], zcol], axis=1)
                # kw taps packed along lanes -> contraction depth 3*K fills the
                # 256-deep v6e/v7x MXU; the kh taps are free H-axis slices.
                wide = jnp.concatenate([left, slab, right], axis=-1)
                acc = jnp.zeros((TH * W, Cp), jnp.float32)
                for kh in range(3):
                    patch = wide[kh:kh + TH].reshape(TH * W, 3 * K)
                    acc = acc + jnp.dot(patch, w_ref[kh],
                                        preferred_element_type=jnp.float32)
                z = acc * scale + shift
                z = jnp.where(z >= 0.0, z, NEG_SLOPE * z)
                store(c, z.reshape(TH, W, Cp))

        def store_h(c, v):
            h_scr[1 + c * TH:1 + c * TH + TH, :, :] = v.astype(bf16)

        def store_o(c, v):
            o_ref[0, c * TH:c * TH + TH, :, :] = v.astype(o_ref.dtype)

        conv3x3_bn_lrelu(cat_scr, w1_ref, s1_ref, t1_ref, Kp, store_h)   # -> h
        conv3x3_bn_lrelu(h_scr, w2_ref, s2_ref, t2_ref, Cp, store_o)     # -> out

    # ---- VMEM footprint -> explicit limit when above the default -----------
    def _nbytes(shape, dtype):
        return math.prod(shape) * jnp.dtype(dtype).itemsize

    vmem_est = (
        2 * (_nbytes((1, H1, W1, Cinp), x1p.dtype)
             + _nbytes((1, H, W, Cx2), x2p.dtype)
             + _nbytes((1, H, W, Cp), out_dtype))
        + 2 * (_nbytes((Cinp, 4 * Gw), jnp.bfloat16)
               + _nbytes((3, 3 * Kp, Cp), jnp.bfloat16)
               + _nbytes((3, 3 * Cp, Cp), jnp.bfloat16))
        + _nbytes((H + 2, W, Kp), jnp.bfloat16)
        + _nbytes((H + 2, W, Cp), jnp.bfloat16)
        + (256 << 10))
    if vmem_est > (30 << 20):
        compiler_params = pltpu.CompilerParams(
            dimension_semantics=("parallel",),
            vmem_limit_bytes=min(int(vmem_est * 1.4), 120 << 20))
    else:
        compiler_params = pltpu.CompilerParams(dimension_semantics=("parallel",))

    out = pl.pallas_call(
        kernel,
        grid=(N,),
        in_specs=[
            pl.BlockSpec((1, H1, W1, Cinp), lambda n: (n, 0, 0, 0)),   # x1
            pl.BlockSpec((1, H, W, Cx2), lambda n: (n, 0, 0, 0)),      # x2
            pl.BlockSpec((Cinp, 4 * Gw), lambda n: (0, 0)),            # deconv w
            pl.BlockSpec((1, 4 * Gw), lambda n: (0, 0)),               # deconv b
            pl.BlockSpec((3, 3 * Kp, Cp), lambda n: (0, 0, 0)),        # conv1 w
            pl.BlockSpec((1, Cp), lambda n: (0, 0)),                   # scale1
            pl.BlockSpec((1, Cp), lambda n: (0, 0)),                   # shift1
            pl.BlockSpec((3, 3 * Cp, Cp), lambda n: (0, 0, 0)),        # conv2 w
            pl.BlockSpec((1, Cp), lambda n: (0, 0)),                   # scale2
            pl.BlockSpec((1, Cp), lambda n: (0, 0)),                   # shift2
        ],
        out_specs=pl.BlockSpec((1, H, W, Cp), lambda n: (n, 0, 0, 0)),
        out_shape=jax.ShapeDtypeStruct((N, H, W, Cp), out_dtype),
        scratch_shapes=[
            pltpu.VMEM((H + 2, W, Kp), jnp.bfloat16),  # [x2 | up(x1)] + H halo
            pltpu.VMEM((H + 2, W, Cp), jnp.bfloat16),  # conv1 output + H halo
        ],
        compiler_params=compiler_params,
    )(x1p, x2p, wd, bd, w1f, s1, t1, w2f, s2, t2)

    if Cp == Cout:
        return out
    return out[..., :Cout]


# ---------------------------------------------------------------------------
# Pure-JAX reference (same bf16-operand / f32-accumulate math) for validation
# ---------------------------------------------------------------------------
def ref_forward(x1, x2, params, eps=1e-5):
    bf16, f32 = jnp.bfloat16, jnp.float32
    N, H1, W1, _ = x1.shape
    Cout = params["deconv_w"].shape[1]

    y = jnp.einsum("nijc,cokl->nikjlo",
                   x1.astype(bf16), params["deconv_w"].astype(bf16),
                   preferred_element_type=f32)
    up = y.reshape(N, 2 * H1, 2 * W1, Cout) + params["deconv_b"]

    def conv_bn_lrelu(x, w, b, gamma, beta, mean, var):
        scale = gamma / jnp.sqrt(var + eps)
        shift = beta + (b - mean) * scale
        z = jax.lax.conv_general_dilated(
            x.astype(bf16), w.astype(bf16), (1, 1), ((1, 1), (1, 1)),
            dimension_numbers=("NHWC", "HWIO", "NHWC"),
            preferred_element_type=f32)
        z = z * scale + shift
        return jnp.where(z >= 0, z, NEG_SLOPE * z)

    xcat = jnp.concatenate([x2, up], axis=-1)
    h = conv_bn_lrelu(xcat, params["conv1_w"], params["conv1_b"],
                      params["bn1_gamma"], params["bn1_beta"],
                      params["bn1_mean"], params["bn1_var"])
    return conv_bn_lrelu(h, params["conv2_w"], params["conv2_b"],
                         params["bn2_gamma"], params["bn2_beta"],
                         params["bn2_mean"], params["bn2_var"])


# ---------------------------------------------------------------------------
# Deterministic parameter init (shapes mirror the PyTorch module's __init__)
# ---------------------------------------------------------------------------
def init_params(key, in_channels, out_channels):
    ks = jax.random.split(key, 12)
    deconv_w = 0.1 * jax.random.normal(ks[0], (in_channels, out_channels, 2, 2), jnp.float32)
    deconv_b = 0.1 * jax.random.normal(ks[1], (out_channels,), jnp.float32)
    c1_oihw = 0.1 * jax.random.normal(ks[2], (out_channels, in_channels, 3, 3), jnp.float32)
    c2_oihw = 0.1 * jax.random.normal(ks[3], (out_channels, out_channels, 3, 3), jnp.float32)
    return {
        "deconv_w": deconv_w,
        "deconv_b": deconv_b,
        "conv1_w": jnp.transpose(c1_oihw, (2, 3, 1, 0)),   # HWIO
        "conv1_b": 0.1 * jax.random.normal(ks[4], (out_channels,), jnp.float32),
        "bn1_gamma": 1.0 + 0.1 * jax.random.normal(ks[5], (out_channels,), jnp.float32),
        "bn1_beta": 0.1 * jax.random.normal(ks[6], (out_channels,), jnp.float32),
        "bn1_mean": 0.1 * jax.random.normal(ks[7], (out_channels,), jnp.float32),
        "bn1_var": jax.random.uniform(ks[8], (out_channels,), jnp.float32, 0.5, 1.5),
        "conv2_w": jnp.transpose(c2_oihw, (2, 3, 1, 0)),   # HWIO
        "conv2_b": 0.1 * jax.random.normal(ks[9], (out_channels,), jnp.float32),
        "bn2_gamma": 1.0 + 0.1 * jax.random.normal(ks[10], (out_channels,), jnp.float32),
        "bn2_beta": 0.1 * jax.random.normal(ks[11], (out_channels,), jnp.float32),
        "bn2_mean": jnp.zeros((out_channels,), jnp.float32),
        "bn2_var": jnp.ones((out_channels,), jnp.float32),
    }


if __name__ == "__main__":
    N = 2
    out_channels = 4
    in_channels = 2 * out_channels      # cat([x2, up(x1)]) must have in_channels channels
    H1 = W1 = 8                         # x1 spatial; x2 spatial = 16

    key = jax.random.PRNGKey(0)
    k_x1, k_x2, k_p = jax.random.split(key, 3)
    x1 = jax.random.normal(k_x1, (N, H1, W1, in_channels), jnp.float32)           # NHWC
    x2 = jax.random.normal(k_x2, (N, 2 * H1, 2 * W1, out_channels), jnp.float32)  # NHWC
    params = init_params(k_p, in_channels, out_channels)

    out = jax.jit(up_forward)(x1, x2, params)
    out = jax.block_until_ready(out)

    assert out.shape == (N, 2 * H1, 2 * W1, out_channels), out.shape
    assert bool(jnp.all(jnp.isfinite(out)))

    ref = jax.jit(ref_forward)(x1, x2, params)
    ref = jax.block_until_ready(ref)
    assert bool(jnp.allclose(out, ref, atol=1e-2, rtol=1e-2)), float(
        jnp.max(jnp.abs(out - ref)))

    print("KERNEL_OK")
</pallas_src>

<mosaic_0001>
module attributes {stable_mosaic.version = 11 : i64} {
  func.func @kernel(%arg0: i32, %arg1: memref<1x8x8x128xf32, #tpu.memory_space<vmem>>, %arg2: memref<1x16x16x128xf32, #tpu.memory_space<vmem>>, %arg3: memref<128x512xbf16, #tpu.memory_space<vmem>>, %arg4: memref<1x512xf32, #tpu.memory_space<vmem>>, %arg5: memref<3x384x128xbf16, #tpu.memory_space<vmem>>, %arg6: memref<1x128xf32, #tpu.memory_space<vmem>>, %arg7: memref<1x128xf32, #tpu.memory_space<vmem>>, %arg8: memref<3x384x128xbf16, #tpu.memory_space<vmem>>, %arg9: memref<1x128xf32, #tpu.memory_space<vmem>>, %arg10: memref<1x128xf32, #tpu.memory_space<vmem>>, %arg11: memref<1x16x16x128xf32, #tpu.memory_space<vmem>>, %arg12: memref<18x16x128xbf16, #tpu.memory_space<vmem>>, %arg13: memref<18x16x128xbf16, #tpu.memory_space<vmem>>) attributes {dimension_semantics = [#tpu.dimension_semantics<parallel>], iteration_bounds = array<i64: 2>, scalar_prefetch = 0 : i64, scratch_operands = 2 : i64, tpu.core_type = #tpu.core_type<tc>, window_params = [{transform_indices = @transform_0, window_bounds = array<i64: 1, 8, 8, 128>}, {transform_indices = @transform_1, window_bounds = array<i64: 1, 16, 16, 128>}, {pipeline_mode = #tpu.pipeline_mode<synchronous>, transform_indices = @transform_2, window_bounds = array<i64: 128, 512>}, {pipeline_mode = #tpu.pipeline_mode<synchronous>, transform_indices = @transform_3, window_bounds = array<i64: 1, 512>}, {pipeline_mode = #tpu.pipeline_mode<synchronous>, transform_indices = @transform_4, window_bounds = array<i64: 3, 384, 128>}, {pipeline_mode = #tpu.pipeline_mode<synchronous>, transform_indices = @transform_5, window_bounds = array<i64: 1, 128>}, {pipeline_mode = #tpu.pipeline_mode<synchronous>, transform_indices = @transform_6, window_bounds = array<i64: 1, 128>}, {pipeline_mode = #tpu.pipeline_mode<synchronous>, transform_indices = @transform_7, window_bounds = array<i64: 3, 384, 128>}, {pipeline_mode = #tpu.pipeline_mode<synchronous>, transform_indices = @transform_8, window_bounds = array<i64: 1, 128>}, {pipeline_mode = #tpu.pipeline_mode<synchronous>, transform_indices = @transform_9, window_bounds = array<i64: 1, 128>}, {transform_indices = @transform_10, window_bounds = array<i64: 1, 16, 16, 128>}]} {
    %cst = arith.constant 0.000000e+00 : bf16
    %0 = vector.broadcast %cst : bf16 to vector<1x16x128xbf16>
    %c0 = arith.constant 0 : index
    %c0_0 = arith.constant 0 : index
    %c0_1 = arith.constant 0 : index
    %1 = vector.load %arg12[%c0, %c0_0, %c0_1] : memref<18x16x128xbf16, #tpu.memory_space<vmem>>, vector<1x16x128xbf16>
    tpu.vector_store %arg12[%c0, %c0_0, %c0_1], %0 {strides = array<i32>} : memref<18x16x128xbf16, #tpu.memory_space<vmem>>, vector<1x16x128xbf16>,
    %cst_2 = arith.constant 0.000000e+00 : bf16
    %2 = vector.broadcast %cst_2 : bf16 to vector<1x16x128xbf16>
    %c17 = arith.constant 17 : index
    %c0_3 = arith.constant 0 : index
    %c0_4 = arith.constant 0 : index
    %3 = vector.load %arg12[%c17, %c0_3, %c0_4] : memref<18x16x128xbf16, #tpu.memory_space<vmem>>, vector<1x16x128xbf16>
    tpu.vector_store %arg12[%c17, %c0_3, %c0_4], %2 {strides = array<i32>} : memref<18x16x128xbf16, #tpu.memory_space<vmem>>, vector<1x16x128xbf16>,
    %cst_5 = arith.constant 0.000000e+00 : bf16
    %4 = vector.broadcast %cst_5 : bf16 to vector<1x16x128xbf16>
    %c0_6 = arith.constant 0 : index
    %c0_7 = arith.constant 0 : index
    %c0_8 = arith.constant 0 : index
    %5 = vector.load %arg13[%c0_6, %c0_7, %c0_8] : memref<18x16x128xbf16, #tpu.memory_space<vmem>>, vector<1x16x128xbf16>
    tpu.vector_store %arg13[%c0_6, %c0_7, %c0_8], %4 {strides = array<i32>} : memref<18x16x128xbf16, #tpu.memory_space<vmem>>, vector<1x16x128xbf16>,
    %cst_9 = arith.constant 0.000000e+00 : bf16
    %6 = vector.broadcast %cst_9 : bf16 to vector<1x16x128xbf16>
    %c17_10 = arith.constant 17 : index
    %c0_11 = arith.constant 0 : index
    %c0_12 = arith.constant 0 : index
    %7 = vector.load %arg13[%c17_10, %c0_11, %c0_12] : memref<18x16x128xbf16, #tpu.memory_space<vmem>>, vector<1x16x128xbf16>
    tpu.vector_store %arg13[%c17_10, %c0_11, %c0_12], %6 {strides = array<i32>} : memref<18x16x128xbf16, #tpu.memory_space<vmem>>, vector<1x16x128xbf16>,
    %c0_13 = arith.constant 0 : index
    %c0_14 = arith.constant 0 : index
    %c0_15 = arith.constant 0 : index
    %c0_16 = arith.constant 0 : index
    %8 = vector.load %arg1[%c0_13, %c0_14, %c0_15, %c0_16] : memref<1x8x8x128xf32, #tpu.memory_space<vmem>>, vector<1x8x8x128xf32>
    %9 = vector.shape_cast %8 : vector<1x8x8x128xf32> to vector<8x8x128xf32>
    %10 = vector.shape_cast %9 : vector<8x8x128xf32> to vector<64x128xf32>
    %11 = arith.truncf %10 : vector<64x128xf32> to vector<64x128xbf16>
    %c0_17 = arith.constant 0 : index
    %c0_18 = arith.constant 0 : index
    %12 = vector.load %arg3[%c0_17, %c0_18] : memref<128x512xbf16, #tpu.memory_space<vmem>>, vector<128x512xbf16>
    %cst_19 = arith.constant dense<0.000000e+00> : vector<64x512xf32>
    %13 = tpu.matmul %11, %12, %cst_19 {dimension_numbers = #tpu.dot_dimension_numbers<[1], [0], [0], [1], [0, 0, 1, 1], [], []>} : vector<64x128xbf16>, vector<128x512xbf16>, vector<64x512xf32> -> vector<64x512xf32>
    %c0_20 = arith.constant 0 : index
    %c0_21 = arith.constant 0 : index
    %14 = vector.load %arg4[%c0_20, %c0_21] : memref<1x512xf32, #tpu.memory_space<vmem>>, vector<1x512xf32>
    %15 = vector.broadcast %14 : vector<1x512xf32> to vector<64x512xf32>
    %16 = arith.addf %13, %15 : vector<64x512xf32>
    %17 = vector.extract_strided_slice %16 {offsets = [0, 0], sizes = [64, 256], strides = [1, 1]} : vector<64x512xf32> to vector<64x256xf32>
    %18 = vector.shape_cast %17 : vector<64x256xf32> to vector<8x16x128xf32>
    %19 = arith.truncf %18 : vector<8x16x128xf32> to vector<8x16x128xbf16>
    %20 = vector.extract_strided_slice %16 {offsets = [0, 256], sizes = [64, 256], strides = [1, 1]} : vector<64x512xf32> to vector<64x256xf32>
    %21 = vector.shape_cast %20 : vector<64x256xf32> to vector<8x16x128xf32>
    %22 = arith.truncf %21 : vector<8x16x128xf32> to vector<8x16x128xbf16>
    %23 = vector.shape_cast %19 : vector<8x16x128xbf16> to vector<8x1x16x128xbf16>
    %24 = vector.shape_cast %22 : vector<8x16x128xbf16> to vector<8x1x16x128xbf16>
    %25 = tpu.concatenate %23, %24 in 1 : vector<8x1x16x128xbf16>, vector<8x1x16x128xbf16> -> vector<8x2x16x128xbf16>
    %26 = vector.shape_cast %25 : vector<8x2x16x128xbf16> to vector<16x16x128xbf16>
    %c0_22 = arith.constant 0 : index
    %c0_23 = arith.constant 0 : index
    %c0_24 = arith.constant 0 : index
    %c0_25 = arith.constant 0 : index
    %27 = vector.load %arg2[%c0_22, %c0_23, %c0_24, %c0_25] : memref<1x16x16x128xf32, #tpu.memory_space<vmem>>, vector<1x16x16x128xf32>
    %28 = vector.shape_cast %27 : vector<1x16x16x128xf32> to vector<16x16x128xf32>
    %29 = arith.truncf %28 : vector<16x16x128xf32> to vector<16x16x128xbf16>
    %30 = arith.addf %26, %29 : vector<16x16x128xbf16>
    %c1 = arith.constant 1 : index
    %c0_26 = arith.constant 0 : index
    %c0_27 = arith.constant 0 : index
    %31 = vector.load %arg12[%c1, %c0_26, %c0_27] : memref<18x16x128xbf16, #tpu.memory_space<vmem>>, vector<16x16x128xbf16>
    tpu.vector_store %arg12[%c1, %c0_26, %c0_27], %30 {strides = array<i32>} : memref<18x16x128xbf16, #tpu.memory_space<vmem>>, vector<16x16x128xbf16>,
    %c0_28 = arith.constant 0 : index
    %c0_29 = arith.constant 0 : index
    %32 = vector.load %arg6[%c0_28, %c0_29] : memref<1x128xf32, #tpu.memory_space<vmem>>, vector<1x128xf32>
    %c0_30 = arith.constant 0 : index
    %c0_31 = arith.constant 0 : index
    %33 = vector.load %arg7[%c0_30, %c0_31] : memref<1x128xf32, #tpu.memory_space<vmem>>, vector<1x128xf32>
    %c0_32 = arith.constant 0 : index
    %c0_33 = arith.constant 0 : index
    %c0_34 = arith.constant 0 : index
    %34 = vector.load %arg12[%c0_32, %c0_33, %c0_34] : memref<18x16x128xbf16, #tpu.memory_space<vmem>>, vector<18x16x128xbf16>
    %cst_35 = arith.constant 0.000000e+00 : bf16
    %35 = vector.broadcast %cst_35 : bf16 to vector<18x1x128xbf16>
    %36 = vector.extract_strided_slice %34 {offsets = [0, 0, 0], sizes = [18, 15, 128], strides = [1, 1, 1]} : vector<18x16x128xbf16> to vector<18x15x128xbf16>
    %37 = tpu.concatenate %35, %36 in 1 : vector<18x1x128xbf16>, vector<18x15x128xbf16> -> vector<18x16x128xbf16>
    %38 = vector.extract_strided_slice %34 {offsets = [0, 1, 0], sizes = [18, 15, 128], strides = [1, 1, 1]} : vector<18x16x128xbf16> to vector<18x15x128xbf16>
    %39 = tpu.concatenate %38, %35 in 1 : vector<18x15x128xbf16>, vector<18x1x128xbf16> -> vector<18x16x128xbf16>
    %40 = tpu.concatenate %37, %34, %39 in 2 : vector<18x16x128xbf16>, vector<18x16x128xbf16>, vector<18x16x128xbf16> -> vector<18x16x384xbf16>
    %cst_36 = arith.constant 0.000000e+00 : f32
    %41 = vector.broadcast %cst_36 : f32 to vector<256x128xf32>
    %42 = vector.extract_strided_slice %40 {offsets = [0, 0, 0], sizes = [16, 16, 384], strides = [1, 1, 1]} : vector<18x16x384xbf16> to vector<16x16x384xbf16>
    %43 = vector.shape_cast %42 : vector<16x16x384xbf16> to vector<256x384xbf16>
    %c0_37 = arith.constant 0 : index
    %c0_38 = arith.constant 0 : index
    %c0_39 = arith.constant 0 : index
    %44 = vector.load %arg5[%c0_37, %c0_38, %c0_39] : memref<3x384x128xbf16, #tpu.memory_space<vmem>>, vector<1x384x128xbf16>
    %45 = vector.shape_cast %44 : vector<1x384x128xbf16> to vector<384x128xbf16>
    %cst_40 = arith.constant dense<0.000000e+00> : vector<256x128xf32>
    %46 = tpu.matmul %43, %45, %cst_40 {dimension_numbers = #tpu.dot_dimension_numbers<[1], [0], [0], [1], [0, 0, 1, 1], [], []>} : vector<256x384xbf16>, vector<384x128xbf16>, vector<256x128xf32> -> vector<256x128xf32>
    %47 = arith.addf %41, %46 : vector<256x128xf32>
    %48 = vector.extract_strided_slice %40 {offsets = [1, 0, 0], sizes = [16, 16, 384], strides = [1, 1, 1]} : vector<18x16x384xbf16> to vector<16x16x384xbf16>
    %49 = vector.shape_cast %48 : vector<16x16x384xbf16> to vector<256x384xbf16>
    %c1_41 = arith.constant 1 : index
    %c0_42 = arith.constant 0 : index
    %c0_43 = arith.constant 0 : index
    %50 = vector.load %arg5[%c1_41, %c0_42, %c0_43] : memref<3x384x128xbf16, #tpu.memory_space<vmem>>, vector<1x384x128xbf16>
    %51 = vector.shape_cast %50 : vector<1x384x128xbf16> to vector<384x128xbf16>
    %cst_44 = arith.constant dense<0.000000e+00> : vector<256x128xf32>
    %52 = tpu.matmul %49, %51, %cst_44 {dimension_numbers = #tpu.dot_dimension_numbers<[1], [0], [0], [1], [0, 0, 1, 1], [], []>} : vector<256x384xbf16>, vector<384x128xbf16>, vector<256x128xf32> -> vector<256x128xf32>
    %53 = arith.addf %47, %52 : vector<256x128xf32>
    %54 = vector.extract_strided_slice %40 {offsets = [2, 0, 0], sizes = [16, 16, 384], strides = [1, 1, 1]} : vector<18x16x384xbf16> to vector<16x16x384xbf16>
    %55 = vector.shape_cast %54 : vector<16x16x384xbf16> to vector<256x384xbf16>
    %c2 = arith.constant 2 : index
    %c0_45 = arith.constant 0 : index
    %c0_46 = arith.constant 0 : index
    %56 = vector.load %arg5[%c2, %c0_45, %c0_46] : memref<3x384x128xbf16, #tpu.memory_space<vmem>>, vector<1x384x128xbf16>
    %57 = vector.shape_cast %56 : vector<1x384x128xbf16> to vector<384x128xbf16>
    %cst_47 = arith.constant dense<0.000000e+00> : vector<256x128xf32>
    %58 = tpu.matmul %55, %57, %cst_47 {dimension_numbers = #tpu.dot_dimension_numbers<[1], [0], [0], [1], [0, 0, 1, 1], [], []>} : vector<256x384xbf16>, vector<384x128xbf16>, vector<256x128xf32> -> vector<256x128xf32>
    %59 = arith.addf %53, %58 : vector<256x128xf32>
    %60 = vector.broadcast %32 : vector<1x128xf32> to vector<256x128xf32>
    %61 = arith.mulf %59, %60 : vector<256x128xf32>
    %62 = vector.broadcast %33 : vector<1x128xf32> to vector<256x128xf32>
    %63 = arith.addf %61, %62 : vector<256x128xf32>
    %cst_48 = arith.constant 0.000000e+00 : f32
    %64 = vector.broadcast %cst_48 : f32 to vector<256x128xf32>
    %65 = arith.cmpf oge, %63, %64 : vector<256x128xf32>
    %cst_49 = arith.constant 5.000000e-02 : f32
    %66 = vector.broadcast %cst_49 : f32 to vector<256x128xf32>
    %67 = arith.mulf %66, %63 : vector<256x128xf32>
    %68 = arith.select %65, %63, %67 : vector<256x128xi1>, vector<256x128xf32>
    %69 = vector.shape_cast %68 : vector<256x128xf32> to vector<16x16x128xf32>
    %70 = arith.truncf %69 : vector<16x16x128xf32> to vector<16x16x128xbf16>
    %c1_50 = arith.constant 1 : index
    %c0_51 = arith.constant 0 : index
    %c0_52 = arith.constant 0 : index
    %71 = vector.load %arg13[%c1_50, %c0_51, %c0_52] : memref<18x16x128xbf16, #tpu.memory_space<vmem>>, vector<16x16x128xbf16>
    tpu.vector_store %arg13[%c1_50, %c0_51, %c0_52], %70 {strides = array<i32>} : memref<18x16x128xbf16, #tpu.memory_space<vmem>>, vector<16x16x128xbf16>,
    %c0_53 = arith.constant 0 : index
    %c0_54 = arith.constant 0 : index
    %72 = vector.load %arg9[%c0_53, %c0_54] : memref<1x128xf32, #tpu.memory_space<vmem>>, vector<1x128xf32>
    %c0_55 = arith.constant 0 : index
    %c0_56 = arith.constant 0 : index
    %73 = vector.load %arg10[%c0_55, %c0_56] : memref<1x128xf32, #tpu.memory_space<vmem>>, vector<1x128xf32>
    %c0_57 = arith.constant 0 : index
    %c0_58 = arith.constant 0 : index
    %c0_59 = arith.constant 0 : index
    %74 = vector.load %arg13[%c0_57, %c0_58, %c0_59] : memref<18x16x128xbf16, #tpu.memory_space<vmem>>, vector<18x16x128xbf16>
    %cst_60 = arith.constant 0.000000e+00 : bf16
    %75 = vector.broadcast %cst_60 : bf16 to vector<18x1x128xbf16>
    %76 = vector.extract_strided_slice %74 {offsets = [0, 0, 0], sizes = [18, 15, 128], strides = [1, 1, 1]} : vector<18x16x128xbf16> to vector<18x15x128xbf16>
    %77 = tpu.concatenate %75, %76 in 1 : vector<18x1x128xbf16>, vector<18x15x128xbf16> -> vector<18x16x128xbf16>
    %78 = vector.extract_strided_slice %74 {offsets = [0, 1, 0], sizes = [18, 15, 128], strides = [1, 1, 1]} : vector<18x16x128xbf16> to vector<18x15x128xbf16>
    %79 = tpu.concatenate %78, %75 in 1 : vector<18x15x128xbf16>, vector<18x1x128xbf16> -> vector<18x16x128xbf16>
    %80 = tpu.concatenate %77, %74, %79 in 2 : vector<18x16x128xbf16>, vector<18x16x128xbf16>, vector<18x16x128xbf16> -> vector<18x16x384xbf16>
    %cst_61 = arith.constant 0.000000e+00 : f32
    %81 = vector.broadcast %cst_61 : f32 to vector<256x128xf32>
    %82 = vector.extract_strided_slice %80 {offsets = [0, 0, 0], sizes = [16, 16, 384], strides = [1, 1, 1]} : vector<18x16x384xbf16> to vector<16x16x384xbf16>
    %83 = vector.shape_cast %82 : vector<16x16x384xbf16> to vector<256x384xbf16>
    %c0_62 = arith.constant 0 : index
    %c0_63 = arith.constant 0 : index
    %c0_64 = arith.constant 0 : index
    %84 = vector.load %arg8[%c0_62, %c0_63, %c0_64] : memref<3x384x128xbf16, #tpu.memory_space<vmem>>, vector<1x384x128xbf16>
    %85 = vector.shape_cast %84 : vector<1x384x128xbf16> to vector<384x128xbf16>
    %cst_65 = arith.constant dense<0.000000e+00> : vector<256x128xf32>
    %86 = tpu.matmul %83, %85, %cst_65 {dimension_numbers = #tpu.dot_dimension_numbers<[1], [0], [0], [1], [0, 0, 1, 1], [], []>} : vector<256x384xbf16>, vector<384x128xbf16>, vector<256x128xf32> -> vector<256x128xf32>
    %87 = arith.addf %81, %86 : vector<256x128xf32>
    %88 = vector.extract_strided_slice %80 {offsets = [1, 0, 0], sizes = [16, 16, 384], strides = [1, 1, 1]} : vector<18x16x384xbf16> to vector<16x16x384xbf16>
    %89 = vector.shape_cast %88 : vector<16x16x384xbf16> to vector<256x384xbf16>
    %c1_66 = arith.constant 1 : index
    %c0_67 = arith.constant 0 : index
    %c0_68 = arith.constant 0 : index
    %90 = vector.load %arg8[%c1_66, %c0_67, %c0_68] : memref<3x384x128xbf16, #tpu.memory_space<vmem>>, vector<1x384x128xbf16>
    %91 = vector.shape_cast %90 : vector<1x384x128xbf16> to vector<384x128xbf16>
    %cst_69 = arith.constant dense<0.000000e+00> : vector<256x128xf32>
    %92 = tpu.matmul %89, %91, %cst_69 {dimension_numbers = #tpu.dot_dimension_numbers<[1], [0], [0], [1], [0, 0, 1, 1], [], []>} : vector<256x384xbf16>, vector<384x128xbf16>, vector<256x128xf32> -> vector<256x128xf32>
    %93 = arith.addf %87, %92 : vector<256x128xf32>
    %94 = vector.extract_strided_slice %80 {offsets = [2, 0, 0], sizes = [16, 16, 384], strides = [1, 1, 1]} : vector<18x16x384xbf16> to vector<16x16x384xbf16>
    %95 = vector.shape_cast %94 : vector<16x16x384xbf16> to vector<256x384xbf16>
    %c2_70 = arith.constant 2 : index
    %c0_71 = arith.constant 0 : index
    %c0_72 = arith.constant 0 : index
    %96 = vector.load %arg8[%c2_70, %c0_71, %c0_72] : memref<3x384x128xbf16, #tpu.memory_space<vmem>>, vector<1x384x128xbf16>
    %97 = vector.shape_cast %96 : vector<1x384x128xbf16> to vector<384x128xbf16>
    %cst_73 = arith.constant dense<0.000000e+00> : vector<256x128xf32>
    %98 = tpu.matmul %95, %97, %cst_73 {dimension_numbers = #tpu.dot_dimension_numbers<[1], [0], [0], [1], [0, 0, 1, 1], [], []>} : vector<256x384xbf16>, vector<384x128xbf16>, vector<256x128xf32> -> vector<256x128xf32>
    %99 = arith.addf %93, %98 : vector<256x128xf32>
    %100 = vector.broadcast %72 : vector<1x128xf32> to vector<256x128xf32>
    %101 = arith.mulf %99, %100 : vector<256x128xf32>
    %102 = vector.broadcast %73 : vector<1x128xf32> to vector<256x128xf32>
    %103 = arith.addf %101, %102 : vector<256x128xf32>
    %cst_74 = arith.constant 0.000000e+00 : f32
    %104 = vector.broadcast %cst_74 : f32 to vector<256x128xf32>
    %105 = arith.cmpf oge, %103, %104 : vector<256x128xf32>
    %cst_75 = arith.constant 5.000000e-02 : f32
    %106 = vector.broadcast %cst_75 : f32 to vector<256x128xf32>
    %107 = arith.mulf %106, %103 : vector<256x128xf32>
    %108 = arith.select %105, %103, %107 : vector<256x128xi1>, vector<256x128xf32>
    %109 = vector.shape_cast %108 : vector<256x128xf32> to vector<16x16x128xf32>
    %c0_76 = arith.constant 0 : index
    %c0_77 = arith.constant 0 : index
    %c0_78 = arith.constant 0 : index
    %c0_79 = arith.constant 0 : index
    %110 = vector.load %arg11[%c0_76, %c0_77, %c0_78, %c0_79] : memref<1x16x16x128xf32, #tpu.memory_space<vmem>>, vector<1x16x16x128xf32>
    %111 = vector.shape_cast %110 : vector<1x16x16x128xf32> to vector<16x16x128xf32>
    %112 = vector.shape_cast %109 : vector<16x16x128xf32> to vector<1x16x16x128xf32>
    tpu.vector_store %arg11[%c0_76, %c0_77, %c0_78, %c0_79], %112 {strides = array<i32>} : memref<1x16x16x128xf32, #tpu.memory_space<vmem>>, vector<1x16x16x128xf32>,
    return
  }
  func.func @transform_0(%arg0: i32) -> (i32, i32, i32, i32) {
    %c0_i32 = arith.constant 0 : i32
    %c0_i32_0 = arith.constant 0 : i32
    %c0_i32_1 = arith.constant 0 : i32
    %c0_i32_2 = arith.constant 0 : i32
    return %arg0, %c0_i32, %c0_i32_0, %c0_i32_1 : i32, i32, i32, i32
  }
  func.func @transform_1(%arg0: i32) -> (i32, i32, i32, i32) {
    %c0_i32 = arith.constant 0 : i32
    %c0_i32_0 = arith.constant 0 : i32
    %c0_i32_1 = arith.constant 0 : i32
    %c0_i32_2 = arith.constant 0 : i32
    return %arg0, %c0_i32, %c0_i32_0, %c0_i32_1 : i32, i32, i32, i32
  }
  func.func @transform_2(%arg0: i32) -> (i32, i32) {
    %c0_i32 = arith.constant 0 : i32
    %c0_i32_0 = arith.constant 0 : i32
    %c0_i32_1 = arith.constant 0 : i32
    return %c0_i32, %c0_i32_0 : i32, i32
  }
  func.func @transform_3(%arg0: i32) -> (i32, i32) {
    %c0_i32 = arith.constant 0 : i32
    %c0_i32_0 = arith.constant 0 : i32
    %c0_i32_1 = arith.constant 0 : i32
    return %c0_i32, %c0_i32_0 : i32, i32
  }
  func.func @transform_4(%arg0: i32) -> (i32, i32, i32) {
    %c0_i32 = arith.constant 0 : i32
    %c0_i32_0 = arith.constant 0 : i32
    %c0_i32_1 = arith.constant 0 : i32
    %c0_i32_2 = arith.constant 0 : i32
    return %c0_i32, %c0_i32_0, %c0_i32_1 : i32, i32, i32
  }
  func.func @transform_5(%arg0: i32) -> (i32, i32) {
    %c0_i32 = arith.constant 0 : i32
    %c0_i32_0 = arith.constant 0 : i32
    %c0_i32_1 = arith.constant 0 : i32
    return %c0_i32, %c0_i32_0 : i32, i32
  }
  func.func @transform_6(%arg0: i32) -> (i32, i32) {
    %c0_i32 = arith.constant 0 : i32
    %c0_i32_0 = arith.constant 0 : i32
    %c0_i32_1 = arith.constant 0 : i32
    return %c0_i32, %c0_i32_0 : i32, i32
  }
  func.func @transform_7(%arg0: i32) -> (i32, i32, i32) {
    %c0_i32 = arith.constant 0 : i32
    %c0_i32_0 = arith.constant 0 : i32
    %c0_i32_1 = arith.constant 0 : i32
    %c0_i32_2 = arith.constant 0 : i32
    return %c0_i32, %c0_i32_0, %c0_i32_1 : i32, i32, i32
  }
  func.func @transform_8(%arg0: i32) -> (i32, i32) {
    %c0_i32 = arith.constant 0 : i32
    %c0_i32_0 = arith.constant 0 : i32
    %c0_i32_1 = arith.constant 0 : i32
    return %c0_i32, %c0_i32_0 : i32, i32
  }
  func.func @transform_9(%arg0: i32) -> (i32, i32) {
    %c0_i32 = arith.constant 0 : i32
    %c0_i32_0 = arith.constant 0 : i32
    %c0_i32_1 = arith.constant 0 : i32
    return %c0_i32, %c0_i32_0 : i32, i32
  }
  func.func @transform_10(%arg0: i32) -> (i32, i32, i32, i32) {
    %c0_i32 = arith.constant 0 : i32
    %c0_i32_0 = arith.constant 0 : i32
    %c0_i32_1 = arith.constant 0 : i32
    %c0_i32_2 = arith.constant 0 : i32
    return %arg0, %c0_i32, %c0_i32_0, %c0_i32_1 : i32, i32, i32, i32
  }
}

</mosaic_0001>

<bundles_post_ra>
// kernel: up_forward.1
= control target key start
LH: loop header
LB: loop body
LE: loop exit
PB: predicated region body
PF: predicated region fallthrough
CT: control target
= control target key end

     0   :  { %s7399_s13 = smov 0   ;;  %s9826_s0 = inlined_call_operand.vmem [shape: f32[2,8,8,128], index: 0, kind: input, shape index: {}]   ;;  %s9827_s1 = inlined_call_operand.vmem [shape: f32[2,16,16,128], index: 1, kind: input, shape index: {}]   ;;  %s9828_s2 = inlined_call_operand.vmem [shape: bf16[128,512], index: 2, kind: input, shape index: {}]   ;;  %s9829_s3 = inlined_call_operand.vmem [shape: f32[1,512], index: 3, kind: input, shape index: {}]   ;;  %s9830_s4 = inlined_call_operand.vmem [shape: bf16[3,384,128], index: 4, kind: input, shape index: {}]   ;;  %s9831_s5 = inlined_call_operand.vmem [shape: f32[1,128], index: 5, kind: input, shape index: {}]   ;;  %s9832_s6 = inlined_call_operand.vmem [shape: f32[1,128], index: 6, kind: input, shape index: {}]   ;;  %s9833_s7 = inlined_call_operand.vmem [shape: bf16[3,384,128], index: 7, kind: input, shape index: {}]   ;;  %s9834_s8 = inlined_call_operand.vmem [shape: f32[1,128], index: 8, kind: input, shape index: {}]   ;;  %s9835_s9 = inlined_call_operand.vmem [shape: f32[1,128], index: 9, kind: input, shape index: {}]   ;;  %s9836_s10 = inlined_call_operand.vmem [shape: f32[2,16,16,128], index: 10, kind: output, shape index: {}]  }
   0x1 LB: > { %s5318_s14 = sadd.s32 4294967295, %s7340_s13   ;;  %p5322_p0 = scmp.ge.s32.totalorder %s7340_s13, 1  ;;  %s7340_s13 = sphi %s7399_s13, %s20_s13  }
   0x2   : > { %p322_p1 = scmp.lt.s32.totalorder %s7340_s13, 3 }
   0x4   : > { %p323_p2 = pnand %p5322_p0, %p322_p1 }
   0x6   : > { %326 = sbr.rel (%p323_p2) target bundleno = 1307 (0x51b), region = 60 }
   0xd   : > { %v7140_v0 = vld [vmem:[%s9828_s2 + $0x4] ss:$16 sps:$4 sm:$0xff]   ;;  %v7142_v1 = vld [vmem:[%s9828_s2] ss:$16 sps:$4 sm:$0xff]   ;;  %v9837_v2 = vmov 0   ;;  %p365_p3 = scmp.lt.s32.totalorder %s5318_s14, 1 }
   0xe   : > { %645 = vmatprep.mubr.bf16.mxu0 %v9837_v2  ;;  %718 = vmatprep.mubr.bf16.mxu1 %v9837_v2  ;;  %v7143_v3 = vld [vmem:[%s9828_s2 + $0xc] ss:$16 sps:$4 sm:$0xff]   ;;  %v7145_v4 = vld [vmem:[%s9828_s2 + $0x24] ss:$16 sps:$4 sm:$0xff]   ;;  %v7147_v5 = vld [vmem:[%s9828_s2 + $0x8] ss:$16 sps:$4 sm:$0xff]  }
   0xf   : > { %613 = vmatprep.subr.bf16.mxu0 %v7140_v0  ;;  %v7148_v6 = vld [vmem:[%s9828_s2 + $0x20] ss:$16 sps:$4 sm:$0xff]   ;;  %686 = vmatprep.subr.bf16.mxu1 %v7143_v3  ;;  %v7149_v7 = vld [vmem:[%s9828_s2 + $0x2c] ss:$16 sps:$4 sm:$0xff]   ;;  %v7151_v8 = vld [vmem:[%s9828_s2 + $0x44] ss:$16 sps:$4 sm:$0xff]  }
  0x10   : > { %614 = vmatpush1.bf16.msra.mxu0 %v7142_v1  ;;  %687 = vmatpush1.bf16.msra.mxu1 %v7147_v5  ;;  %v7153_v9 = vld [vmem:[%s9828_s2 + $0x28] ss:$16 sps:$4 sm:$0xff]   ;;  %v7154_v10 = vld [vmem:[%s9828_s2 + $0x40] ss:$16 sps:$4 sm:$0xff]   ;;  %v7155_v11 = vld [vmem:[%s9828_s2 + $0x4c] ss:$16 sps:$4 sm:$0xff]  }
  0x11   : > { %615 = vmatprep.subr.bf16.mxu0 %v7145_v4  ;;  %688 = vmatprep.subr.bf16.mxu1 %v7149_v7  ;;  %v7157_v12 = vld [vmem:[%s9828_s2 + $0x64] ss:$16 sps:$4 sm:$0xff]   ;;  %v7159_v13 = vld [vmem:[%s9828_s2 + $0x48] ss:$16 sps:$4 sm:$0xff]   ;;  %v7161_v14 = vld [vmem:[%s9828_s2 + $0x6c] ss:$16 sps:$4 sm:$0xff]  }
  0x12   : > { %v7160_v15 = vld [vmem:[%s9828_s2 + $0x60] ss:$16 sps:$4 sm:$0xff]   ;;  %v7163_v16 = vld [vmem:[%s9828_s2 + $0x84] ss:$16 sps:$4 sm:$0xff]   ;;  %v7165_v17 = vld [vmem:[%s9828_s2 + $0x68] ss:$16 sps:$4 sm:$0xff]  }
  0x13   : > { %v7167_v18 = vld [vmem:[%s9828_s2 + $0x8c] ss:$16 sps:$4 sm:$0xff]   ;;  %v7166_v19 = vld [vmem:[%s9828_s2 + $0x80] ss:$16 sps:$4 sm:$0xff]   ;;  %v7169_v20 = vld [vmem:[%s9828_s2 + $0xa4] ss:$16 sps:$4 sm:$0xff]  }
  0x14   : > { %616 = vmatpush1.bf16.msra.mxu0 %v7148_v6  ;;  %689 = vmatpush1.bf16.msra.mxu1 %v7153_v9  ;;  %s9969_s14 = smov (!%p365_p3, %s5318_s14), 1  ;;  %v7171_v21 = vld [vmem:[%s9828_s2 + $0x88] ss:$16 sps:$4 sm:$0xff]   ;;  %v7173_v22 = vld [vmem:[%s9828_s2 + $0xac] ss:$16 sps:$4 sm:$0xff]   ;;  %v7192_v34 = vld [vmem:[%s9830_s4 + $0x100] sm:$0xff]  }
  0x15   : > { %617 = vmatprep.subr.bf16.mxu0 %v7151_v8  ;;  %690 = vmatprep.subr.bf16.mxu1 %v7155_v11  ;;  %v7172_v23 = vld [vmem:[%s9828_s2 + $0xa0] ss:$16 sps:$4 sm:$0xff]   ;;  %v7175_v24 = vld [vmem:[%s9828_s2 + $0xc4] ss:$16 sps:$4 sm:$0xff]   ;;  %s5703_s27 = sshll.u32 %s9969_s14, 6  ;;  %v7196_v39 = vld [vmem:[%s9830_s4 + $0x108] sm:$0xff]  }
  0x16   : > { %v7177_v25 = vld [vmem:[%s9828_s2 + $0xa8] ss:$16 sps:$4 sm:$0xff]   ;;  %v7179_v26 = vld [vmem:[%s9828_s2 + $0xcc] ss:$16 sps:$4 sm:$0xff]   ;;  %v7178_v27 = vld [vmem:[%s9828_s2 + $0xc0] ss:$16 sps:$4 sm:$0xff]   ;;  %s7503_s20 = scalar_lea.vmem %s9826_s0, %s5703_s27 }
  0x17   : > { %v7181_v28 = vld [vmem:[%s9828_s2 + $0xe4] ss:$16 sps:$4 sm:$0xff]   ;;  %v7183_v29 = vld [vmem:[%s9828_s2 + $0xc8] ss:$16 sps:$4 sm:$0xff]   ;;  %v7184_v30 = vld [vmem:[%s9828_s2 + $0xe0] ss:$16 sps:$4 sm:$0xff]  }
  0x18   : > { %618 = vmatpush1.bf16.msra.mxu0 %v7154_v10  ;;  %691 = vmatpush1.bf16.msra.mxu1 %v7159_v13  ;;  %v7185_v31 = vld [vmem:[%s9828_s2 + $0xec] ss:$16 sps:$4 sm:$0xff]   ;;  %v387_v32 = vld [vmem:[%s7503_s20] sm:$0xff]  ;;  %v7187_v35 = vld [vmem:[%s9828_s2 + $0xe8] ss:$16 sps:$4 sm:$0xff]   ;;  %v1199_v10 = vrot.slane %v9837_v2, 7 }
  0x19   : > { %619 = vmatprep.subr.bf16.mxu0 %v7157_v12  ;;  %692 = vmatprep.subr.bf16.mxu1 %v7161_v14  ;;  %v388_v33 = vld [vmem:[%s7503_s20 + $0x8] sm:$0xff]  ;;  %v7188_v37 = vld [vmem:[%s9830_s4 + $0x40] sm:$0xff]   ;;  %v389_v40 = vld [vmem:[%s7503_s20 + $0x10] sm:$0xff]  ;;  %vm1340_vm0 = vcmask 1040384   ;;  %vm1341_vm1 = vsmask.f32 256 }
  0x1a   : > { %v395_v36 = vpack.c.bf16 %v388_v33, %v387_v32  ;;  %v7193_v38 = vld [vmem:[%s9830_s4 + $0xc0] sm:$0xff]   ;;  %v390_v41 = vld [vmem:[%s7503_s20 + $0x18] sm:$0xff]  ;;  %v7190_v43 = vld [vmem:[%s9830_s4 + $0x48] sm:$0xff]   ;;  %v9881_v13 = vmov 0  ;;  %s5704_s18 = sshll.u32 %s9969_s14, 8  ;;  %vm1415_vm3 = vcmask 1047552  }
  0x1b   : > { %v7189_v42 = vld [vmem:[%s9830_s4] sm:$0xff]   ;;  %v7197_v44 = vld [vmem:[%s9830_s4 + $0xc8] sm:$0xff]   ;;  %v7200_v45 = vld [vmem:[%s9830_s4 + $0x110] sm:$0xff]   ;;  %v396_v47 = vpack.c.bf16 %v390_v41, %v389_v40  ;;  %s7675_s24 = scalar_lea.vmem %s9827_s1, %s5704_s18  ;;  %vm1416_vm4 = vsmask.f32 7424  ;;  %s9703_s29 = scalar_lea.vmem %s9836_s10, %s5704_s18 }
  0x1c   : > { %620 = vmatpush1.bf16.msra.mxu0 %v7160_v15  ;;  %693 = vmatpush1.bf16.msra.mxu1 %v7165_v17  ;;  %v7191_v46 = vld [vmem:[%s9830_s4 + $0x8] sm:$0xff]   ;;  %v7194_v48 = vld [vmem:[%s9830_s4 + $0x50] sm:$0xff]   ;;  %v7204_v50 = vld [vmem:[%s9830_s4 + $0x118] sm:$0xff]  }
  0x1d   : > { %621 = vmatprep.subr.bf16.mxu0 %v7163_v16  ;;  %694 = vmatprep.subr.bf16.mxu1 %v7167_v18  ;;  %v7201_v49 = vld [vmem:[%s9830_s4 + $0xd0] sm:$0xff]   ;;  %v391_v51 = vld [vmem:[%s7503_s20 + $0x20] sm:$0xff]  ;;  %v392_v52 = vld [vmem:[%s7503_s20 + $0x28] sm:$0xff] }
  0x1e   : > { %v7195_v53 = vld [vmem:[%s9830_s4 + $0x10] sm:$0xff]   ;;  %v7198_v54 = vld [vmem:[%s9830_s4 + $0x58] sm:$0xff]   ;;  %v7202_v57 = vld [vmem:[%s9830_s4 + $0x60] sm:$0xff]   ;;  %v397_v58 = vpack.c.bf16 %v392_v52, %v391_v51 }
  0x1f   : > { %v7199_v55 = vld [vmem:[%s9830_s4 + $0x18] sm:$0xff]   ;;  %v7203_v59 = vld [vmem:[%s9830_s4 + $0x20] sm:$0xff]   ;;  %v7206_v60 = vld [vmem:[%s9830_s4 + $0x68] sm:$0xff]  }
  0x20   : > { %622 = vmatpush1.bf16.msra.mxu0 %v7166_v19  ;;  %695 = vmatpush1.bf16.msra.mxu1 %v7171_v21  ;;  %v7205_v56 = vld [vmem:[%s9830_s4 + $0xd8] sm:$0xff]   ;;  %v393_v61 = vld [vmem:[%s7503_s20 + $0x30] sm:$0xff]  ;;  %v7207_v0 = vld [vmem:[%s9830_s4 + $0x28] sm:$0xff]  }
  0x21   : > { %623 = vmatprep.subr.bf16.mxu0 %v7169_v20  ;;  %696 = vmatprep.subr.bf16.mxu1 %v7173_v22  ;;  %v394_v62 = vld [vmem:[%s7503_s20 + $0x38] sm:$0xff]  ;;  %v7208_v1 = vld [vmem:[%s9830_s4 + $0x120] sm:$0xff]   ;;  %v7210_v3 = vld [vmem:[%s9830_s4 + $0x70] sm:$0xff]   ;;  %v433_v20 = vlaneseq }
  0x22   : > { %v398_v63 = vpack.c.bf16 %v394_v62, %v393_v61  ;;  %v7209_v4 = vld [vmem:[%s9830_s4 + $0xe0] sm:$0xff]   ;;  %v7211_v5 = vld [vmem:[%s9830_s4 + $0x30] sm:$0xff]   ;;  %v7212_v6 = vld [vmem:[%s9830_s4 + $0x128] sm:$0xff]  }
  0x23   : > { %v7214_v7 = vld [vmem:[%s9830_s4 + $0x78] sm:$0xff]   ;;  %v7213_v8 = vld [vmem:[%s9830_s4 + $0xe8] sm:$0xff]   ;;  %v7216_v11 = vld [vmem:[%s9830_s4 + $0x130] sm:$0xff]  }
  0x24   : > { %624 = vmatpush1.bf16.msra.mxu0 %v7172_v23  ;;  %697 = vmatpush1.bf16.msra.mxu1 %v7177_v25  ;;  %v7215_v9 = vld [vmem:[%s9830_s4 + $0x38] sm:$0xff]   ;;  %v7217_v12 = vld [vmem:[%s9830_s4 + $0xf0] sm:$0xff]   ;;  %vm7623_vm2 = vmand %vm1340_vm0, %vm1341_vm1  ;;  %v434_v23 = vshrl.u32 %v433_v20, 7 }
  0x25   : > { %625 = vmatprep.subr.bf16.mxu0 %v7175_v24  ;;  %698 = vmatprep.subr.bf16.mxu1 %v7179_v26  ;;  %v9882_v13 = vsel %vm7623_vm2, 4294967295, %v9881_v13  ;;  %v7629_v14 = vsel %vm7623_vm2, 0, %v1199_v10  ;;  %v7218_v15 = vld [vmem:[%s9830_s4 + $0x138] sm:$0xff]   ;;  %v7641_v17 = vld [vmem:[%s9830_s4 + $0x140] sm:$0xff]   ;;  %v7227_v19 = vld [vmem:[%s9830_s4 + $0x88] sm:$0xff]  }
  0x26   : > { %9883 = vst [vmem:[#allocation4_spill] sm:$0xff] %v9882_v13  ;;  %9884 = vst [vmem:[#allocation5_spill] sm:$0xff] %v7629_v14  ;;  %v7219_v16 = vld [vmem:[%s9830_s4 + $0xf8] sm:$0xff]   ;;  %v7225_v18 = vld [vmem:[%s9830_s4 + $0x80] sm:$0xff]   ;;  %v435_v24 = vsub.s32 0, %v434_v23 }
  0x27   : > { %v7229_v21 = vld [vmem:[%s9830_s4 + $0x90] sm:$0xff]   ;;  %v7230_v22 = vld [vmem:[%s9830_s4 + $0x98] sm:$0xff]   ;;  %v431_v25 = vld [vmem:[%s9829_s3] sm:$0xf]  ;;  %v7343_v26 = vmov 1935823168  }
  0x28   : > { %626 = vmatpush1.bf16.msra.mxu0 %v7178_v27  ;;  %699 = vmatpush1.bf16.msra.mxu1 %v7183_v29  ;;  %v808_v27 = vunpack.c.l.s4 %v7343_v26  ;;  %v443_v29 = vsub.s32 2, %v434_v23  ;;  %v7232_v32 = vld [vmem:[%s9830_s4 + $0xa8] sm:$0xff]   ;;  %v7666_v33 = vrot.slane %v431_v25, %v435_v24  ;;  %v7234_v51 = vld [vmem:[%s9830_s4 + $0xb0] sm:$0xff]   ;;  %vm8205_vm5 = vmand %vm1415_vm3, %vm1416_vm4 }
  0x29   : > { %627 = vmatprep.subr.bf16.mxu0 %v7181_v28  ;;  %700 = vmatprep.subr.bf16.mxu1 %v7185_v31  ;;  %v439_v28 = vsub.s32 1, %v434_v23  ;;  %v447_v31 = vsub.s32 3, %v434_v23 }
  0x2c   : > { %628 = vmatpush1.bf16.msra.mxu0 %v7184_v30  ;;  %701 = vmatpush1.bf16.msra.mxu1 %v7187_v35  ;;  %v7231_v30 = vld [vmem:[%s9830_s4 + $0xa0] sm:$0xff]   ;;  %v7668_v35 = vrot.slane %v431_v25, %v439_v28 }
  0x2d   : > { %5706 = vmatprep.subr.bf16.mxu0 %v7192_v34  ;;  %5842 = vmatprep.subr.bf16.mxu1 %v7188_v37  ;;  %v809_v34 = vunpack.c.0.s8 %v808_v27 }
  0x2f   : > { %646 = vmatmul.mubr.bf16.vlgmr.msra.gmra.mrb[0].mxu0 %v395_v36  ;;  %719 = vmatmul.mubr.bf16.vlgmr.msra.gmra.mrb[0].mxu1 %v395_v36  ;;  %v7677_v36 = vrot.slane %v431_v25, %v443_v29  ;;  %v7682_v41 = vsub.s32 %v809_v34, %v434_v23 }
  0x30   : > { %655 = vmatprep.mubr.bf16.mxu0 %v9837_v2  ;;  %5707 = vmatpush3.bf16.msra.mxu0 %v7193_v38  ;;  %v7679_v38 = vrot.slane %v431_v25, %v447_v31 }
  0x31   : > { %5708 = vmatprep.subr.bf16.mxu0 %v7196_v39  ;;  %728 = vmatprep.mubr.bf16.mxu1 %v9837_v2 }
  0x32   : > { %5843 = vmatpush3.bf16.msra.mxu1 %v7189_v42 }
  0x33   : > { %5844 = vmatprep.subr.bf16.mxu1 %v7190_v43 }
  0x34   : > { %5709 = vmatpush3.bf16.msra.mxu0 %v7197_v44 }
  0x35   : > { %5710 = vmatprep.subr.bf16.mxu0 %v7200_v45  ;;  %v1095_v45 = vld [vmem:[%s7675_s24] sm:$0xff] }
  0x36   : > { %5845 = vmatpush3.bf16.msra.mxu1 %v7191_v46  ;;  %v1096_v46 = vld [vmem:[%s7675_s24 + $0x8] sm:$0xff] }
  0x37   : > { %656 = vmatmul.mubr.bf16.gmra.mrb[4].mxu0 %v396_v47  ;;  %5846 = vmatprep.subr.bf16.mxu1 %v7194_v48  ;;  %v1127_v62 = vpack.c.bf16 %v1096_v46, %v1095_v45 }
  0x38   : > { %665 = vmatprep.mubr.bf16.mxu0 %v9837_v2  ;;  %5711 = vmatpush3.bf16.msra.mxu0 %v7201_v49 }
  0x39   : > { %729 = vmatmul.mubr.bf16.gmra.mrb[4].mxu1 %v396_v47  ;;  %5712 = vmatprep.subr.bf16.mxu0 %v7204_v50 }
  0x3a   : > { %738 = vmatprep.mubr.bf16.mxu1 %v9837_v2  ;;  %5847 = vmatpush3.bf16.msra.mxu1 %v7195_v53 }
  0x3b   : > { %5848 = vmatprep.subr.bf16.mxu1 %v7198_v54 }
  0x3c   : > { %5713 = vmatpush3.bf16.msra.mxu0 %v7205_v56 }
  0x3d   : > { %5714 = vmatprep.subr.bf16.mxu0 %v7208_v1 }
  0x3e   : > { %5849 = vmatpush3.bf16.msra.mxu1 %v7199_v55 }
  0x3f   : > { %666 = vmatmul.mubr.bf16.gmra.mrb[8].mxu0 %v397_v58  ;;  %5850 = vmatprep.subr.bf16.mxu1 %v7202_v57  ;;  %v7235_v57 = vld [vmem:[%s9830_s4 + $0xb8] sm:$0xff]  }
  0x40   : > { %675 = vmatprep.mubr.bf16.mxu0 %v9837_v2  ;;  %5715 = vmatpush3.bf16.msra.mxu0 %v7209_v4 }
  0x41   : > { %739 = vmatmul.mubr.bf16.gmra.mrb[8].mxu1 %v397_v58  ;;  %5716 = vmatprep.subr.bf16.mxu0 %v7212_v6  ;;  %v1097_v58 = vld [vmem:[%s7675_s24 + $0x10] sm:$0xff] }
  0x42   : > { %748 = vmatprep.mubr.bf16.mxu1 %v9837_v2  ;;  %5851 = vmatpush3.bf16.msra.mxu1 %v7203_v59  ;;  %v1098_v59 = vld [vmem:[%s7675_s24 + $0x18] sm:$0xff] }
  0x43   : > { %5852 = vmatprep.subr.bf16.mxu1 %v7206_v60 }
  0x44   : > { %5717 = vmatpush3.bf16.msra.mxu0 %v7213_v8 }
  0x45   : > { %5718 = vmatprep.subr.bf16.mxu0 %v7216_v11 }
  0x46   : > { %5853 = vmatpush3.bf16.msra.mxu1 %v7207_v0 }
  0x47   : > { %676 = vmatmul.mubr.bf16.gmra.mrb[12].mxu0 %v398_v63  ;;  %5854 = vmatprep.subr.bf16.mxu1 %v7210_v3 }
  0x48   : > { %5719 = vmatpush3.bf16.msra.mxu0 %v7217_v12  ;;  %v1099_v12 = vld [vmem:[%s7675_s24 + $0x20] sm:$0xff] }
  0x49   : > { %749 = vmatmul.mubr.bf16.gmra.mrb[12].mxu1 %v398_v63  ;;  %5720 = vmatprep.subr.bf16.mxu0 %v7218_v15  ;;  %v1100_v15 = vld [vmem:[%s7675_s24 + $0x28] sm:$0xff] }
  0x4a   : > { %2175 = vmatprep.mubr.bf16.mxu1 %v9837_v2  ;;  %5855 = vmatpush3.bf16.msra.mxu1 %v7211_v5  ;;  %v1129_v34 = vpack.c.bf16 %v1100_v15, %v1099_v12 }
  0x4b   : > { %5856 = vmatprep.subr.bf16.mxu1 %v7214_v7 }
  0x4c   : > { %5721 = vmatpush3.bf16.msra.mxu0 %v7219_v16 }
  0x4d   : > { %6522 = vmatprep.subr.bf16.mxu0 %v7641_v17 }
  0x4e   : > { %5857 = vmatpush3.bf16.msra.mxu1 %v7215_v9  ;;  %v1128_v9 = vpack.c.bf16 %v1098_v59, %v1097_v58 }
  0x4f   : > { %6570 = vmatprep.subr.bf16.mxu1 %v7225_v18 }
  0x51   : > { %2176 = vmatmul.mubr.bf16.vlgmr.msra.gmra.mrb[16].mxu1 %v7629_v14 }
  0x52   : > { %6571 = vmatpush3.bf16.msra.mxu1 %v7225_v18 }
  0x53   : > { %6572 = vmatprep.subr.bf16.mxu1 %v7227_v19 }
  0x56   : > { %6573 = vmatpush3.bf16.msra.mxu1 %v7227_v19 }
  0x57   : > { %6574 = vmatprep.subr.bf16.mxu1 %v7229_v21 }
  0x5a   : > { %6575 = vmatpush3.bf16.msra.mxu1 %v7229_v21 }
  0x5b   : > { %6576 = vmatprep.subr.bf16.mxu1 %v7230_v22 }
  0x5e   : > { %6577 = vmatpush3.bf16.msra.mxu1 %v7230_v22 }
  0x5f   : > { %6578 = vmatprep.subr.bf16.mxu1 %v7231_v30 }
  0x62   : > { %6579 = vmatpush3.bf16.msra.mxu1 %v7231_v30 }
  0x63   : > { %6580 = vmatprep.subr.bf16.mxu1 %v7232_v32 }
  0x66   : > { %6581 = vmatpush3.bf16.msra.mxu1 %v7232_v32 }
  0x67   : > { %6582 = vmatprep.subr.bf16.mxu1 %v7234_v51 }
  0x6a   : > { %6583 = vmatpush3.bf16.msra.mxu1 %v7234_v51 }
  0x6b   : > { %6584 = vmatprep.subr.bf16.mxu1 %v7235_v57 }
  0x6e   : > { %6585 = vmatpush3.bf16.msra.mxu1 %v7235_v57 }
 0x102   : > { %v647_v37 = vpop.f32.mrb[0].mxu0  ;;  %v720_v44 = vpop.f32.mrb[0].mxu1 }
 0x103   : > { %v648_v39 = vadd.f32 %v647_v37, %v7666_v33  ;;  %v649_v40 = vpop.f32.mrb[1].mxu0  ;;  %v721_v49 = vadd.f32 %v720_v44, %v7677_v36  ;;  %v722_v50 = vpop.f32.mrb[1].mxu1 }
 0x104   : > { %v650_v42 = vadd.f32 %v649_v40, %v7668_v35  ;;  %v651_v43 = vpop.f32.mrb[2].mxu0  ;;  %v723_v55 = vadd.f32 %v722_v50, %v7679_v38  ;;  %v724_v56 = vpop.f32.mrb[2].mxu1 }
 0x105   : > { %v652_v47 = vadd.f32 %v651_v43, %v7666_v33  ;;  %v653_v48 = vpop.f32.mrb[3].mxu0  ;;  %v725_v60 = vadd.f32 %v724_v56, %v7677_v36  ;;  %v726_v61 = vpop.f32.mrb[3].mxu1 }
 0x106   : > { %v775_v52 = vcombine.low %v648_v39, %v650_v42  ;;  %v776_v53 = vcombine.high %v648_v39, %v650_v42  ;;  %v654_v54 = vadd.f32 %v653_v48, %v7668_v35  ;;  %v943_v4 = vcombine.low %v721_v49, %v723_v55 }
 0x107   : > { %v944_v5 = vcombine.high %v721_v49, %v723_v55  ;;  %v727_v6 = vadd.f32 %v726_v61, %v7679_v38 }
 0x108   : > { %v813_v63 = vrot.slane %v775_v52, %v7682_v41  ;;  %v820_v0 = vrot.slane %v776_v53, %v7682_v41  ;;  %v777_v1 = vcombine.low %v652_v47, %v654_v54  ;;  %v778_v3 = vcombine.high %v652_v47, %v654_v54 }
 0x109   : > { %v981_v16 = vrot.slane %v943_v4, %v7682_v41  ;;  %v988_v18 = vrot.slane %v944_v5, %v7682_v41  ;;  %v945_v19 = vcombine.low %v725_v60, %v727_v6  ;;  %v946_v20 = vcombine.high %v725_v60, %v727_v6  ;;  %v7221_v60 = vld [vmem:[%s9830_s4 + $0x148] sm:$0xff]  }
 0x10a   : > { %v827_v7 = vrot.slane %v777_v1, %v7682_v41  ;;  %v834_v8 = vrot.slane %v778_v3, %v7682_v41  ;;  %v919_v10 = vpack.c.bf16 %v820_v0, %v813_v63  ;;  %v657_v11 = vpop.f32.mrb[4].mxu0  ;;  %v1101_v63 = vld [vmem:[%s7675_s24 + $0x30] sm:$0xff]  ;;  %v1102_v0 = vld [vmem:[%s7675_s24 + $0x38] sm:$0xff] }
 0x10b   : > { %v659_v21 = vpop.f32.mrb[5].mxu0  ;;  %v658_v24 = vadd.f32 %v657_v11, %v7666_v33  ;;  %v1087_v28 = vpack.c.bf16 %v988_v18, %v981_v16  ;;  %v7714_v29 = vrot.slane %v945_v19, %v7682_v41  ;;  %v7717_v30 = vrot.slane %v946_v20, %v7682_v41 }
 0x10c   : > { %v920_v22 = vpack.c.bf16 %v834_v8, %v827_v7  ;;  %v7709_v23 = vadd.bf16 %v1127_v62, %v919_v10  ;;  %v660_v25 = vadd.f32 %v659_v21, %v7668_v35  ;;  %v661_v26 = vpop.f32.mrb[6].mxu0  ;;  %v730_v27 = vpop.f32.mrb[4].mxu1  ;;  %v1130_v19 = vpack.c.bf16 %v1102_v0, %v1101_v63 }
 0x10d   : > { %v663_v31 = vpop.f32.mrb[7].mxu0  ;;  %v732_v32 = vpop.f32.mrb[5].mxu1  ;;  %v662_v40 = vadd.f32 %v661_v26, %v7666_v33  ;;  %v7723_v43 = vadd.bf16 %v1128_v9, %v1087_v28  ;;  %v1088_v44 = vpack.c.bf16 %v7717_v30, %v7714_v29  ;;  %v731_v56 = vadd.f32 %v730_v27, %v7677_v36 }
 0x10e   : > { %1709 = vmatprep.mubr.bf16.mxu0 %v7709_v23  ;;  %2183 = vmatprep.mubr.bf16.mxu1 %v7709_v23  ;;  %v9846_v37 = vshrl.u32 %v7709_v23, 16  ;;  %v779_v39 = vcombine.low %v658_v24, %v660_v25  ;;  %v734_v42 = vpop.f32.mrb[6].mxu1  ;;  %v780_v45 = vcombine.high %v658_v24, %v660_v25  ;;  %v664_v46 = vadd.f32 %v663_v31, %v7668_v35 }
 0x10f   : > { %v736_v47 = vpop.f32.mrb[7].mxu1  ;;  %v9848_v49 = vshll.u32 %v7709_v23, 16  ;;  %v9843_v51 = vshrl.u32 %v7723_v43, 16  ;;  %v7741_v58 = vadd.bf16 %v1129_v34, %v920_v22  ;;  %v733_v61 = vadd.f32 %v732_v32, %v7679_v38 }
 0x110   : > { %v1206_v48 = vrot.slane %v9846_v37, 7  ;;  %v7732_v50 = vrot.slane %v779_v39, %v7682_v41  ;;  %v7736_v52 = vrot.slane %v780_v45, %v7682_v41  ;;  %v781_v54 = vcombine.low %v662_v40, %v664_v46  ;;  %v1103_v39 = vld [vmem:[%s7675_s24 + $0x40] sm:$0xff] }
 0x111   : > { %v782_v55 = vcombine.high %v662_v40, %v664_v46  ;;  %v1213_v3 = vrot.slane %v9843_v51, 7  ;;  %v735_v8 = vadd.f32 %v734_v42, %v7677_v36  ;;  %v9847_v11 = vshll.u32 %v7723_v43, 16 }
 0x112   : > { %v1209_v53 = vor.u32 %v9848_v49, %v1206_v48  ;;  %v667_v57 = vpop.f32.mrb[8].mxu0  ;;  %v921_v59 = vpack.c.bf16 %v7736_v52, %v7732_v50  ;;  %v7756_v4 = vrot.slane %v781_v54, %v7682_v41  ;;  %v947_v15 = vcombine.low %v731_v56, %v733_v61  ;;  %v1104_v48 = vld [vmem:[%s7675_s24 + $0x48] sm:$0xff] }
 0x113   : > { %v669_v62 = vpop.f32.mrb[9].mxu0  ;;  %v7759_v5 = vrot.slane %v782_v55, %v7682_v41  ;;  %v948_v16 = vcombine.high %v731_v56, %v733_v61  ;;  %v737_v20 = vadd.f32 %v736_v47, %v7679_v38  ;;  %v1216_v22 = vor.u32 %v9847_v11, %v1213_v3  ;;  %v7223_v55 = vld [vmem:[%s9830_s4 + $0x158] sm:$0xff]   ;;  %v7226_v52 = vld [vmem:[%s9830_s4 + $0x168] sm:$0xff]  }
 0x114   : > { %v1344_v1 = vsel %vm7623_vm2, 0, %v1209_v53  ;;  %v671_v6 = vpop.f32.mrb[10].mxu0  ;;  %v740_v7 = vpop.f32.mrb[8].mxu1  ;;  %v9841_v24 = vshrl.u32 %v7741_v58, 16  ;;  %v7776_v25 = vrot.slane %v947_v15, %v7682_v41  ;;  %v668_v30 = vadd.f32 %v667_v57, %v7666_v33  ;;  %v1122_v11 = vld [vmem:[%s7675_s24 + $0xd8] sm:$0xff] }
 0x115   : > { %1710 = vmatmul.mubr.bf16.vlgmr.msra.gmra.mrb[16].mxu0 %v1344_v1  ;;  %2184 = vmatmul.mubr.bf16.gmra.mrb[20].mxu1 %v1344_v1  ;;  %v673_v9 = vpop.f32.mrb[11].mxu0  ;;  %v742_v10 = vpop.f32.mrb[9].mxu1  ;;  %v922_v12 = vpack.c.bf16 %v7759_v5, %v7756_v4  ;;  %v7779_v26 = vrot.slane %v948_v16, %v7682_v41  ;;  %v949_v27 = vcombine.low %v735_v8, %v737_v20  ;;  %v7801_v47 = vsel %vm7623_vm2, 0, %v1216_v22 }
 0x116   : > { %6523 = vmatpush3.bf16.msra.mxu0 %v7641_v17  ;;  %1717 = vmatprep.mubr.bf16.mxu0 %v7723_v43  ;;  %v744_v18 = vpop.f32.mrb[10].mxu1  ;;  %v7222_v17 = vld [vmem:[%s9830_s4 + $0x150] sm:$0xff]   ;;  %v950_v28 = vcombine.high %v735_v8, %v737_v20  ;;  %v670_v31 = vadd.f32 %v669_v62, %v7668_v35  ;;  %v7787_v34 = vadd.bf16 %v1130_v19, %v1088_v44  ;;  %v1220_v44 = vrot.slane %v9841_v24, 7 }
 0x117   : > { %2191 = vmatprep.mubr.bf16.mxu1 %v7723_v43  ;;  %6524 = vmatprep.subr.bf16.mxu0 %v7221_v60  ;;  %v746_v21 = vpop.f32.mrb[11].mxu1  ;;  %v1089_v29 = vpack.c.bf16 %v7779_v26, %v7776_v25  ;;  %v7791_v40 = vrot.slane %v949_v27, %v7682_v41  ;;  %v672_v45 = vadd.f32 %v671_v6, %v7666_v33  ;;  %v9844_v1 = vshll.u32 %v7741_v58, 16  ;;  %v1111_v25 = vld [vmem:[%s7675_s24 + $0x80] sm:$0xff]  ;;  %v1112_v26 = vld [vmem:[%s7675_s24 + $0x88] sm:$0xff] }
 0x118   : > { %v7794_v42 = vrot.slane %v950_v28, %v7682_v41  ;;  %v783_v53 = vcombine.low %v668_v30, %v670_v31  ;;  %v784_v54 = vcombine.high %v668_v30, %v670_v31  ;;  %v674_v61 = vadd.f32 %v673_v9, %v7668_v35 }
 0x119   : > { %v741_v62 = vadd.f32 %v740_v7, %v7677_v36  ;;  %v1131_v8 = vpack.c.bf16 %v1104_v48, %v1103_v39  ;;  %v1223_v19 = vor.u32 %v9844_v1, %v1220_v44  ;;  %v9839_v20 = vshrl.u32 %v7787_v34, 16  ;;  %v1105_v48 = vld [vmem:[%s7675_s24 + $0x50] sm:$0xff]  ;;  %v1106_v44 = vld [vmem:[%s7675_s24 + $0x58] sm:$0xff]  ;;  %v1120_v1 = vld [vmem:[%s7675_s24 + $0xc8] sm:$0xff] }
 0x11a   : > { %6525 = vmatpush3.bf16.msra.mxu0 %v7221_v60  ;;  %v7785_v32 = vpop.f32.mrb[12].mxu0  ;;  %v1090_v60 = vpack.c.bf16 %v7794_v42, %v7791_v40  ;;  %v7823_v3 = vrot.slane %v783_v53, %v7682_v41  ;;  %v7828_v9 = vrot.slane %v784_v54, %v7682_v41  ;;  %v785_v7 = vcombine.low %v672_v45, %v674_v61  ;;  %v1119_v53 = vld [vmem:[%s7675_s24 + $0xc0] sm:$0xff] }
 0x11b   : > { %6526 = vmatprep.subr.bf16.mxu0 %v7222_v17  ;;  %v7797_v46 = vpop.f32.mrb[13].mxu0  ;;  %v786_v15 = vcombine.high %v672_v45, %v674_v61  ;;  %v743_v22 = vadd.f32 %v742_v10, %v7679_v38  ;;  %v745_v31 = vadd.f32 %v744_v18, %v7677_v36  ;;  %v7851_v10 = vadd.bf16 %v1131_v8, %v921_v59 }
 0x11c   : > { %v681_v56 = vpop.f32.mrb[14].mxu0  ;;  %v7809_v57 = vpop.f32.mrb[12].mxu1  ;;  %v923_v27 = vpack.c.bf16 %v7828_v9, %v7823_v3  ;;  %v7842_v28 = vrot.slane %v785_v7, %v7682_v41  ;;  %v747_v54 = vadd.f32 %v746_v21, %v7679_v38  ;;  %v7860_v61 = vsel %vm7623_vm2, 0, %v1223_v19  ;;  %v1121_v7 = vld [vmem:[%s7675_s24 + $0xd0] sm:$0xff] }
 0x11d   : > { %1718 = vmatmul.mubr.bf16.gmra.mrb[20].mxu0 %v7801_v47  ;;  %2192 = vmatmul.mubr.bf16.gmra.mrb[24].mxu1 %v7801_v47  ;;  %v683_v63 = vpop.f32.mrb[15].mxu0  ;;  %v7817_v0 = vpop.f32.mrb[13].mxu1  ;;  %v7845_v30 = vrot.slane %v786_v15, %v7682_v41  ;;  %v951_v39 = vcombine.low %v741_v62, %v743_v22  ;;  %v952_v45 = vcombine.high %v741_v62, %v743_v22  ;;  %v1227_v18 = vrot.slane %v9839_v20, 7 }
 0x11e   : > { %1725 = vmatprep.mubr.bf16.mxu0 %v7741_v58  ;;  %2199 = vmatprep.mubr.bf16.mxu1 %v7741_v58  ;;  %v7825_v6 = vpop.f32.mrb[14].mxu1  ;;  %v953_v59 = vcombine.low %v745_v31, %v747_v54  ;;  %v954_v21 = vcombine.high %v745_v31, %v747_v54  ;;  %v9840_v8 = vshll.u32 %v7787_v34, 16  ;;  %v678_v22 = vadd.f32 %v7785_v32, %v7666_v33 }
 0x11f   : > { %6527 = vmatpush3.bf16.msra.mxu0 %v7222_v17  ;;  %v7830_v16 = vpop.f32.mrb[15].mxu1  ;;  %v7224_v17 = vld [vmem:[%s9830_s4 + $0x160] sm:$0xff]   ;;  %v7865_v62 = vrot.slane %v951_v39, %v7682_v41  ;;  %v7868_v50 = vrot.slane %v952_v45, %v7682_v41  ;;  %v680_v31 = vadd.f32 %v7797_v46, %v7668_v35  ;;  %v1108_v45 = vld [vmem:[%s7675_s24 + $0x68] sm:$0xff]  ;;  %v682_v54 = vadd.f32 %v681_v56, %v7666_v33  ;;  %v1109_v33 = vld [vmem:[%s7675_s24 + $0x70] sm:$0xff] }
 0x120   : > { %6528 = vmatprep.subr.bf16.mxu0 %v7223_v55  ;;  %v7881_v15 = vrot.slane %v953_v59, %v7682_v41  ;;  %v7884_v19 = vrot.slane %v954_v21, %v7682_v41  ;;  %v1107_v39 = vld [vmem:[%s7675_s24 + $0x60] sm:$0xff]  ;;  %v684_v21 = vadd.f32 %v683_v63, %v7668_v35  ;;  %v1110_v56 = vld [vmem:[%s7675_s24 + $0x78] sm:$0xff]  ;;  %v751_v63 = vadd.f32 %v7809_v57, %v7677_v36 }
 0x121   : > { %v787_v46 = vcombine.low %v678_v22, %v680_v31  ;;  %v788_v59 = vcombine.high %v678_v22, %v680_v31  ;;  %v1133_v2 = vpack.c.bf16 %v1108_v45, %v1107_v39  ;;  %v7938_v57 = vld [vmem:[%s9830_s4 + $0x200] sm:$0xff]   ;;  %v9845_v45 = vshll.u32 %v7851_v10, 16  ;;  %v1118_v31 = vld [vmem:[%s7675_s24 + $0xb8] sm:$0xff] }
 0x122   : > { %v789_v24 = vcombine.low %v682_v54, %v684_v21  ;;  %v755_v51 = vadd.f32 %v7825_v6, %v7677_v36  ;;  %v757_v32 = vadd.f32 %v7830_v16, %v7679_v38  ;;  %6618 = vmatprep.subr.bf16.mxu1 %v7938_v57  ;;  %v7236_v36 = vld [vmem:[%s9830_s4 + $0x1c0] sm:$0xff]   ;;  %v1139_v37 = vpack.c.bf16 %v1120_v1, %v1119_v53 }
 0x123   : > { %6529 = vmatpush3.bf16.msra.mxu0 %v7223_v55  ;;  %v1132_v55 = vpack.c.bf16 %v1106_v44, %v1105_v48  ;;  %v1230_v48 = vor.u32 %v9840_v8, %v1227_v18  ;;  %v9842_v44 = vshrl.u32 %v7851_v10, 16  ;;  %v7910_v20 = vrot.slane %v787_v46, %v7682_v41  ;;  %v1116_v46 = vld [vmem:[%s7675_s24 + $0xa8] sm:$0xff] }
 0x124   : > { %6530 = vmatprep.subr.bf16.mxu0 %v7224_v17  ;;  %v7913_v8 = vrot.slane %v788_v59, %v7682_v41  ;;  %v7933_v39 = vrot.slane %v789_v24, %v7682_v41  ;;  %v1113_v59 = vld [vmem:[%s7675_s24 + $0x90] sm:$0xff]  ;;  %v957_v16 = vcombine.low %v755_v51, %v757_v32  ;;  %v9887_v9 = vpack.c.bf16 %v7868_v50, %v7865_v62 }
 0x125   : > { %1726 = vmatmul.mubr.bf16.gmra.mrb[24].mxu0 %v7860_v61  ;;  %2200 = vmatmul.mubr.bf16.gmra.mrb[28].mxu1 %v7860_v61  ;;  %v7905_v18 = vadd.bf16 %v1132_v55, %v1089_v29  ;;  %v7917_v22 = vsel %vm7623_vm2, 0, %v1230_v48  ;;  %v1234_v35 = vrot.slane %v9842_v44, 7  ;;  %v790_v29 = vcombine.high %v682_v54, %v684_v21  ;;  %v1115_v54 = vld [vmem:[%s7675_s24 + $0xa0] sm:$0xff]  ;;  %v1117_v44 = vld [vmem:[%s7675_s24 + $0xb0] sm:$0xff] }
 0x126   : > { %1733 = vmatprep.mubr.bf16.mxu0 %v7787_v34  ;;  %2207 = vmatprep.mubr.bf16.mxu1 %v7787_v34  ;;  %v1134_v55 = vpack.c.bf16 %v1110_v56, %v1109_v33  ;;  %v753_v21 = vadd.f32 %v7817_v0, %v7679_v38  ;;  %v1135_v33 = vpack.c.bf16 %v1112_v26, %v1111_v25  ;;  %v1114_v56 = vld [vmem:[%s7675_s24 + $0x98] sm:$0xff]  ;;  %v9892_v50 = vshrl.u32 %v7723_v43, 16 }
 0x127   : > { %6531 = vmatpush3.bf16.msra.mxu0 %v7224_v17  ;;  %v7228_v17 = vld [vmem:[%s9830_s4 + $0x170] sm:$0xff]   ;;  %v1239_v48 = vshrl.u32 %v7905_v18, 16  ;;  %v7948_v24 = vrot.slane %v790_v29, %v7682_v41  ;;  %v1237_v29 = vor.u32 %v9845_v45, %v1234_v35  ;;  %v7972_v38 = vadd.bf16 %v1133_v2, %v922_v12 }
 0x128   : > { %6532 = vmatprep.subr.bf16.mxu0 %v7226_v52  ;;  %v955_v25 = vcombine.low %v751_v63, %v753_v21  ;;  %v956_v26 = vcombine.high %v751_v63, %v753_v21  ;;  %v1137_v6 = vpack.c.bf16 %v1116_v46, %v1115_v54  ;;  %v1136_v0 = vpack.c.bf16 %v1114_v56, %v1113_v59 }
 0x129   : > { %v1241_v35 = vrot.slane %v1239_v48, 7  ;;  %v1138_v21 = vpack.c.bf16 %v1118_v31, %v1117_v44  ;;  %v7981_v49 = vrot.slane %v957_v16, %v7682_v41  ;;  %v7993_v4 = vsel %vm7623_vm2, 0, %v1237_v29 }
 0x12a   : > { %v1065_v45 = vrot.slane %v955_v25, %v7682_v41  ;;  %v1072_v63 = vrot.slane %v956_v26, %v7682_v41  ;;  %v1242_v5 = vshll.u32 %v7905_v18, 16  ;;  %v1246_v40 = vshrl.u32 %v7972_v38, 16 }
 0x12b   : > { %6533 = vmatpush3.bf16.msra.mxu0 %v7226_v52  ;;  %v7233_v52 = vld [vmem:[%s9830_s4 + $0x178] sm:$0xff]   ;;  %v1140_v44 = vpack.c.bf16 %v1122_v11, %v1121_v7  ;;  %v1249_v3 = vshll.u32 %v7972_v38, 16  ;;  %v9890_v11 = vpack.c.bf16 %v7845_v30, %v7842_v28  ;;  %v9891_v46 = vpack.c.bf16 %v7884_v19, %v7881_v15 }
 0x12c   : > { %6534 = vmatprep.subr.bf16.mxu0 %v7228_v17  ;;  %v1093_v12 = vpack.c.bf16 %v1072_v63, %v1065_v45  ;;  %v1244_v53 = vor.u32 %v1242_v5, %v1241_v35  ;;  %v9889_v45 = vshll.u32 %v7741_v58, 16  ;;  %v9893_v28 = vpack.c.bf16 %v7913_v8, %v7910_v20 }
 0x12d   : > { %1734 = vmatmul.mubr.bf16.gmra.mrb[28].mxu0 %v7917_v22  ;;  %2208 = vmatmul.mubr.bf16.gmra.mrb[32].mxu1 %v7917_v22  ;;  %v8027_v7 = vadd.bf16 %v1137_v6, %v9890_v11  ;;  %v8032_v59 = vadd.bf16 %v1138_v21, %v9891_v46  ;;  %v9894_v25 = vshrl.u32 %v7741_v58, 16  ;;  %v9895_v6 = vshll.u32 %v7787_v34, 16 }
 0x12e   : > { %1741 = vmatprep.mubr.bf16.mxu0 %v7851_v10  ;;  %2215 = vmatprep.mubr.bf16.mxu1 %v7851_v10  ;;  %v1367_v54 = vrot.slane %v9889_v45, 1  ;;  %v8044_v30 = vadd.bf16 %v1139_v37, %v9893_v28  ;;  %v8048_v15 = vsel %vm7623_vm2, 0, %v1244_v53  ;;  %v9896_v37 = vshll.u32 %v7851_v10, 16 }
 0x12f   : > { %6535 = vmatpush3.bf16.msra.mxu0 %v7228_v17  ;;  %v958_v17 = vcombine.high %v755_v51, %v757_v32  ;;  %v7989_v51 = vadd.bf16 %v1134_v55, %v1090_v60  ;;  %v9885_v60 = vshll.u32 %v7709_v23, 16  ;;  %v9886_v32 = vshll.u32 %v7723_v43, 16 }
 0x130   : > { %6536 = vmatprep.subr.bf16.mxu0 %v7233_v52  ;;  %v9888_v55 = vshrl.u32 %v7709_v23, 16  ;;  %v8055_v26 = vor.u32 %v1367_v54, %v9894_v25  ;;  %v1369_v16 = vrot.slane %v9895_v6, 1  ;;  %v1371_v20 = vrot.slane %v9896_v37, 1 }
 0x131   : > { %v7984_v2 = vrot.slane %v958_v17, %v7682_v41  ;;  %v8001_v41 = vadd.bf16 %v1135_v33, %v923_v27  ;;  %v1363_v1 = vrot.slane %v9885_v60, 1  ;;  %v8016_v27 = vadd.bf16 %v1136_v0, %v9887_v9 }
 0x132   : > { %v1256_v62 = vshll.u32 %v7989_v51, 16  ;;  %v1248_v33 = vrot.slane %v1246_v40, 7  ;;  %v1253_v56 = vshrl.u32 %v7989_v51, 16  ;;  %v8051_v0 = vadd.bf16 %v1140_v44, %v1093_v12 }
 0x133   : > { %6537 = vmatpush3.bf16.msra.mxu0 %v7233_v52  ;;  %v1094_v42 = vpack.c.bf16 %v7984_v2, %v7981_v49  ;;  %v1365_v52 = vrot.slane %v9886_v32, 1  ;;  %v8020_v31 = vor.u32 %v1363_v1, %v9888_v55  ;;  %v1263_v29 = vshll.u32 %v8001_v41, 16 }
 0x134   : > { %5978 = vmatprep.subr.bf16.mxu0 %v7236_v36  ;;  %v1260_v19 = vshrl.u32 %v8001_v41, 16  ;;  %v1270_v36 = vshll.u32 %v8016_v27, 16  ;;  %v1373_v8 = vrot.slane %v1242_v5, 1  ;;  %v1277_v17 = vshll.u32 %v8027_v7, 16 }
 0x135   : > { %1742 = vmatmul.mubr.bf16.gmra.mrb[32].mxu0 %v7993_v4  ;;  %2216 = vmatmul.mubr.bf16.gmra.mrb[36].mxu1 %v7993_v4  ;;  %v8037_v23 = vor.u32 %v1365_v52, %v9892_v50  ;;  %v1284_v35 = vshll.u32 %v8032_v59, 16  ;;  %v1375_v63 = vrot.slane %v1249_v3, 1  ;;  %v1377_v21 = vrot.slane %v1256_v62, 1 }
 0x136   : > { %1749 = vmatprep.mubr.bf16.mxu0 %v7905_v18  ;;  %2223 = vmatprep.mubr.bf16.mxu1 %v7905_v18  ;;  %v1291_v12 = vshll.u32 %v8044_v30, 16  ;;  %v9897_v60 = vshrl.u32 %v7787_v34, 16  ;;  %v9898_v53 = vshrl.u32 %v7851_v10, 16  ;;  %v1379_v5 = vrot.slane %v1263_v29, 1 }
 0x137   : > { %v1298_v32 = vshll.u32 %v8051_v0, 16  ;;  %v8080_v52 = vor.u32 %v1373_v8, %v1239_v48  ;;  %v8082_v9 = vor.u32 %v1375_v63, %v1246_v40  ;;  %v8084_v55 = vor.u32 %v1377_v21, %v1253_v56 }
 0x138   : > { %v8069_v1 = vor.u32 %v1369_v16, %v9897_v60  ;;  %v8073_v44 = vor.u32 %v1371_v20, %v9898_v53  ;;  %v1251_v45 = vor.u32 %v1249_v3, %v1248_v33  ;;  %v8086_v54 = vor.u32 %v1379_v5, %v1260_v19 }
 0x139   : > { %v1267_v11 = vshrl.u32 %v8016_v27, 16  ;;  %v1274_v46 = vshrl.u32 %v8027_v7, 16  ;;  %v1281_v50 = vshrl.u32 %v8032_v59, 16  ;;  %v1381_v28 = vrot.slane %v1270_v36, 1 }
 0x13a   : > { %v1288_v25 = vshrl.u32 %v8044_v30, 16  ;;  %v1383_v6 = vrot.slane %v1277_v17, 1  ;;  %v1385_v48 = vrot.slane %v1284_v35, 1  ;;  %v1387_v40 = vrot.slane %v1291_v12, 1 }
 0x13b   : > { %v1295_v3 = vshrl.u32 %v8051_v0, 16  ;;  %v8097_v33 = vor.u32 %v1381_v28, %v1267_v11  ;;  %v1389_v16 = vrot.slane %v1298_v32, 1  ;;  %v8109_v63 = vsel %vm7623_vm2, 0, %v1251_v45 }
 0x13c   : > { %v8101_v37 = vor.u32 %v1383_v6, %v1274_v46  ;;  %v8103_v20 = vor.u32 %v1385_v48, %v1281_v50  ;;  %v8105_v8 = vor.u32 %v1387_v40, %v1288_v25  ;;  %v1255_v21 = vrot.slane %v1253_v56, 7 }
 0x13d   : > { %1750 = vmatmul.mubr.bf16.gmra.mrb[36].mxu0 %v8048_v15  ;;  %2224 = vmatmul.mubr.bf16.gmra.mrb[40].mxu1 %v8048_v15  ;;  %v8111_v60 = vor.u32 %v1389_v16, %v1295_v3  ;;  %v1262_v28 = vrot.slane %v1260_v19, 7  ;;  %v1269_v6 = vrot.slane %v1267_v11, 7  ;;  %v1276_v48 = vrot.slane %v1274_v46, 7  ;;  %v5858_v11 = vpop.f32.mrb[16].mxu1 }
 0x13e   : > { %1757 = vmatprep.mubr.bf16.mxu0 %v7972_v38  ;;  %2231 = vmatprep.mubr.bf16.mxu1 %v7972_v38  ;;  %v1258_v53 = vor.u32 %v1256_v62, %v1255_v21  ;;  %v5859_v40 = vpop.f32.mrb[17].mxu1  ;;  %v1283_v46 = vrot.slane %v1281_v50, 7  ;;  %v1290_v50 = vrot.slane %v1288_v25, 7  ;;  %v9901_v2 = vmov 0 }
 0x13f   : > { %v1265_v56 = vor.u32 %v1263_v29, %v1262_v28  ;;  %v1272_v62 = vor.u32 %v1270_v36, %v1269_v6  ;;  %v1279_v29 = vor.u32 %v1277_v17, %v1276_v48  ;;  %v8141_v16 = vadd.f32 %v5859_v40, %v5858_v11  ;;  %v5861_v21 = vpop.f32.mrb[18].mxu1  ;;  %v1123_v6 = vld [vmem:[%s7675_s24 + $0xe0] sm:$0xff] }
 0x140   : > { %v8119_v5 = vsel %vm7623_vm2, 0, %v1258_v53  ;;  %v5862_v17 = vpop.f32.mrb[19].mxu1  ;;  %v1286_v28 = vor.u32 %v1284_v35, %v1283_v46  ;;  %v1293_v35 = vor.u32 %v1291_v12, %v1290_v50  ;;  %v1297_v40 = vrot.slane %v1295_v3, 7  ;;  %v1125_v46 = vld [vmem:[%s7675_s24 + $0xf0] sm:$0xff] }
 0x141   : > { %v8127_v45 = vsel %vm7623_vm2, 0, %v1265_v56  ;;  %v8135_v19 = vsel %vm7623_vm2, 0, %v1272_v62  ;;  %v8145_v36 = vsel %vm7623_vm2, 0, %v1279_v29  ;;  %v8151_v53 = vadd.f32 %v5862_v17, %v5861_v21  ;;  %v1124_v62 = vld [vmem:[%s7675_s24 + $0xe8] sm:$0xff]  ;;  %v1126_v21 = vld [vmem:[%s7675_s24 + $0xf8] sm:$0xff] }
 0x142   : > { %v8157_v56 = vsel %vm7623_vm2, 0, %v1286_v28  ;;  %v1141_v48 = vpack.c.bf16 %v1124_v62, %v1123_v6  ;;  %v9899_v29 = vpack.c.bf16 %v7948_v24, %v7933_v39  ;;  %v8174_v25 = vsel %vm7623_vm2, 0, %v1293_v35 }
 0x143   : > { %v1300_v39 = vor.u32 %v1298_v32, %v1297_v40  ;;  %v1142_v12 = vpack.c.bf16 %v1126_v21, %v1125_v46  ;;  %v9900_v50 = vmov 0   ;;  %v9902_v2 = vsel %vm8205_vm5, 4294967295, %v9901_v2 }
 0x144   : > { %v8170_v11 = vadd.bf16 %v1141_v48, %v9899_v29  ;;  %v1361_v6 = vrot.slane %v9900_v50, 1  ;;  %9903 = vst [vmem:[#allocation6_spill] sm:$0xff] %v9902_v2  ;;  %v1419_v21 = vsel %vm8205_vm5, %v8020_v31, 0  ;;  %v7248_v31 = vld [vmem:[%s9830_s4 + $0x210] sm:$0xff]  }
 0x145   : > { %1758 = vmatmul.mubr.bf16.gmra.mrb[40].mxu0 %v8109_v63  ;;  %2232 = vmatmul.mubr.bf16.gmra.mrb[44].mxu1 %v8109_v63  ;;  %v8187_v17 = vsel %vm7623_vm2, 0, %v1300_v39  ;;  %v8194_v28 = vadd.bf16 %v1142_v12, %v1094_v42  ;;  %v7245_v39 = vld [vmem:[%s9830_s4 + $0x208] sm:$0xff]   ;;  %v8240_v12 = vsel %vm8205_vm5, %v8037_v23, 0  ;;  %v8256_v23 = vsel %vm8205_vm5, %v8055_v26, 0 }
 0x146   : > { %1765 = vmatprep.mubr.bf16.mxu0 %v7989_v51  ;;  %2239 = vmatprep.mubr.bf16.mxu1 %v7989_v51  ;;  %v1302_v24 = vshrl.u32 %v8170_v11, 16  ;;  %v1305_v32 = vshll.u32 %v8170_v11, 16  ;;  %v8211_v42 = vsel %vm8205_vm5, %v1361_v6, 0  ;;  %v7238_v6 = vld [vmem:[%s9830_s4 + $0x1c8] sm:$0xff]  }
 0x147   : > { %v1309_v49 = vshrl.u32 %v8194_v28, 16  ;;  %9904 = vst [vmem:[#allocation7_spill] sm:$0xff] %v8211_v42  ;;  %v1312_v29 = vshll.u32 %v8194_v28, 16  ;;  %v7239_v26 = vld [vmem:[%s9830_s4 + $0x188] sm:$0xff]  }
 0x148   : > { %v1304_v3 = vrot.slane %v1302_v24, 7 }
 0x149   : > { %v1311_v35 = vrot.slane %v1309_v49, 7 }
 0x14a   : > { %v1307_v62 = vor.u32 %v1305_v32, %v1304_v3  ;;  %v7237_v3 = vld [vmem:[%s9830_s4 + $0x180] sm:$0xff]  }
 0x14b   : > { %v1314_v40 = vor.u32 %v1312_v29, %v1311_v35  ;;  %v7240_v35 = vld [vmem:[%s9830_s4 + $0x1d0] sm:$0xff]  }
 0x14c   : > { %v8215_v48 = vsel %vm7623_vm2, 0, %v1307_v62  ;;  %v8267_v62 = vsel %vm8205_vm5, %v8069_v1, 0  ;;  %v7241_v1 = vld [vmem:[%s9830_s4 + $0x190] sm:$0xff]  }
 0x14d   : > { %1766 = vmatmul.mubr.bf16.gmra.mrb[44].mxu0 %v8119_v5  ;;  %2240 = vmatmul.mubr.bf16.gmra.mrb[48].mxu1 %v8119_v5  ;;  %v8228_v46 = vsel %vm7623_vm2, 0, %v1314_v40  ;;  %v7252_v40 = vld [vmem:[%s9830_s4 + $0x220] sm:$0xff]  }
 0x14e   : > { %1773 = vmatprep.mubr.bf16.mxu0 %v8001_v41  ;;  %2247 = vmatprep.mubr.bf16.mxu1 %v8001_v41 }
 0x155   : > { %1774 = vmatmul.mubr.bf16.gmra.mrb[48].mxu0 %v8127_v45  ;;  %2248 = vmatmul.mubr.bf16.gmra.mrb[52].mxu1 %v8127_v45 }
 0x156   : > { %1781 = vmatprep.mubr.bf16.mxu0 %v8016_v27  ;;  %2255 = vmatprep.mubr.bf16.mxu1 %v8016_v27 }
 0x15d   : > { %1782 = vmatmul.mubr.bf16.gmra.mrb[52].mxu0 %v8135_v19  ;;  %2256 = vmatmul.mubr.bf16.gmra.mrb[56].mxu1 %v8135_v19 }
 0x15e   : > { %1789 = vmatprep.mubr.bf16.mxu0 %v8027_v7  ;;  %2263 = vmatprep.mubr.bf16.mxu1 %v8027_v7 }
 0x165   : > { %1790 = vmatmul.mubr.bf16.gmra.mrb[56].mxu0 %v8145_v36  ;;  %2264 = vmatmul.mubr.bf16.gmra.mrb[60].mxu1 %v8145_v36 }
 0x166   : > { %1797 = vmatprep.mubr.bf16.mxu0 %v8032_v59  ;;  %2271 = vmatprep.mubr.bf16.mxu1 %v8032_v59 }
 0x16d   : > { %1798 = vmatmul.mubr.bf16.gmra.mrb[60].mxu0 %v8157_v56  ;;  %2272 = vmatmul.mubr.bf16.gmra.mrb[64].mxu1 %v8157_v56 }
 0x16e   : > { %1805 = vmatprep.mubr.bf16.mxu0 %v8044_v30  ;;  %2279 = vmatprep.mubr.bf16.mxu1 %v8044_v30 }
 0x175   : > { %1806 = vmatmul.mubr.bf16.gmra.mrb[64].mxu0 %v8174_v25  ;;  %2280 = vmatmul.mubr.bf16.gmra.mrb[68].mxu1 %v8174_v25 }
 0x176   : > { %1813 = vmatprep.mubr.bf16.mxu0 %v8051_v0  ;;  %2287 = vmatprep.mubr.bf16.mxu1 %v8051_v0 }
 0x17d   : > { %1814 = vmatmul.mubr.bf16.gmra.mrb[68].mxu0 %v8187_v17  ;;  %2288 = vmatmul.mubr.bf16.gmra.mrb[72].mxu1 %v8187_v17 }
 0x17e   : > { %1821 = vmatprep.mubr.bf16.mxu0 %v8170_v11  ;;  %2295 = vmatprep.mubr.bf16.mxu1 %v8170_v11 }
 0x185   : > { %1822 = vmatmul.mubr.bf16.gmra.mrb[72].mxu0 %v8215_v48  ;;  %2296 = vmatmul.mubr.bf16.gmra.mrb[76].mxu1 %v8215_v48 }
 0x186   : > { %1829 = vmatprep.mubr.bf16.mxu0 %v8194_v28  ;;  %6586 = vmatprep.mubr.bf16.mxu1 %v8211_v42 }
 0x18d   : > { %1830 = vmatmul.mubr.bf16.gmra.mrb[76].mxu0 %v8228_v46  ;;  %6587 = vmatmul.mubr.bf16.vlgmr.msra.gmra.mrb[80].mxu1 %v1419_v21 }
 0x18e   : > { %6538 = vmatprep.mubr.bf16.mxu0 %v1419_v21  ;;  %6590 = vmatprep.mubr.bf16.mxu1 %v8240_v12  ;;  %v8285_v21 = vsel %vm8205_vm5, %v8073_v44, 0  ;;  %v7243_v44 = vld [vmem:[%s9830_s4 + $0x198] sm:$0xff]  }
 0x18f   : > { %6619 = vmatpush3.bf16.msra.mxu1 %v7938_v57  ;;  %v7249_v57 = vld [vmem:[%s9830_s4 + $0x218] sm:$0xff]  }
 0x190   : > { %6620 = vmatprep.subr.bf16.mxu1 %v7245_v39 }
 0x193   : > { %6621 = vmatpush3.bf16.msra.mxu1 %v7245_v39  ;;  %v7242_v39 = vld [vmem:[%s9830_s4 + $0x1d8] sm:$0xff]  }
 0x194   : > { %6622 = vmatprep.subr.bf16.mxu1 %v7248_v31 }
 0x195   : > { %6539 = vmatmul.mubr.bf16.vlgmr.msra.gmra.mrb[80].mxu0 %v8240_v12  ;;  %6591 = vmatmul.mubr.bf16.gmra.mrb[84].mxu1 %v8256_v23 }
 0x196   : > { %5979 = vmatpush3.bf16.msra.mxu0 %v7237_v3  ;;  %6542 = vmatprep.mubr.bf16.mxu0 %v8256_v23  ;;  %v7253_v3 = vld [vmem:[%s9830_s4 + $0x228] sm:$0xff]  }
 0x197   : > { %6594 = vmatprep.mubr.bf16.mxu1 %v8267_v62  ;;  %5980 = vmatprep.subr.bf16.mxu0 %v7238_v6  ;;  %v7247_v6 = vld [vmem:[%s9830_s4 + $0x1a0] sm:$0xff]  }
 0x198   : > { %6623 = vmatpush3.bf16.msra.mxu1 %v7248_v31  ;;  %v8295_v31 = vsel %vm8205_vm5, %v8080_v52, 0  ;;  %v7246_v52 = vld [vmem:[%s9830_s4 + $0x1e0] sm:$0xff]  }
 0x199   : > { %6624 = vmatprep.subr.bf16.mxu1 %v7249_v57 }
 0x19a   : > { %5981 = vmatpush3.bf16.msra.mxu0 %v7239_v26  ;;  %v1425_v26 = vsel %vm8205_vm5, %v8082_v9, 0  ;;  %v7251_v9 = vld [vmem:[%s9830_s4 + $0x1a8] sm:$0xff]  }
 0x19b   : > { %5982 = vmatprep.subr.bf16.mxu0 %v7240_v35  ;;  %v7250_v35 = vld [vmem:[%s9830_s4 + $0x1e8] sm:$0xff]  }
 0x19c   : > { %6625 = vmatpush3.bf16.msra.mxu1 %v7249_v57  ;;  %v7256_v57 = vld [vmem:[%s9830_s4 + $0x230] sm:$0xff]  }
 0x19d   : > { %6543 = vmatmul.mubr.bf16.gmra.mrb[84].mxu0 %v8267_v62  ;;  %6595 = vmatmul.mubr.bf16.gmra.mrb[88].mxu1 %v8285_v21 }
 0x19e   : > { %6546 = vmatprep.mubr.bf16.mxu0 %v8285_v21  ;;  %6598 = vmatprep.mubr.bf16.mxu1 %v8295_v31 }
 0x19f   : > { %5983 = vmatpush3.bf16.msra.mxu0 %v7241_v1  ;;  %6626 = vmatprep.subr.bf16.mxu1 %v7252_v40  ;;  %v1426_v1 = vsel %vm8205_vm5, %v8084_v55, 0  ;;  %v7255_v55 = vld [vmem:[%s9830_s4 + $0x1b0] sm:$0xff]  }
 0x1a0   : > { %5984 = vmatprep.subr.bf16.mxu0 %v7242_v39  ;;  %6627 = vmatpush3.bf16.msra.mxu1 %v7252_v40  ;;  %v7257_v40 = vld [vmem:[%s9830_s4 + $0x238] sm:$0xff]   ;;  %v7254_v39 = vld [vmem:[%s9830_s4 + $0x1f0] sm:$0xff]  }
 0x1a1   : > { %6628 = vmatprep.subr.bf16.mxu1 %v7253_v3 }
 0x1a3   : > { %5985 = vmatpush3.bf16.msra.mxu0 %v7243_v44  ;;  %v7258_v44 = vld [vmem:[%s9830_s4 + $0x1f8] sm:$0xff]  }
 0x1a4   : > { %5986 = vmatprep.subr.bf16.mxu0 %v7246_v52  ;;  %6629 = vmatpush3.bf16.msra.mxu1 %v7253_v3  ;;  %v1427_v3 = vsel %vm8205_vm5, %v8086_v54, 0  ;;  %v1428_v52 = vsel %vm8205_vm5, %v8097_v33, 0  ;;  %v1429_v54 = vsel %vm8205_vm5, %v8101_v37, 0  ;;  %v1431_v33 = vsel %vm8205_vm5, %v8105_v8, 0 }
 0x1a5   : > { %6547 = vmatmul.mubr.bf16.gmra.mrb[88].mxu0 %v8295_v31  ;;  %6599 = vmatmul.mubr.bf16.gmra.mrb[92].mxu1 %v1425_v26  ;;  %v1432_v37 = vsel %vm8205_vm5, %v8111_v60, 0  ;;  %v1393_v8 = vrot.slane %v1312_v29, 1 }
 0x1a6   : > { %6550 = vmatprep.mubr.bf16.mxu0 %v1425_v26  ;;  %6602 = vmatprep.mubr.bf16.mxu1 %v1426_v1 }
 0x1a7   : > { %5987 = vmatpush3.bf16.msra.mxu0 %v7247_v6  ;;  %6630 = vmatprep.subr.bf16.mxu1 %v7256_v57  ;;  %v7259_v6 = vld [vmem:[%s9830_s4 + $0x1b8] sm:$0xff]   ;;  %v1394_v60 = vor.u32 %v1393_v8, %v1309_v49 }
 0x1a8   : > { %5988 = vmatprep.subr.bf16.mxu0 %v7250_v35  ;;  %6631 = vmatpush3.bf16.msra.mxu1 %v7256_v57  ;;  %v1430_v57 = vsel %vm8205_vm5, %v8103_v20, 0  ;;  %v1391_v35 = vrot.slane %v1305_v32, 1 }
 0x1a9   : > { %6632 = vmatprep.subr.bf16.mxu1 %v7257_v40 }
 0x1aa   : > { %v1392_v20 = vor.u32 %v1391_v35, %v1302_v24  ;;  %v8377_v24 = vsel %vm8205_vm5, %v1394_v60, 0 }
 0x1ab   : > { %5989 = vmatpush3.bf16.msra.mxu0 %v7251_v9 }
 0x1ac   : > { %5990 = vmatprep.subr.bf16.mxu0 %v7254_v39  ;;  %6633 = vmatpush3.bf16.msra.mxu1 %v7257_v40  ;;  %v8366_v40 = vsel %vm8205_vm5, %v1392_v20, 0 }
 0x1ad   : > { %6551 = vmatmul.mubr.bf16.gmra.mrb[92].mxu0 %v1426_v1  ;;  %6603 = vmatmul.mubr.bf16.gmra.mrb[96].mxu1 %v1427_v3 }
 0x1ae   : > { %6554 = vmatprep.mubr.bf16.mxu0 %v1427_v3  ;;  %6606 = vmatprep.mubr.bf16.mxu1 %v1428_v52 }
 0x1af   : > { %5991 = vmatpush3.bf16.msra.mxu0 %v7255_v55 }
 0x1b0   : > { %5992 = vmatprep.subr.bf16.mxu0 %v7258_v44 }
 0x1b3   : > { %5993 = vmatpush3.bf16.msra.mxu0 %v7259_v6 }
 0x1b5   : > { %6555 = vmatmul.mubr.bf16.gmra.mrb[96].mxu0 %v1428_v52  ;;  %6607 = vmatmul.mubr.bf16.gmra.mrb[100].mxu1 %v1429_v54 }
 0x1b6   : > { %6558 = vmatprep.mubr.bf16.mxu0 %v1429_v54  ;;  %6610 = vmatprep.mubr.bf16.mxu1 %v1430_v57 }
 0x1bd   : > { %6559 = vmatmul.mubr.bf16.gmra.mrb[100].mxu0 %v1430_v57  ;;  %6611 = vmatmul.mubr.bf16.gmra.mrb[104].mxu1 %v1431_v33 }
 0x1be   : > { %6562 = vmatprep.mubr.bf16.mxu0 %v1431_v33  ;;  %6614 = vmatprep.mubr.bf16.mxu1 %v1432_v37 }
 0x1c5   : > { %6563 = vmatmul.mubr.bf16.gmra.mrb[104].mxu0 %v1432_v37  ;;  %6615 = vmatmul.mubr.bf16.gmra.mrb[108].mxu1 %v8366_v40 }
 0x1c6   : > { %6566 = vmatprep.mubr.bf16.mxu0 %v8366_v40  ;;  %6634 = vmatprep.mubr.bf16.mxu1 %v8240_v12 }
 0x1cd   : > { %6567 = vmatmul.mubr.bf16.gmra.mrb[108].mxu0 %v8377_v24  ;;  %6635 = vmatmul.mubr.bf16.vlgmr.msra.gmra.mrb[80].mxu1 %v8256_v23 }
 0x1ce   : > { %2690 = vmatprep.mubr.bf16.mxu0 %v7723_v43  ;;  %6638 = vmatprep.mubr.bf16.mxu1 %v8267_v62 }
 0x1d5   : > { %2691 = vmatmul.mubr.bf16.vlgmr.msra.gmra.mrb[112].mxu0 %v7801_v47  ;;  %6639 = vmatmul.mubr.bf16.gmra.mrb[84].mxu1 %v8285_v21 }
 0x1d6   : > { %2698 = vmatprep.mubr.bf16.mxu0 %v7741_v58  ;;  %6642 = vmatprep.mubr.bf16.mxu1 %v8295_v31 }
 0x1dd   : > { %2699 = vmatmul.mubr.bf16.gmra.mrb[116].mxu0 %v7860_v61  ;;  %6643 = vmatmul.mubr.bf16.gmra.mrb[88].mxu1 %v1425_v26 }
 0x1de   : > { %2706 = vmatprep.mubr.bf16.mxu0 %v7787_v34  ;;  %6646 = vmatprep.mubr.bf16.mxu1 %v1426_v1 }
 0x1e5   : > { %2707 = vmatmul.mubr.bf16.gmra.mrb[120].mxu0 %v7917_v22  ;;  %6647 = vmatmul.mubr.bf16.gmra.mrb[92].mxu1 %v1427_v3 }
 0x1e6   : > { %2714 = vmatprep.mubr.bf16.mxu0 %v7851_v10  ;;  %6650 = vmatprep.mubr.bf16.mxu1 %v1428_v52 }
 0x1e8   : > { %v5722_v43 = vpop.f32.mrb[16].mxu0  ;;  %v5864_v47 = vpop.f32.mrb[20].mxu1 }
 0x1e9   : > { %v5723_v32 = vpop.f32.mrb[17].mxu0  ;;  %v5865_v49 = vpop.f32.mrb[21].mxu1 }
 0x1ea   : > { %v8391_v29 = vadd.f32 %v5865_v49, %v5864_v47  ;;  %v5725_v58 = vpop.f32.mrb[18].mxu0  ;;  %v5867_v12 = vpop.f32.mrb[22].mxu1  ;;  %v8393_v23 = vadd.f32 %v5723_v32, %v5722_v43 }
 0x1eb   : > { %v5726_v61 = vpop.f32.mrb[19].mxu0  ;;  %v5868_v62 = vpop.f32.mrb[23].mxu1 }
 0x1ec   : > { %v8395_v34 = vadd.f32 %v5868_v62, %v5867_v12  ;;  %v8397_v21 = vadd.f32 %v5726_v61, %v5725_v58 }
 0x1ed   : > { %2715 = vmatmul.mubr.bf16.gmra.mrb[124].mxu0 %v7993_v4  ;;  %6651 = vmatmul.mubr.bf16.gmra.mrb[96].mxu1 %v1429_v54 }
 0x1ee   : > { %2722 = vmatprep.mubr.bf16.mxu0 %v7905_v18  ;;  %6654 = vmatprep.mubr.bf16.mxu1 %v1430_v57 }
 0x1f0   : > { %v5728_v10 = vpop.f32.mrb[20].mxu0  ;;  %v5870_v22 = vpop.f32.mrb[24].mxu1 }
 0x1f1   : > { %v5729_v31 = vpop.f32.mrb[21].mxu0  ;;  %v5871_v26 = vpop.f32.mrb[25].mxu1 }
 0x1f2   : > { %v8401_v1 = vadd.f32 %v5871_v26, %v5870_v22  ;;  %v5731_v9 = vpop.f32.mrb[22].mxu0  ;;  %v5873_v39 = vpop.f32.mrb[26].mxu1  ;;  %v8403_v55 = vadd.f32 %v5729_v31, %v5728_v10 }
 0x1f3   : > { %v5732_v3 = vpop.f32.mrb[23].mxu0  ;;  %v5874_v44 = vpop.f32.mrb[27].mxu1 }
 0x1f4   : > { %v8405_v52 = vadd.f32 %v5874_v44, %v5873_v39  ;;  %v8407_v6 = vadd.f32 %v5732_v3, %v5731_v9 }
 0x1f5   : > { %2723 = vmatmul.mubr.bf16.gmra.mrb[128].mxu0 %v8048_v15  ;;  %6655 = vmatmul.mubr.bf16.gmra.mrb[100].mxu1 %v1431_v33 }
 0x1f6   : > { %2730 = vmatprep.mubr.bf16.mxu0 %v7972_v38  ;;  %6658 = vmatprep.mubr.bf16.mxu1 %v1432_v37 }
 0x1f8   : > { %v5734_v18 = vpop.f32.mrb[24].mxu0  ;;  %v5876_v4 = vpop.f32.mrb[28].mxu1 }
 0x1f9   : > { %v5735_v54 = vpop.f32.mrb[25].mxu0  ;;  %v5877_v57 = vpop.f32.mrb[29].mxu1 }
 0x1fa   : > { %v8411_v35 = vadd.f32 %v5877_v57, %v5876_v4  ;;  %v5737_v20 = vpop.f32.mrb[26].mxu0  ;;  %v5879_v8 = vpop.f32.mrb[30].mxu1  ;;  %v8413_v60 = vadd.f32 %v5735_v54, %v5734_v18 }
 0x1fb   : > { %v5738_v43 = vpop.f32.mrb[27].mxu0  ;;  %v5880_v47 = vpop.f32.mrb[31].mxu1 }
 0x1fc   : > { %v8415_v32 = vadd.f32 %v5880_v47, %v5879_v8  ;;  %v8417_v49 = vadd.f32 %v5738_v43, %v5737_v20 }
 0x1fd   : > { %2731 = vmatmul.mubr.bf16.gmra.mrb[132].mxu0 %v8109_v63  ;;  %6659 = vmatmul.mubr.bf16.gmra.mrb[104].mxu1 %v8366_v40 }
 0x1fe   : > { %2738 = vmatprep.mubr.bf16.mxu0 %v7989_v51  ;;  %6662 = vmatprep.mubr.bf16.mxu1 %v8377_v24 }
 0x200   : > { %v5740_v38 = vpop.f32.mrb[28].mxu0  ;;  %v5882_v15 = vpop.f32.mrb[32].mxu1 }
 0x201   : > { %v5741_v33 = vpop.f32.mrb[29].mxu0  ;;  %v5883_v37 = vpop.f32.mrb[33].mxu1 }
 0x202   : > { %v8423_v58 = vadd.f32 %v5883_v37, %v5882_v15  ;;  %v5743_v12 = vpop.f32.mrb[30].mxu0  ;;  %v5885_v61 = vpop.f32.mrb[34].mxu1  ;;  %v8425_v62 = vadd.f32 %v5741_v33, %v5740_v38 }
 0x203   : > { %v5744_v10 = vpop.f32.mrb[31].mxu0  ;;  %v5886_v22 = vpop.f32.mrb[35].mxu1 }
 0x204   : > { %v8427_v31 = vadd.f32 %v5886_v22, %v5885_v61  ;;  %v8429_v63 = vadd.f32 %v5744_v10, %v5743_v12 }
 0x205   : > { %2739 = vmatmul.mubr.bf16.gmra.mrb[136].mxu0 %v8119_v5  ;;  %6663 = vmatmul.mubr.bf16.gmra.mrb[108].mxu1 %v8211_v42 }
 0x206   : > { %2746 = vmatprep.mubr.bf16.mxu0 %v8001_v41 }
 0x208   : > { %v5746_v51 = vpop.f32.mrb[32].mxu0  ;;  %v5888_v40 = vpop.f32.mrb[36].mxu1 }
 0x209   : > { %v5747_v24 = vpop.f32.mrb[33].mxu0  ;;  %v5889_v26 = vpop.f32.mrb[37].mxu1 }
 0x20a   : > { %v8434_v9 = vadd.f32 %v5889_v26, %v5888_v40  ;;  %v5749_v39 = vpop.f32.mrb[34].mxu0  ;;  %v5891_v3 = vpop.f32.mrb[38].mxu1  ;;  %v8436_v44 = vadd.f32 %v5747_v24, %v5746_v51 }
 0x20b   : > { %v5750_v18 = vpop.f32.mrb[35].mxu0  ;;  %v5892_v4 = vpop.f32.mrb[39].mxu1 }
 0x20c   : > { %v8438_v54 = vadd.f32 %v5892_v4, %v5891_v3  ;;  %v8440_v57 = vadd.f32 %v5750_v18, %v5749_v39 }
 0x20d   : > { %2747 = vmatmul.mubr.bf16.gmra.mrb[140].mxu0 %v8127_v45 }
 0x20e   : > { %2754 = vmatprep.mubr.bf16.mxu0 %v8016_v27 }
 0x210   : > { %v5752_v41 = vpop.f32.mrb[36].mxu0  ;;  %v5894_v5 = vpop.f32.mrb[40].mxu1 }
 0x211   : > { %v5753_v20 = vpop.f32.mrb[37].mxu0  ;;  %v5895_v8 = vpop.f32.mrb[41].mxu1 }
 0x212   : > { %v8444_v43 = vadd.f32 %v5895_v8, %v5894_v5  ;;  %v5755_v47 = vpop.f32.mrb[38].mxu0  ;;  %v5897_v38 = vpop.f32.mrb[42].mxu1  ;;  %v8446_v15 = vadd.f32 %v5753_v20, %v5752_v41 }
 0x213   : > { %v5756_v33 = vpop.f32.mrb[39].mxu0  ;;  %v5898_v37 = vpop.f32.mrb[43].mxu1 }
 0x214   : > { %v8448_v12 = vadd.f32 %v5898_v37, %v5897_v38  ;;  %v8450_v61 = vadd.f32 %v5756_v33, %v5755_v47 }
 0x215   : > { %2755 = vmatmul.mubr.bf16.gmra.mrb[144].mxu0 %v8135_v19 }
 0x216   : > { %2762 = vmatprep.mubr.bf16.mxu0 %v8027_v7 }
 0x218   : > { %v5758_v27 = vpop.f32.mrb[40].mxu0  ;;  %v5900_v45 = vpop.f32.mrb[44].mxu1 }
 0x219   : > { %v5759_v10 = vpop.f32.mrb[41].mxu0  ;;  %v5901_v22 = vpop.f32.mrb[45].mxu1 }
 0x21a   : > { %v8454_v51 = vadd.f32 %v5901_v22, %v5900_v45  ;;  %v5761_v40 = vpop.f32.mrb[42].mxu0  ;;  %v5903_v24 = vpop.f32.mrb[46].mxu1  ;;  %v8456_v26 = vadd.f32 %v5759_v10, %v5758_v27  ;;  %v7262_v10 = vld [vmem:[%s9833_s7 + $0x108] sm:$0xff]  }
 0x21b   : > { %v5762_v39 = vpop.f32.mrb[43].mxu0  ;;  %v5904_v3 = vpop.f32.mrb[47].mxu1 }
 0x21c   : > { %v8458_v18 = vadd.f32 %v5904_v3, %v5903_v24  ;;  %v8460_v4 = vadd.f32 %v5762_v39, %v5761_v40 }
 0x21d   : > { %2763 = vmatmul.mubr.bf16.gmra.mrb[148].mxu0 %v8145_v36  ;;  %v7261_v36 = vld [vmem:[%s9833_s7 + $0xc0] sm:$0xff]  }
 0x21e   : > { %2770 = vmatprep.mubr.bf16.mxu0 %v8032_v59  ;;  %v7260_v59 = vld [vmem:[%s9833_s7 + $0x100] sm:$0xff]  }
 0x21f   : > { %6114 = vmatprep.subr.bf16.mxu0 %v7260_v59 }
 0x220   : > { %v5764_v7 = vpop.f32.mrb[44].mxu0  ;;  %v5906_v19 = vpop.f32.mrb[48].mxu1  ;;  %6115 = vmatpush3.bf16.msra.mxu0 %v7261_v36 }
 0x221   : > { %v5765_v41 = vpop.f32.mrb[45].mxu0  ;;  %v5907_v5 = vpop.f32.mrb[49].mxu1  ;;  %6116 = vmatprep.subr.bf16.mxu0 %v7262_v10 }
 0x222   : > { %v8464_v20 = vadd.f32 %v5907_v5, %v5906_v19  ;;  %v5767_v8 = vpop.f32.mrb[46].mxu0  ;;  %v5909_v47 = vpop.f32.mrb[50].mxu1  ;;  %v8466_v38 = vadd.f32 %v5765_v41, %v5764_v7 }
 0x223   : > { %v5768_v33 = vpop.f32.mrb[47].mxu0  ;;  %v5910_v37 = vpop.f32.mrb[51].mxu1 }
 0x224   : > { %v8468_v27 = vadd.f32 %v5910_v37, %v5909_v47  ;;  %v8470_v45 = vadd.f32 %v5768_v33, %v5767_v8 }
 0x225   : > { %2771 = vmatmul.mubr.bf16.gmra.mrb[152].mxu0 %v8157_v56  ;;  %v7263_v56 = vld [vmem:[%s9833_s7 + $0xc8] sm:$0xff]  }
 0x226   : > { %2778 = vmatprep.mubr.bf16.mxu0 %v8044_v30  ;;  %6117 = vmatpush3.bf16.msra.mxu0 %v7263_v56 }
 0x228   : > { %v5770_v22 = vpop.f32.mrb[48].mxu0  ;;  %v5912_v40 = vpop.f32.mrb[52].mxu1 }
 0x229   : > { %v5771_v24 = vpop.f32.mrb[49].mxu0  ;;  %v5913_v39 = vpop.f32.mrb[53].mxu1 }
 0x22a   : > { %v8486_v30 = vadd.f32 %v5771_v24, %v5770_v22  ;;  %v8488_v3 = vadd.f32 %v5913_v39, %v5912_v40  ;;  %v5773_v7 = vpop.f32.mrb[50].mxu0  ;;  %v5915_v19 = vpop.f32.mrb[54].mxu1  ;;  %v7264_v39 = vld [vmem:[%s9833_s7 + $0x110] sm:$0xff]  }
 0x22b   : > { %v5774_v41 = vpop.f32.mrb[51].mxu0  ;;  %v5916_v5 = vpop.f32.mrb[55].mxu1  ;;  %6118 = vmatprep.subr.bf16.mxu0 %v7264_v39 }
 0x22c   : > { %v8490_v8 = vadd.f32 %v5774_v41, %v5773_v7  ;;  %v8492_v47 = vadd.f32 %v5916_v5, %v5915_v19  ;;  %v7266_v41 = vld [vmem:[%s9833_s7 + $0xd0] sm:$0xff]   ;;  %v7267_v5 = vld [vmem:[%s9833_s7 + $0x118] sm:$0xff]  }
 0x22d   : > { %2779 = vmatmul.mubr.bf16.gmra.mrb[156].mxu0 %v8174_v25  ;;  %v7265_v25 = vld [vmem:[%s9833_s7 + $0x140] sm:$0xff]  }
 0x22e   : > { %2786 = vmatprep.mubr.bf16.mxu0 %v8051_v0  ;;  %6666 = vmatprep.subr.bf16.mxu1 %v7265_v25 }
 0x22f   : > { %6667 = vmatpush3.bf16.msra.mxu1 %v7265_v25  ;;  %6119 = vmatpush3.bf16.msra.mxu0 %v7266_v41 }
 0x230   : > { %v5776_v33 = vpop.f32.mrb[52].mxu0  ;;  %v5918_v37 = vpop.f32.mrb[56].mxu1  ;;  %6120 = vmatprep.subr.bf16.mxu0 %v7267_v5  ;;  %v7270_v5 = vld [vmem:[%s9833_s7 + $0x120] sm:$0xff]  }
 0x231   : > { %v5777_v59 = vpop.f32.mrb[53].mxu0  ;;  %v5919_v36 = vpop.f32.mrb[57].mxu1 }
 0x232   : > { %v8496_v10 = vadd.f32 %v5777_v59, %v5776_v33  ;;  %v8498_v22 = vadd.f32 %v5919_v36, %v5918_v37  ;;  %v5779_v40 = vpop.f32.mrb[54].mxu0  ;;  %v5921_v24 = vpop.f32.mrb[58].mxu1  ;;  %v7268_v33 = vld [vmem:[%s9833_s7 + $0x148] sm:$0xff]   ;;  %v7269_v37 = vld [vmem:[%s9833_s7 + $0xd8] sm:$0xff]  }
 0x233   : > { %v5780_v56 = vpop.f32.mrb[55].mxu0  ;;  %v5922_v0 = vpop.f32.mrb[59].mxu1  ;;  %6668 = vmatprep.subr.bf16.mxu1 %v7268_v33  ;;  %6121 = vmatpush3.bf16.msra.mxu0 %v7269_v37  ;;  %v7272_v37 = vld [vmem:[%s9833_s7 + $0xe0] sm:$0xff]  }
 0x234   : > { %v8506_v7 = vadd.f32 %v5780_v56, %v5779_v40  ;;  %v8508_v19 = vadd.f32 %v5922_v0, %v5921_v24  ;;  %6669 = vmatpush3.bf16.msra.mxu1 %v7268_v33  ;;  %v7271_v33 = vld [vmem:[%s9833_s7 + $0x150] sm:$0xff]   ;;  %6122 = vmatprep.subr.bf16.mxu0 %v7270_v5 }
 0x235   : > { %2787 = vmatmul.mubr.bf16.gmra.mrb[160].mxu0 %v8187_v17  ;;  %6670 = vmatprep.subr.bf16.mxu1 %v7271_v33 }
 0x236   : > { %9905 = vst [vmem:[#allocation8_spill] sm:$0xff] %v8508_v19  ;;  %2794 = vmatprep.mubr.bf16.mxu0 %v8170_v11 }
 0x237   : > { %6123 = vmatpush3.bf16.msra.mxu0 %v7272_v37 }
 0x238   : > { %v5782_v59 = vpop.f32.mrb[56].mxu0  ;;  %v5924_v36 = vpop.f32.mrb[60].mxu1  ;;  %6671 = vmatpush3.bf16.msra.mxu1 %v7271_v33  ;;  %v7276_v33 = vld [vmem:[%s9833_s7 + $0x130] sm:$0xff]  }
 0x239   : > { %v5783_v40 = vpop.f32.mrb[57].mxu0  ;;  %v5925_v24 = vpop.f32.mrb[61].mxu1 }
 0x23a   : > { %v8524_v39 = vadd.f32 %v5783_v40, %v5782_v59  ;;  %v8526_v56 = vadd.f32 %v5925_v24, %v5924_v36  ;;  %v5785_v17 = vpop.f32.mrb[58].mxu0  ;;  %v5927_v25 = vpop.f32.mrb[62].mxu1  ;;  %v7273_v59 = vld [vmem:[%s9833_s7 + $0x128] sm:$0xff]   ;;  %v7274_v36 = vld [vmem:[%s9833_s7 + $0x158] sm:$0xff]  }
 0x23b   : > { %v5786_v11 = vpop.f32.mrb[59].mxu0  ;;  %v5928_v0 = vpop.f32.mrb[63].mxu1  ;;  %6124 = vmatprep.subr.bf16.mxu0 %v7273_v59  ;;  %6672 = vmatprep.subr.bf16.mxu1 %v7274_v36  ;;  %v7277_v59 = vld [vmem:[%s9833_s7 + $0x160] sm:$0xff]  }
 0x23c   : > { %v8528_v41 = vadd.f32 %v5786_v11, %v5785_v17  ;;  %v8530_v42 = vadd.f32 %v5928_v0, %v5927_v25  ;;  %6673 = vmatpush3.bf16.msra.mxu1 %v7274_v36  ;;  %v7280_v36 = vld [vmem:[%s9833_s7 + $0x168] sm:$0xff]  }
 0x23d   : > { %2795 = vmatmul.mubr.bf16.gmra.mrb[164].mxu0 %v8215_v48  ;;  %6674 = vmatprep.subr.bf16.mxu1 %v7277_v59 }
 0x23e   : > { %9906 = vst [vmem:[#allocation9_spill] sm:$0xff] %v8528_v41  ;;  %9907 = vst [vmem:[#allocation10_spill] sm:$0xff] %v8530_v42  ;;  %2802 = vmatprep.mubr.bf16.mxu0 %v8194_v28  ;;  %v7275_v28 = vld [vmem:[%s9833_s7 + $0xe8] sm:$0xff]  }
 0x23f   : > { %6125 = vmatpush3.bf16.msra.mxu0 %v7275_v28 }
 0x240   : > { %v5788_v40 = vpop.f32.mrb[60].mxu0  ;;  %v5930_v24 = vpop.f32.mrb[64].mxu1  ;;  %6126 = vmatprep.subr.bf16.mxu0 %v7276_v33  ;;  %6675 = vmatpush3.bf16.msra.mxu1 %v7277_v59  ;;  %v7281_v33 = vld [vmem:[%s9833_s7 + $0xf8] sm:$0xff]  }
 0x241   : > { %v5789_v48 = vpop.f32.mrb[61].mxu0  ;;  %v5931_v17 = vpop.f32.mrb[65].mxu1  ;;  %6676 = vmatprep.subr.bf16.mxu1 %v7280_v36 }
 0x242   : > { %v8552_v25 = vadd.f32 %v5789_v48, %v5788_v40  ;;  %v8554_v11 = vadd.f32 %v5931_v17, %v5930_v24  ;;  %v5791_v0 = vpop.f32.mrb[62].mxu0  ;;  %v5933_v5 = vpop.f32.mrb[66].mxu1 }
 0x243   : > { %v5792_v2 = vpop.f32.mrb[63].mxu0  ;;  %v5934_v13 = vpop.f32.mrb[67].mxu1 }
 0x244   : > { %9908 = vst [vmem:[#allocation11_spill] sm:$0xff] %v8554_v11  ;;  %v8556_v19 = vadd.f32 %v5792_v2, %v5791_v0  ;;  %v8558_v37 = vadd.f32 %v5934_v13, %v5933_v5  ;;  %v7278_v13 = vld [vmem:[%s9833_s7 + $0xf0] sm:$0xff]   ;;  %v7279_v2 = vld [vmem:[%s9833_s7 + $0x138] sm:$0xff]   ;;  %6677 = vmatpush3.bf16.msra.mxu1 %v7280_v36 }
 0x245   : > { %2803 = vmatmul.mubr.bf16.gmra.mrb[168].mxu0 %v8228_v46 }
 0x246   : > { %9909 = vst [vmem:[#allocation12_spill] sm:$0xff] %v8558_v37  ;;  %2810 = vmatprep.mubr.bf16.mxu0 %v9900_v50  ;;  %6127 = vmatpush3.bf16.msra.mxu0 %v7278_v13  ;;  %v7282_v13 = vld [vmem:[%s9833_s7 + $0x170] sm:$0xff]  }
 0x247   : > { %6128 = vmatprep.subr.bf16.mxu0 %v7279_v2  ;;  %6678 = vmatprep.subr.bf16.mxu1 %v7282_v13  ;;  %v7283_v2 = vld [vmem:[%s9833_s7 + $0x178] sm:$0xff]  }
 0x248   : > { %v5794_v40 = vpop.f32.mrb[64].mxu0  ;;  %v5936_v24 = vpop.f32.mrb[68].mxu1  ;;  %6679 = vmatpush3.bf16.msra.mxu1 %v7282_v13 }
 0x249   : > { %v5795_v46 = vpop.f32.mrb[65].mxu0  ;;  %v5937_v28 = vpop.f32.mrb[69].mxu1  ;;  %6680 = vmatprep.subr.bf16.mxu1 %v7283_v2 }
 0x24a   : > { %v8577_v48 = vadd.f32 %v5795_v46, %v5794_v40  ;;  %v8579_v17 = vadd.f32 %v5937_v28, %v5936_v24  ;;  %v5797_v0 = vpop.f32.mrb[66].mxu0  ;;  %v5939_v5 = vpop.f32.mrb[70].mxu1  ;;  %6129 = vmatpush3.bf16.msra.mxu0 %v7281_v33 }
 0x24b   : > { %v5798_v50 = vpop.f32.mrb[67].mxu0  ;;  %v5940_v37 = vpop.f32.mrb[71].mxu1 }
 0x24c   : > { %9910 = vst [vmem:[#allocation13_spill] sm:$0xff] %v8577_v48  ;;  %9911 = vst [vmem:[#allocation14_spill] sm:$0xff] %v8579_v17  ;;  %v8584_v11 = vadd.f32 %v5798_v50, %v5797_v0  ;;  %v8586_v59 = vadd.f32 %v5940_v37, %v5939_v5  ;;  %6681 = vmatpush3.bf16.msra.mxu1 %v7283_v2 }
 0x24d   : > { %2811 = vmatmul.mubr.bf16.gmra.mrb[172].mxu0 %v7629_v14 }
 0x24e   : > { %9912 = vst [vmem:[#allocation15_spill] sm:$0xff] %v8584_v11  ;;  %9913 = vst [vmem:[#allocation16_spill] sm:$0xff] %v8586_v59 }
 0x250   : > { %v5800_v40 = vpop.f32.mrb[68].mxu0  ;;  %v5942_v24 = vpop.f32.mrb[72].mxu1 }
 0x251   : > { %v5801_v50 = vpop.f32.mrb[69].mxu0  ;;  %v5943_v46 = vpop.f32.mrb[73].mxu1 }
 0x252   : > { %v8595_v37 = vadd.f32 %v5801_v50, %v5800_v40  ;;  %v8597_v36 = vadd.f32 %v5943_v46, %v5942_v24  ;;  %v5803_v28 = vpop.f32.mrb[70].mxu0  ;;  %v5945_v0 = vpop.f32.mrb[74].mxu1 }
 0x253   : > { %v5804_v5 = vpop.f32.mrb[71].mxu0  ;;  %v5946_v14 = vpop.f32.mrb[75].mxu1 }
 0x254   : > { %9914 = vst [vmem:[#allocation17_spill] sm:$0xff] %v8595_v37  ;;  %9915 = vst [vmem:[#allocation18_spill] sm:$0xff] %v8597_v36  ;;  %v8599_v33 = vadd.f32 %v5804_v5, %v5803_v28  ;;  %v8601_v59 = vadd.f32 %v5946_v14, %v5945_v0 }
 0x256   : > { %9916 = vst [vmem:[#allocation19_spill] sm:$0xff] %v8601_v59 }
 0x258   : > { %v5806_v11 = vpop.f32.mrb[72].mxu0  ;;  %v5948_v17 = vpop.f32.mrb[76].mxu1 }
 0x259   : > { %v5807_v48 = vpop.f32.mrb[73].mxu0  ;;  %v5949_v13 = vpop.f32.mrb[77].mxu1 }
 0x25a   : > { %v8603_v42 = vadd.f32 %v5807_v48, %v5806_v11  ;;  %v8605_v41 = vadd.f32 %v5949_v13, %v5948_v17  ;;  %v5809_v40 = vpop.f32.mrb[74].mxu0  ;;  %v5951_v24 = vpop.f32.mrb[78].mxu1 }
 0x25b   : > { %v5810_v50 = vpop.f32.mrb[75].mxu0  ;;  %v5952_v46 = vpop.f32.mrb[79].mxu1 }
 0x25c   : > { %9917 = vst [vmem:[#allocation20_spill] sm:$0xff] %v8605_v41  ;;  %v8607_v36 = vadd.f32 %v5810_v50, %v5809_v40  ;;  %v8609_v37 = vadd.f32 %v5952_v46, %v5951_v24 }
 0x260   : > { %v5812_v28 = vpop.f32.mrb[76].mxu0 }
 0x261   : > { %v5813_v14 = vpop.f32.mrb[77].mxu0 }
 0x262   : > { %v8611_v0 = vadd.f32 %v5813_v14, %v5812_v28  ;;  %v5815_v2 = vpop.f32.mrb[78].mxu0 }
 0x263   : > { %v5816_v5 = vpop.f32.mrb[79].mxu0 }
 0x264   : > { %v8613_v59 = vadd.f32 %v5816_v5, %v5815_v2 }
 0x268   : > { %v6540_v11 = vpop.f32.mrb[80].mxu0 }
 0x269   : > { %v1881_v48 = vadd.f32 %v6540_v11, %v8403_v55  ;;  %v1872_v17 = vpop.f32.mrb[81].mxu0 }
 0x26a   : > { %v1873_v13 = vadd.f32 %v8393_v23, %v1872_v17  ;;  %v6541_v41 = vpop.f32.mrb[82].mxu0 }
 0x26b   : > { %v8618_v40 = vadd.f32 %v8391_v29, %v1881_v48  ;;  %v1884_v24 = vadd.f32 %v6541_v41, %v8407_v6  ;;  %v1875_v50 = vpop.f32.mrb[83].mxu0 }
 0x26c   : > { %v8622_v46 = vadd.f32 %v8141_v16, %v1873_v13  ;;  %v1876_v28 = vadd.f32 %v8397_v21, %v1875_v50 }
 0x26d   : > { %v8626_v14 = vadd.f32 %v8395_v34, %v1884_v24 }
 0x26e   : > { %v8629_v55 = vadd.f32 %v8151_v53, %v1876_v28 }
 0x270   : > { %v6544_v2 = vpop.f32.mrb[84].mxu0 }
 0x271   : > { %v1897_v23 = vadd.f32 %v6544_v2, %v8425_v62  ;;  %v1888_v5 = vpop.f32.mrb[85].mxu0 }
 0x272   : > { %v1889_v29 = vadd.f32 %v8413_v60, %v1888_v5  ;;  %v6545_v11 = vpop.f32.mrb[86].mxu0 }
 0x273   : > { %v8634_v6 = vadd.f32 %v8411_v35, %v1897_v23  ;;  %v1900_v16 = vadd.f32 %v6545_v11, %v8429_v63  ;;  %v1891_v41 = vpop.f32.mrb[87].mxu0 }
 0x274   : > { %v8638_v21 = vadd.f32 %v8401_v1, %v1889_v29  ;;  %v1892_v34 = vadd.f32 %v8417_v49, %v1891_v41 }
 0x275   : > { %v8642_v53 = vadd.f32 %v8415_v32, %v1900_v16 }
 0x276   : > { %v8645_v62 = vadd.f32 %v8405_v52, %v1892_v34 }
 0x278   : > { %v6548_v48 = vpop.f32.mrb[88].mxu0 }
 0x279   : > { %v1913_v60 = vadd.f32 %v6548_v48, %v8446_v15  ;;  %v1904_v17 = vpop.f32.mrb[89].mxu0 }
 0x27a   : > { %v1905_v35 = vadd.f32 %v8436_v44, %v1904_v17  ;;  %v6549_v13 = vpop.f32.mrb[90].mxu0 }
 0x27b   : > { %v8650_v63 = vadd.f32 %v8434_v9, %v1913_v60  ;;  %v1916_v1 = vadd.f32 %v6549_v13, %v8450_v61  ;;  %v1907_v24 = vpop.f32.mrb[91].mxu0 }
 0x27c   : > { %v8654_v49 = vadd.f32 %v8423_v58, %v1905_v35  ;;  %v1908_v32 = vadd.f32 %v8440_v57, %v1907_v24  ;;  %v9919_v35 = vld [vmem:[#allocation10_spill] sm:$0xff] }
 0x27d   : > { %v8658_v52 = vadd.f32 %v8438_v54, %v1916_v1  ;;  %v9920_v1 = vld [vmem:[#allocation8_spill] sm:$0xff] }
 0x27e   : > { %v8661_v15 = vadd.f32 %v8427_v31, %v1908_v32 }
 0x280   : > { %v6552_v50 = vpop.f32.mrb[92].mxu0 }
 0x281   : > { %v1929_v44 = vadd.f32 %v6552_v50, %v8466_v38  ;;  %v1920_v28 = vpop.f32.mrb[93].mxu0 }
 0x282   : > { %v1921_v9 = vadd.f32 %v8456_v26, %v1920_v28  ;;  %v6553_v2 = vpop.f32.mrb[94].mxu0 }
 0x283   : > { %v8666_v61 = vadd.f32 %v8454_v51, %v1929_v44  ;;  %v1932_v58 = vadd.f32 %v6553_v2, %v8470_v45  ;;  %v1923_v23 = vpop.f32.mrb[95].mxu0 }
 0x284   : > { %v8670_v57 = vadd.f32 %v8444_v43, %v1921_v9  ;;  %v1924_v54 = vadd.f32 %v8460_v4, %v1923_v23 }
 0x285   : > { %v8674_v31 = vadd.f32 %v8458_v18, %v1932_v58  ;;  %v9924_v58 = vld [vmem:[#allocation11_spill] sm:$0xff] }
 0x286   : > { %v8677_v38 = vadd.f32 %v8448_v12, %v1924_v54  ;;  %v8692_v12 = vld [vmem:[%s9833_s7 + $0x80] sm:$0xff]   ;;  %v9925_v54 = vld [vmem:[#allocation15_spill] sm:$0xff] }
 0x287   : > { %6714 = vmatprep.subr.bf16.mxu1 %v8692_v12 }
 0x288   : > { %v6556_v5 = vpop.f32.mrb[96].mxu0 }
 0x289   : > { %v1945_v26 = vadd.f32 %v6556_v5, %v8496_v10  ;;  %v1936_v29 = vpop.f32.mrb[97].mxu0 }
 0x28a   : > { %v1937_v51 = vadd.f32 %v8486_v30, %v1936_v29  ;;  %v6557_v11 = vpop.f32.mrb[98].mxu0 }
 0x28b   : > { %v8682_v45 = vadd.f32 %v8488_v3, %v1945_v26  ;;  %v1948_v43 = vadd.f32 %v6557_v11, %v8506_v7  ;;  %v1939_v16 = vpop.f32.mrb[99].mxu0  ;;  %v9926_v26 = vld [vmem:[#allocation16_spill] sm:$0xff] }
 0x28c   : > { %v8686_v4 = vadd.f32 %v8464_v20, %v1937_v51  ;;  %v1940_v18 = vadd.f32 %v8490_v8, %v1939_v16  ;;  %v9927_v51 = vld [vmem:[#allocation12_spill] sm:$0xff] }
 0x28d   : > { %v8695_v10 = vadd.f32 %v8492_v47, %v1948_v43 }
 0x28e   : > { %v8698_v30 = vadd.f32 %v8468_v27, %v1940_v18  ;;  %v9918_v27 = vld [vmem:[#allocation9_spill] sm:$0xff] }
 0x290   : > { %v6560_v3 = vpop.f32.mrb[100].mxu0 }
 0x291   : > { %v1961_v7 = vadd.f32 %v6560_v3, %v8552_v25  ;;  %v1952_v20 = vpop.f32.mrb[101].mxu0 }
 0x292   : > { %v1953_v41 = vadd.f32 %v8524_v39, %v1952_v20  ;;  %v6561_v8 = vpop.f32.mrb[102].mxu0  ;;  %v9921_v39 = vld [vmem:[#allocation17_spill] sm:$0xff] }
 0x293   : > { %v8704_v34 = vadd.f32 %v8526_v56, %v1961_v7  ;;  %v1964_v48 = vadd.f32 %v6561_v8, %v8556_v19  ;;  %v1955_v60 = vpop.f32.mrb[103].mxu0  ;;  %v9922_v56 = vld [vmem:[#allocation13_spill] sm:$0xff]  ;;  %v9923_v19 = vld [vmem:[#allocation14_spill] sm:$0xff]  ;;  %v9928_v8 = vld [vmem:[#allocation20_spill] sm:$0xff] }
 0x294   : > { %v8708_v47 = vadd.f32 %v8498_v22, %v1953_v41  ;;  %v1956_v17 = vadd.f32 %v9918_v27, %v1955_v60 }
 0x295   : > { %v8712_v13 = vadd.f32 %v9919_v35, %v1964_v48  ;;  %v9930_v35 = vld [vmem:[#allocation18_spill] sm:$0xff] }
 0x296   : > { %v8715_v25 = vadd.f32 %v9920_v1, %v1956_v17 }
 0x298   : > { %v6564_v24 = vpop.f32.mrb[104].mxu0 }
 0x299   : > { %v1977_v32 = vadd.f32 %v6564_v24, %v9921_v39  ;;  %v1968_v50 = vpop.f32.mrb[105].mxu0  ;;  %v9932_v39 = vld [vmem:[#allocation19_spill] sm:$0xff] }
 0x29a   : > { %v1969_v44 = vadd.f32 %v9922_v56, %v1968_v50  ;;  %v6565_v28 = vpop.f32.mrb[106].mxu0 }
 0x29b   : > { %v8720_v9 = vadd.f32 %v9923_v19, %v1977_v32  ;;  %v1980_v22 = vadd.f32 %v6565_v28, %v8599_v33  ;;  %v1971_v2 = vpop.f32.mrb[107].mxu0 }
 0x29c   : > { %v8724_v23 = vadd.f32 %v9924_v58, %v1969_v44  ;;  %v1972_v5 = vadd.f32 %v9925_v54, %v1971_v2  ;;  %v8764_v54 = vld [vmem:[%s9831_s5] ss:$0 sm:$0xff] }
 0x29d   : > { %v8728_v29 = vadd.f32 %v9926_v26, %v1980_v22 }
 0x29e   : > { %v8731_v11 = vadd.f32 %v9927_v51, %v1972_v5  ;;  %v8770_v51 = vld [vmem:[%s9832_s6] ss:$0 sm:$0xff] }
 0x2a0   : > { %v6568_v43 = vpop.f32.mrb[108].mxu0  ;;  %v6636_v16 = vpop.f32.mrb[80].mxu1 }
 0x2a1   : > { %v1993_v18 = vadd.f32 %v6568_v43, %v8611_v0  ;;  %v1984_v3 = vpop.f32.mrb[109].mxu0  ;;  %v2853_v7 = vpop.f32.mrb[81].mxu1 }
 0x2a2   : > { %v1985_v33 = vadd.f32 %v8603_v42, %v1984_v3  ;;  %v6569_v20 = vpop.f32.mrb[110].mxu0  ;;  %v6637_v41 = vpop.f32.mrb[82].mxu1 }
 0x2a3   : > { %v8736_v48 = vadd.f32 %v9928_v8, %v1993_v18  ;;  %v1996_v60 = vadd.f32 %v6569_v20, %v8613_v59  ;;  %v1987_v27 = vpop.f32.mrb[111].mxu0  ;;  %v2856_v17 = vpop.f32.mrb[83].mxu1 }
 0x2a4   : > { %v8740_v1 = vadd.f32 %v9930_v35, %v1985_v33  ;;  %v1988_v24 = vadd.f32 %v8607_v36, %v1987_v27  ;;  %v7289_v36 = vld [vmem:[%s9833_s7 + $0x40] sm:$0xff]  }
 0x2a5   : > { %9929 = vst [vmem:[#allocation9_spill] sm:$0xff] %v8736_v48  ;;  %v8744_v0 = vadd.f32 %v8609_v37, %v1996_v60  ;;  %6250 = vmatprep.subr.bf16.mxu0 %v7289_v36 }
 0x2a6   : > { %v8747_v32 = vadd.f32 %v9932_v39, %v1988_v24 }
 0x2a7   : > { %9931 = vst [vmem:[#allocation10_spill] sm:$0xff] %v8744_v0 }
 0x2a8   : > { %9933 = vst [vmem:[#allocation8_spill] sm:$0xff] %v8747_v32  ;;  %v5994_v42 = vpop.f32.mrb[112].mxu0  ;;  %v8749_v50 = vpop.f32.mrb[84].mxu1 }
 0x2a9   : > { %v5995_v56 = vpop.f32.mrb[113].mxu0  ;;  %v8751_v44 = vpop.f32.mrb[85].mxu1 }
 0x2aa   : > { %v5996_v59 = vadd.f32 %v5995_v56, %v5994_v42  ;;  %v5997_v28 = vpop.f32.mrb[114].mxu0  ;;  %v8753_v19 = vpop.f32.mrb[86].mxu1 }
 0x2ab   : > { %v5998_v22 = vpop.f32.mrb[115].mxu0  ;;  %v8758_v37 = vpop.f32.mrb[87].mxu1 }
 0x2ac   : > { %v6816_v2 = vadd.f32 %v5996_v59, %v8622_v46  ;;  %v5999_v58 = vadd.f32 %v5998_v22, %v5997_v28 }
 0x2ae   : > { %v6817_v5 = vadd.f32 %v6816_v2, %v2853_v7  ;;  %v6824_v26 = vadd.f32 %v5999_v58, %v8629_v55 }
 0x2b0   : > { %v3018_v43 = vmul.f32 %v6817_v5, %v8764_v54  ;;  %v6825_v18 = vadd.f32 %v6824_v26, %v2856_v17  ;;  %v6000_v3 = vpop.f32.mrb[116].mxu0  ;;  %v8773_v46 = vpop.f32.mrb[88].mxu1 }
 0x2b1   : > { %v6001_v33 = vpop.f32.mrb[117].mxu0  ;;  %v8775_v20 = vpop.f32.mrb[89].mxu1 }
 0x2b2   : > { %v3056_v8 = vadd.f32 %v8770_v51, %v3018_v43  ;;  %v3019_v7 = vmul.f32 %v6825_v18, %v8764_v54  ;;  %v6002_v60 = vadd.f32 %v6001_v33, %v6000_v3  ;;  %v6003_v55 = vpop.f32.mrb[118].mxu0  ;;  %v8779_v27 = vpop.f32.mrb[90].mxu1 }
 0x2b3   : > { %v6004_v35 = vpop.f32.mrb[119].mxu0  ;;  %v8781_v24 = vpop.f32.mrb[91].mxu1 }
 0x2b4   : > { %v3057_v39 = vadd.f32 %v8770_v51, %v3019_v7  ;;  %v6812_v17 = vadd.f32 %v6002_v60, %v8618_v40  ;;  %v6005_v42 = vadd.f32 %v6004_v35, %v6003_v55  ;;  %vm3088_vm6 = vcmp.ge.f32.partialorder %v3056_v8, 0.0 }
 0x2b5   : > { %v3120_v56 = vmul.f32 0.05, %v3056_v8 }
 0x2b6   : > { %v6813_v59 = vadd.f32 %v6812_v17, %v6636_v16  ;;  %v6820_v28 = vadd.f32 %v6005_v42, %v8626_v14  ;;  %vm3089_vm7 = vcmp.ge.f32.partialorder %v3057_v39, 0.0  ;;  %v3121_v36 = vmul.f32 0.05, %v3057_v39 }
 0x2b7   : > { %v3152_v26 = vsel %vm3088_vm6, %v3056_v8, %v3120_v56 }
 0x2b8   : > { %v3020_v22 = vmul.f32 %v6813_v59, %v8764_v54  ;;  %v6821_v2 = vadd.f32 %v6820_v28, %v6637_v41  ;;  %v6006_v58 = vpop.f32.mrb[120].mxu0  ;;  %v8787_v5 = vpop.f32.mrb[92].mxu1  ;;  %v3153_v43 = vsel %vm3089_vm7, %v3057_v39, %v3121_v36 }
 0x2b9   : > { %v6007_v18 = vpop.f32.mrb[121].mxu0  ;;  %v8789_v3 = vpop.f32.mrb[93].mxu1  ;;  %v8791_v40 = vpack.c.bf16 %v3153_v43, %v3152_v26  ;;  %v7290_v43 = vld [vmem:[%s9833_s7] sm:$0xff]  }
 0x2ba   : > { %v3058_v33 = vadd.f32 %v8770_v51, %v3020_v22  ;;  %v3021_v16 = vmul.f32 %v6821_v2, %v8764_v54  ;;  %v6008_v14 = vadd.f32 %v6007_v18, %v6006_v58  ;;  %v6009_v7 = vpop.f32.mrb[122].mxu0  ;;  %v8795_v60 = vpop.f32.mrb[94].mxu1 }
 0x2bb   : > { %9934 = vst [vmem:[#allocation17_spill] sm:$0xff] %v8791_v40  ;;  %v6010_v55 = vpop.f32.mrb[123].mxu0  ;;  %v8797_v41 = vpop.f32.mrb[95].mxu1  ;;  %3744 = vmatprep.mubr.bf16.mxu0 %v8791_v40  ;;  %v3245_v8 = vshrl.u32 %v8791_v40, 16  ;;  %v3248_v35 = vshll.u32 %v8791_v40, 16 }
 0x2bc   : > { %v3122_v39 = vmul.f32 0.05, %v3058_v33  ;;  %v3059_v17 = vadd.f32 %v8770_v51, %v3021_v16  ;;  %v6832_v42 = vadd.f32 %v6008_v14, %v8638_v21  ;;  %vm3090_vm8 = vcmp.ge.f32.partialorder %v3058_v33, 0.0 }
 0x2bd   : > { %v6011_v56 = vadd.f32 %v6010_v55, %v6009_v7  ;;  %v3247_v59 = vrot.slane %v3245_v8, 7  ;;  %v3401_v28 = vrot.slane %v3248_v35, 1  ;;  %v7291_v55 = vld [vmem:[%s9833_s7 + $0x48] sm:$0xff]  }
 0x2be   : > { %vm3091_vm9 = vcmp.ge.f32.partialorder %v3059_v17, 0.0  ;;  %v3123_v36 = vmul.f32 0.05, %v3059_v17  ;;  %v6833_v22 = vadd.f32 %v6832_v42, %v8751_v44  ;;  %v3154_v14 = vsel %vm3090_vm8, %v3058_v33, %v3122_v39 }
 0x2bf   : > { %v6840_v2 = vadd.f32 %v6011_v56, %v8645_v62  ;;  %v3250_v58 = vor.u32 %v3248_v35, %v3247_v59  ;;  %v3402_v26 = vor.u32 %v3401_v28, %v3245_v8  ;;  %v7310_v8 = vld [vmem:[%s9833_s7 + $0x1c8] sm:$0xff]  }
 0x2c0   : > { %v3022_v18 = vmul.f32 %v6833_v22, %v8764_v54  ;;  %v6012_v16 = vpop.f32.mrb[124].mxu0  ;;  %v8810_v21 = vpop.f32.mrb[96].mxu1  ;;  %v3155_v7 = vsel %vm3091_vm9, %v3059_v17, %v3123_v36 }
 0x2c1   : > { %v6841_v44 = vadd.f32 %v6840_v2, %v8758_v37  ;;  %v6013_v62 = vpop.f32.mrb[125].mxu0  ;;  %v8816_v35 = vpop.f32.mrb[97].mxu1  ;;  %v8820_v42 = vsel %vm7623_vm2, 0, %v3250_v58  ;;  %v8824_v59 = vsel %vm8205_vm5, %v3402_v26, 0  ;;  %v8826_v28 = vpack.c.bf16 %v3155_v7, %v3154_v14  ;;  %v7294_v7 = vld [vmem:[%s9833_s7 + $0x50] sm:$0xff]  }
 0x2c2   : > { %9936 = vst [vmem:[#allocation13_spill] sm:$0xff] %v8820_v42  ;;  %9938 = vst [vmem:[#allocation14_spill] sm:$0xff] %v8824_v59  ;;  %v3060_v33 = vadd.f32 %v8770_v51, %v3022_v18  ;;  %v6014_v39 = vadd.f32 %v6013_v62, %v6012_v16  ;;  %v6015_v17 = vpop.f32.mrb[126].mxu0  ;;  %v8829_v36 = vpop.f32.mrb[98].mxu1  ;;  %3745 = vmatmul.mubr.bf16.vlgmr.msra.gmra.mrb[176].mxu0 %v8820_v42  ;;  %6682 = vmatprep.mubr.bf16.mxu1 %v8824_v59  ;;  %v7292_v18 = vld [vmem:[%s9833_s7 + $0x8] sm:$0xff]  }
 0x2c3   : > { %9939 = vst [vmem:[#allocation11_spill] sm:$0xff] %v8826_v28  ;;  %v3023_v37 = vmul.f32 %v6841_v44, %v8764_v54  ;;  %v6016_v22 = vpop.f32.mrb[127].mxu0  ;;  %v8834_v2 = vpop.f32.mrb[99].mxu1  ;;  %3752 = vmatprep.mubr.bf16.mxu0 %v8826_v28  ;;  %v3252_v58 = vshrl.u32 %v8826_v28, 16  ;;  %v3255_v26 = vshll.u32 %v8826_v28, 16  ;;  %6251 = vmatpush3.bf16.msra.mxu0 %v7290_v43 }
 0x2c4   : > { %v6828_v16 = vadd.f32 %v6014_v39, %v8634_v6  ;;  %v6017_v14 = vadd.f32 %v6016_v22, %v6015_v17  ;;  %6252 = vmatprep.subr.bf16.mxu0 %v7291_v55  ;;  %v3124_v44 = vmul.f32 0.05, %v3060_v33  ;;  %vm3092_vm10 = vcmp.ge.f32.partialorder %v3060_v33, 0.0  ;;  %v7295_v55 = vld [vmem:[%s9833_s7 + $0x10] sm:$0xff]  }
 0x2c5   : > { %v3061_v62 = vadd.f32 %v8770_v51, %v3023_v37  ;;  %v3254_v42 = vrot.slane %v3252_v58, 7  ;;  %v3403_v40 = vrot.slane %v3255_v26, 1 }
 0x2c6   : > { %v6829_v43 = vadd.f32 %v6828_v16, %v8749_v50  ;;  %v6836_v28 = vadd.f32 %v6017_v14, %v8642_v53  ;;  %v7285_v53 = vld [vmem:[%s9833_s7 + $0x88] sm:$0xff]   ;;  %v7296_v50 = vld [vmem:[%s9833_s7 + $0x58] sm:$0xff]  }
 0x2c7   : > { %vm3093_vm11 = vcmp.ge.f32.partialorder %v3061_v62, 0.0  ;;  %v3125_v59 = vmul.f32 0.05, %v3061_v62  ;;  %v3257_v0 = vor.u32 %v3255_v26, %v3254_v42  ;;  %v3404_v6 = vor.u32 %v3403_v40, %v3252_v58  ;;  %6253 = vmatpush3.bf16.msra.mxu0 %v7292_v18 }
 0x2c8   : > { %v3024_v39 = vmul.f32 %v6829_v43, %v8764_v54  ;;  %v6837_v17 = vadd.f32 %v6836_v28, %v8753_v19  ;;  %v6018_v37 = vpop.f32.mrb[128].mxu0  ;;  %v8854_v22 = vpop.f32.mrb[100].mxu1  ;;  %6254 = vmatprep.subr.bf16.mxu0 %v7294_v7  ;;  %v3156_v28 = vsel %vm3092_vm10, %v3060_v33, %v3124_v44 }
 0x2c9   : > { %v6019_v40 = vpop.f32.mrb[129].mxu0  ;;  %v8862_v42 = vpop.f32.mrb[101].mxu1  ;;  %v8866_v58 = vsel %vm7623_vm2, 0, %v3257_v0  ;;  %v8870_v19 = vsel %vm8205_vm5, %v3404_v6, 0  ;;  %v3157_v26 = vsel %vm3093_vm11, %v3061_v62, %v3125_v59  ;;  %v7297_v59 = vld [vmem:[%s9833_s7 + $0x18] sm:$0xff]  }
 0x2ca   : > { %9940 = vst [vmem:[#allocation15_spill] sm:$0xff] %v8866_v58  ;;  %9941 = vst [vmem:[#allocation16_spill] sm:$0xff] %v8870_v19  ;;  %v3062_v18 = vadd.f32 %v8770_v51, %v3024_v39  ;;  %v3025_v16 = vmul.f32 %v6837_v17, %v8764_v54  ;;  %v6020_v14 = vadd.f32 %v6019_v40, %v6018_v37  ;;  %v6021_v7 = vpop.f32.mrb[130].mxu0  ;;  %v8876_v43 = vpop.f32.mrb[102].mxu1  ;;  %3753 = vmatmul.mubr.bf16.gmra.mrb[180].mxu0 %v8866_v58  ;;  %v7286_v39 = vld [vmem:[%s9833_s7 + $0x90] sm:$0xff]  }
 0x2cb   : > { %6683 = vmatmul.mubr.bf16.vlgmr.msra.gmra.mrb[112].mxu1 %v8870_v19  ;;  %v6022_v0 = vpop.f32.mrb[131].mxu0  ;;  %v8880_v48 = vpop.f32.mrb[103].mxu1  ;;  %v8882_v6 = vpack.c.bf16 %v3157_v26, %v3156_v28  ;;  %6255 = vmatpush3.bf16.msra.mxu0 %v7295_v55 }
 0x2cc   : > { %6715 = vmatpush3.bf16.msra.mxu1 %v8692_v12  ;;  %v3126_v33 = vmul.f32 0.05, %v3062_v18  ;;  %v3063_v44 = vadd.f32 %v8770_v51, %v3025_v16  ;;  %v6848_v62 = vadd.f32 %v6020_v14, %v8654_v49  ;;  %6256 = vmatprep.subr.bf16.mxu0 %v7296_v50  ;;  %v7299_v12 = vld [vmem:[%s9833_s7 + $0x60] sm:$0xff]   ;;  %vm3094_vm12 = vcmp.ge.f32.partialorder %v3062_v18, 0.0 }
 0x2cd   : > { %9942 = vst [vmem:[#allocation12_spill] sm:$0xff] %v8882_v6  ;;  %6716 = vmatprep.subr.bf16.mxu1 %v7285_v53  ;;  %v6023_v55 = vadd.f32 %v6022_v0, %v6021_v7  ;;  %3760 = vmatprep.mubr.bf16.mxu0 %v8882_v6  ;;  %v3259_v17 = vshrl.u32 %v8882_v6, 16  ;;  %v3262_v37 = vshll.u32 %v8882_v6, 16  ;;  %v7300_v16 = vld [vmem:[%s9833_s7 + $0x20] sm:$0xff]  }
 0x2ce   : > { %vm3095_vm13 = vcmp.ge.f32.partialorder %v3063_v44, 0.0  ;;  %v3127_v49 = vmul.f32 0.05, %v3063_v44  ;;  %v6849_v40 = vadd.f32 %v6848_v62, %v8775_v20  ;;  %v3158_v6 = vsel %vm3094_vm12, %v3062_v18, %v3126_v33 }
 0x2cf   : > { %v6856_v28 = vadd.f32 %v6023_v55, %v8661_v15  ;;  %v3261_v26 = vrot.slane %v3259_v17, 7  ;;  %v3405_v50 = vrot.slane %v3262_v37, 1  ;;  %6257 = vmatpush3.bf16.msra.mxu0 %v7297_v59 }
 0x2d0   : > { %6717 = vmatpush3.bf16.msra.mxu1 %v7285_v53  ;;  %v3026_v14 = vmul.f32 %v6849_v40, %v8764_v54  ;;  %v6024_v7 = vpop.f32.mrb[132].mxu0  ;;  %v8905_v0 = vpop.f32.mrb[104].mxu1  ;;  %v3159_v58 = vsel %vm3095_vm13, %v3063_v44, %v3127_v49  ;;  %6258 = vmatprep.subr.bf16.mxu0 %v7299_v12  ;;  %v7287_v40 = vld [vmem:[%s9833_s7 + $0x98] sm:$0xff]   ;;  %v7302_v49 = vld [vmem:[%s9833_s7 + $0x28] sm:$0xff]  }
 0x2d1   : > { %6718 = vmatprep.subr.bf16.mxu1 %v7286_v39  ;;  %v6857_v15 = vadd.f32 %v6856_v28, %v8781_v24  ;;  %v6025_v20 = vpop.f32.mrb[133].mxu0  ;;  %v8909_v62 = vpop.f32.mrb[105].mxu1  ;;  %v3264_v53 = vor.u32 %v3262_v37, %v3261_v26  ;;  %v3406_v59 = vor.u32 %v3405_v50, %v3259_v17  ;;  %v8911_v55 = vpack.c.bf16 %v3159_v58, %v3158_v6  ;;  %v7301_v24 = vld [vmem:[%s9833_s7 + $0x68] sm:$0xff]   ;;  %v7288_v50 = vld [vmem:[%s9833_s7 + $0xa0] sm:$0xff]  }
 0x2d2   : > { %v3064_v19 = vadd.f32 %v8770_v51, %v3026_v14  ;;  %v6026_v32 = vadd.f32 %v6025_v20, %v6024_v7  ;;  %v6027_v18 = vpop.f32.mrb[134].mxu0  ;;  %v8917_v33 = vpop.f32.mrb[106].mxu1  ;;  %v9955_v56 = vld [vmem:[#allocation16_spill] sm:$0xff] }
 0x2d3   : > { %9943 = vst [vmem:[#allocation20_spill] sm:$0xff] %v8911_v55  ;;  %v3027_v44 = vmul.f32 %v6857_v15, %v8764_v54  ;;  %v8925_v58 = vsel %vm7623_vm2, 0, %v3264_v53  ;;  %v8929_v6 = vsel %vm8205_vm5, %v3406_v59, 0  ;;  %v6028_v12 = vpop.f32.mrb[135].mxu0  ;;  %v8931_v17 = vpop.f32.mrb[107].mxu1  ;;  %v3266_v37 = vshrl.u32 %v8911_v55, 16  ;;  %6259 = vmatpush3.bf16.msra.mxu0 %v7300_v16 }
 0x2d4   : > { %9944 = vst [vmem:[#allocation18_spill] sm:$0xff] %v8925_v58  ;;  %9945 = vst [vmem:[#allocation19_spill] sm:$0xff] %v8929_v6  ;;  %6719 = vmatpush3.bf16.msra.mxu1 %v7286_v39  ;;  %v6844_v28 = vadd.f32 %v6026_v32, %v8650_v63  ;;  %3761 = vmatmul.mubr.bf16.gmra.mrb[184].mxu0 %v8925_v58  ;;  %v6029_v26 = vadd.f32 %v6028_v12, %v6027_v18  ;;  %v7304_v39 = vld [vmem:[%s9833_s7 + $0x70] sm:$0xff]   ;;  %v3128_v16 = vmul.f32 0.05, %v3064_v19 }
 0x2d5   : > { %6686 = vmatprep.mubr.bf16.mxu1 %v8929_v6  ;;  %v3065_v14 = vadd.f32 %v8770_v51, %v3027_v44  ;;  %3768 = vmatprep.mubr.bf16.mxu0 %v8911_v55  ;;  %v3268_v7 = vrot.slane %v3266_v37, 7  ;;  %v3269_v63 = vshll.u32 %v8911_v55, 16  ;;  %vm3096_vm14 = vcmp.ge.f32.partialorder %v3064_v19, 0.0  ;;  %v7305_v18 = vld [vmem:[%s9833_s7 + $0x30] sm:$0xff]  }
 0x2d6   : > { %6720 = vmatprep.subr.bf16.mxu1 %v7287_v40  ;;  %v6845_v32 = vadd.f32 %v6844_v28, %v8773_v46  ;;  %v6852_v15 = vadd.f32 %v6029_v26, %v8658_v52  ;;  %6260 = vmatprep.subr.bf16.mxu0 %v7301_v24 }
 0x2d7   : > { %vm3097_vm15 = vcmp.ge.f32.partialorder %v3065_v14, 0.0  ;;  %v3129_v20 = vmul.f32 0.05, %v3065_v14  ;;  %v3271_v53 = vor.u32 %v3269_v63, %v3268_v7  ;;  %v3407_v59 = vrot.slane %v3269_v63, 1  ;;  %6261 = vmatpush3.bf16.msra.mxu0 %v7302_v49 }
 0x2d8   : > { %6721 = vmatpush3.bf16.msra.mxu1 %v7287_v40  ;;  %v3028_v44 = vmul.f32 %v6845_v32, %v8764_v54  ;;  %v6853_v12 = vadd.f32 %v6852_v15, %v8779_v27  ;;  %v6030_v55 = vpop.f32.mrb[136].mxu0  ;;  %v8956_v58 = vpop.f32.mrb[108].mxu1  ;;  %6262 = vmatprep.subr.bf16.mxu0 %v7304_v39  ;;  %v3160_v49 = vsel %vm3096_vm14, %v3064_v19, %v3128_v16  ;;  %v7293_v27 = vld [vmem:[%s9833_s7 + $0xa8] sm:$0xff]   ;;  %v7306_v19 = vld [vmem:[%s9833_s7 + $0x78] sm:$0xff]  }
 0x2d9   : > { %6722 = vmatprep.subr.bf16.mxu1 %v7288_v50  ;;  %v6031_v52 = vpop.f32.mrb[137].mxu0  ;;  %v8958_v46 = vpop.f32.mrb[109].mxu1  ;;  %v8962_v40 = vsel %vm7623_vm2, 0, %v3271_v53  ;;  %v3408_v24 = vor.u32 %v3407_v59, %v3266_v37  ;;  %v3161_v28 = vsel %vm3097_vm15, %v3065_v14, %v3129_v20 }
 0x2da   : > { %9946 = vst [vmem:[#allocation4_spill] sm:$0xff] %v8962_v40  ;;  %v3066_v26 = vadd.f32 %v8770_v51, %v3028_v44  ;;  %v3029_v39 = vmul.f32 %v6853_v12, %v8764_v54  ;;  %v6032_v7 = vadd.f32 %v6031_v52, %v6030_v55  ;;  %v6033_v63 = vpop.f32.mrb[138].mxu0  ;;  %v8971_v32 = vpop.f32.mrb[110].mxu1  ;;  %v8973_v15 = vpack.c.bf16 %v3161_v28, %v3160_v49  ;;  %v7307_v55 = vld [vmem:[%s9833_s7 + $0x38] sm:$0xff]   ;;  %v7298_v44 = vld [vmem:[%s9833_s7 + $0xb0] sm:$0xff]  }
 0x2db   : > { %v8980_v37 = vsel %vm8205_vm5, %v3408_v24, 0  ;;  %v6034_v16 = vpop.f32.mrb[139].mxu0  ;;  %v8982_v14 = vpop.f32.mrb[111].mxu1  ;;  %6263 = vmatpush3.bf16.msra.mxu0 %v7305_v18 }
 0x2dc   : > { %9947 = vst [vmem:[#allocation6_spill] sm:$0xff] %v8973_v15  ;;  %9948 = vst [vmem:[#allocation21_spill] sm:$0xff] %v8980_v37  ;;  %6723 = vmatpush3.bf16.msra.mxu1 %v7288_v50  ;;  %v3130_v20 = vmul.f32 0.05, %v3066_v26  ;;  %v3067_v53 = vadd.f32 %v8770_v51, %v3029_v39  ;;  %v6864_v59 = vadd.f32 %v6032_v7, %v8670_v57  ;;  %3769 = vmatmul.mubr.bf16.gmra.mrb[188].mxu0 %v8962_v40 }
 0x2dd   : > { %6687 = vmatmul.mubr.bf16.gmra.mrb[116].mxu1 %v8980_v37  ;;  %vm3098_vm0 = vcmp.ge.f32.partialorder %v3066_v26, 0.0  ;;  %v6035_v50 = vadd.f32 %v6034_v16, %v6033_v63  ;;  %3776 = vmatprep.mubr.bf16.mxu0 %v8973_v15  ;;  %v3273_v18 = vshrl.u32 %v8973_v15, 16  ;;  %v3276_v12 = vshll.u32 %v8973_v15, 16 }
 0x2de   : > { %6724 = vmatprep.subr.bf16.mxu1 %v7293_v27  ;;  %vm3099_vm1 = vcmp.ge.f32.partialorder %v3067_v53, 0.0  ;;  %v3131_v52 = vmul.f32 0.05, %v3067_v53  ;;  %v6865_v57 = vadd.f32 %v6864_v59, %v8789_v3  ;;  %6264 = vmatprep.subr.bf16.mxu0 %v7306_v19  ;;  %v3162_v63 = vsel %vm3098_vm0, %v3066_v26, %v3130_v20 }
 0x2df   : > { %v6872_v24 = vadd.f32 %v6035_v50, %v8677_v38  ;;  %v3275_v49 = vrot.slane %v3273_v18, 7  ;;  %v3409_v28 = vrot.slane %v3276_v12, 1  ;;  %6265 = vmatpush3.bf16.msra.mxu0 %v7307_v55  ;;  %v7303_v38 = vld [vmem:[%s9833_s7 + $0xb8] sm:$0xff]  }
 0x2e0   : > { %6725 = vmatpush3.bf16.msra.mxu1 %v7293_v27  ;;  %v3030_v39 = vmul.f32 %v6865_v57, %v8764_v54  ;;  %v6036_v7 = vpop.f32.mrb[140].mxu0  ;;  %v3163_v16 = vsel %vm3099_vm1, %v3067_v53, %v3131_v52 }
 0x2e1   : > { %6726 = vmatprep.subr.bf16.mxu1 %v7298_v44  ;;  %v6873_v15 = vadd.f32 %v6872_v24, %v8797_v41  ;;  %v6037_v40 = vpop.f32.mrb[141].mxu0  ;;  %v3278_v37 = vor.u32 %v3276_v12, %v3275_v49  ;;  %v3410_v6 = vor.u32 %v3409_v28, %v3273_v18  ;;  %v9002_v3 = vpack.c.bf16 %v3163_v16, %v3162_v63 }
 0x2e2   : > { %v3068_v27 = vadd.f32 %v8770_v51, %v3030_v39  ;;  %v6038_v19 = vadd.f32 %v6037_v40, %v6036_v7  ;;  %v6039_v55 = vpop.f32.mrb[142].mxu0 }
 0x2e3   : > { %v3031_v59 = vmul.f32 %v6873_v15, %v8764_v54  ;;  %v9011_v26 = vsel %vm7623_vm2, 0, %v3278_v37  ;;  %v9015_v41 = vsel %vm8205_vm5, %v3410_v6, 0  ;;  %v6040_v20 = vpop.f32.mrb[143].mxu0  ;;  %v3280_v53 = vshrl.u32 %v9002_v3, 16  ;;  %v7308_v15 = vld [vmem:[%s9833_s7 + $0x1c0] sm:$0xff]  }
 0x2e4   : > { %6727 = vmatpush3.bf16.msra.mxu1 %v7298_v44  ;;  %v6860_v50 = vadd.f32 %v6038_v19, %v8666_v61  ;;  %3777 = vmatmul.mubr.bf16.gmra.mrb[192].mxu0 %v9011_v26  ;;  %v6041_v40 = vadd.f32 %v6040_v20, %v6039_v55  ;;  %v3132_v37 = vmul.f32 0.05, %v3068_v27  ;;  %v3283_v12 = vshll.u32 %v9002_v3, 16 }
 0x2e5   : > { %6690 = vmatprep.mubr.bf16.mxu1 %v9015_v41  ;;  %v3069_v18 = vadd.f32 %v8770_v51, %v3031_v59  ;;  %3784 = vmatprep.mubr.bf16.mxu0 %v9002_v3  ;;  %v3282_v6 = vrot.slane %v3280_v53, 7  ;;  %vm3100_vm3 = vcmp.ge.f32.partialorder %v3068_v27, 0.0 }
 0x2e6   : > { %6728 = vmatprep.subr.bf16.mxu1 %v7303_v38  ;;  %v6861_v61 = vadd.f32 %v6860_v50, %v8787_v5  ;;  %v6868_v44 = vadd.f32 %v6041_v40, %v8674_v31  ;;  %v3411_v24 = vrot.slane %v3283_v12, 1  ;;  %v3164_v5 = vsel %vm3100_vm3, %v3068_v27, %v3132_v37 }
 0x2e7   : > { %vm3101_vm4 = vcmp.ge.f32.partialorder %v3069_v18, 0.0  ;;  %v3133_v52 = vmul.f32 0.05, %v3069_v18  ;;  %v3285_v57 = vor.u32 %v3283_v12, %v3282_v6 }
 0x2e8   : > { %6729 = vmatpush3.bf16.msra.mxu1 %v7303_v38  ;;  %v3032_v49 = vmul.f32 %v6861_v61, %v8764_v54  ;;  %v6869_v28 = vadd.f32 %v6868_v44, %v8795_v60  ;;  %v6042_v39 = vpop.f32.mrb[144].mxu0  ;;  %v3412_v16 = vor.u32 %v3411_v24, %v3280_v53 }
 0x2e9   : > { %6386 = vmatprep.subr.bf16.mxu1 %v7308_v15  ;;  %v6043_v7 = vpop.f32.mrb[145].mxu0  ;;  %v9033_v63 = vsel %vm7623_vm2, 0, %v3285_v57  ;;  %v3165_v19 = vsel %vm3101_vm4, %v3069_v18, %v3133_v52 }
 0x2ea   : > { %v3070_v31 = vadd.f32 %v8770_v51, %v3032_v49  ;;  %v3033_v55 = vmul.f32 %v6869_v28, %v8764_v54  ;;  %v6044_v59 = vadd.f32 %v6043_v7, %v6042_v39  ;;  %v6045_v38 = vpop.f32.mrb[146].mxu0  ;;  %v9037_v20 = vpack.c.bf16 %v3165_v19, %v3164_v5 }
 0x2eb   : > { %v9041_v60 = vsel %vm8205_vm5, %v3412_v16, 0  ;;  %v6046_v50 = vpop.f32.mrb[147].mxu0 }
 0x2ec   : > { %v3134_v40 = vmul.f32 0.05, %v3070_v31  ;;  %v3071_v15 = vadd.f32 %v8770_v51, %v3033_v55  ;;  %v6880_v53 = vadd.f32 %v6044_v59, %v8686_v4  ;;  %3785 = vmatmul.mubr.bf16.gmra.mrb[196].mxu0 %v9033_v63  ;;  %6691 = vmatmul.mubr.bf16.gmra.mrb[120].mxu1 %v9041_v60  ;;  %vm3102_vm6 = vcmp.ge.f32.partialorder %v3070_v31, 0.0 }
 0x2ed   : > { %v6047_v27 = vadd.f32 %v6046_v50, %v6045_v38  ;;  %3792 = vmatprep.mubr.bf16.mxu0 %v9037_v20  ;;  %v3287_v37 = vshrl.u32 %v9037_v20, 16  ;;  %v3290_v18 = vshll.u32 %v9037_v20, 16 }
 0x2ee   : > { %vm3103_vm7 = vcmp.ge.f32.partialorder %v3071_v15, 0.0  ;;  %v3135_v6 = vmul.f32 0.05, %v3071_v15  ;;  %v6881_v12 = vadd.f32 %v6880_v53, %v8816_v35  ;;  %v3166_v24 = vsel %vm3102_vm6, %v3070_v31, %v3134_v40 }
 0x2ef   : > { %v6888_v61 = vadd.f32 %v6047_v27, %v8698_v30  ;;  %v3289_v44 = vrot.slane %v3287_v37, 7  ;;  %v3413_v4 = vrot.slane %v3290_v18, 1 }
 0x2f0   : > { %v3034_v52 = vmul.f32 %v6881_v12, %v8764_v54  ;;  %v6048_v57 = vpop.f32.mrb[148].mxu0  ;;  %v3167_v49 = vsel %vm3103_vm7, %v3071_v15, %v3135_v6 }
 0x2f1   : > { %v6889_v28 = vadd.f32 %v6888_v61, %v8834_v2  ;;  %v6049_v39 = vpop.f32.mrb[149].mxu0  ;;  %v3292_v7 = vor.u32 %v3290_v18, %v3289_v44  ;;  %v3414_v16 = vor.u32 %v3413_v4, %v3287_v37  ;;  %v9054_v5 = vpack.c.bf16 %v3167_v49, %v3166_v24 }
 0x2f2   : > { %v3072_v19 = vadd.f32 %v8770_v51, %v3034_v52  ;;  %v6050_v55 = vadd.f32 %v6049_v39, %v6048_v57  ;;  %v6051_v35 = vpop.f32.mrb[150].mxu0 }
 0x2f3   : > { %v3035_v30 = vmul.f32 %v6889_v28, %v8764_v54  ;;  %v9060_v59 = vsel %vm7623_vm2, 0, %v3292_v7  ;;  %v9064_v31 = vsel %vm8205_vm5, %v3414_v16, 0  ;;  %v6052_v2 = vpop.f32.mrb[151].mxu0  ;;  %v3294_v38 = vshrl.u32 %v9054_v5, 16 }
 0x2f4   : > { %v6876_v50 = vadd.f32 %v6050_v55, %v8682_v45  ;;  %3793 = vmatmul.mubr.bf16.gmra.mrb[200].mxu0 %v9060_v59  ;;  %6694 = vmatprep.mubr.bf16.mxu1 %v9064_v31  ;;  %v6053_v40 = vadd.f32 %v6052_v2, %v6051_v35  ;;  %v3136_v15 = vmul.f32 0.05, %v3072_v19  ;;  %v3297_v37 = vshll.u32 %v9054_v5, 16 }
 0x2f5   : > { %v3073_v53 = vadd.f32 %v8770_v51, %v3035_v30  ;;  %3800 = vmatprep.mubr.bf16.mxu0 %v9054_v5  ;;  %v3296_v27 = vrot.slane %v3294_v38, 7  ;;  %vm3104_vm8 = vcmp.ge.f32.partialorder %v3072_v19, 0.0 }
 0x2f6   : > { %v6877_v18 = vadd.f32 %v6876_v50, %v8810_v21  ;;  %v6884_v6 = vadd.f32 %v6053_v40, %v8695_v10  ;;  %v3415_v61 = vrot.slane %v3297_v37, 1  ;;  %v3168_v28 = vsel %vm3104_vm8, %v3072_v19, %v3136_v15 }
 0x2f7   : > { %vm3105_vm9 = vcmp.ge.f32.partialorder %v3073_v53, 0.0  ;;  %v3137_v45 = vmul.f32 0.05, %v3073_v53  ;;  %v3299_v12 = vor.u32 %v3297_v37, %v3296_v27 }
 0x2f8   : > { %v3036_v44 = vmul.f32 %v6877_v18, %v8764_v54  ;;  %v6885_v4 = vadd.f32 %v6884_v6, %v8829_v36  ;;  %v6054_v52 = vpop.f32.mrb[152].mxu0  ;;  %v3416_v49 = vor.u32 %v3415_v61, %v3294_v38 }
 0x2f9   : > { %v6055_v57 = vpop.f32.mrb[153].mxu0  ;;  %v9079_v24 = vsel %vm7623_vm2, 0, %v3299_v12  ;;  %v3169_v39 = vsel %vm3105_vm9, %v3073_v53, %v3137_v45 }
 0x2fa   : > { %v3074_v21 = vadd.f32 %v8770_v51, %v3036_v44  ;;  %v3037_v10 = vmul.f32 %v6885_v4, %v8764_v54  ;;  %v6056_v7 = vadd.f32 %v6055_v57, %v6054_v52  ;;  %v6057_v16 = vpop.f32.mrb[154].mxu0  ;;  %v9083_v55 = vpack.c.bf16 %v3169_v39, %v3168_v28 }
 0x2fb   : > { %v9087_v36 = vsel %vm8205_vm5, %v3416_v49, 0  ;;  %v6058_v35 = vpop.f32.mrb[155].mxu0 }
 0x2fc   : > { %v3138_v30 = vmul.f32 0.05, %v3074_v21  ;;  %v3075_v2 = vadd.f32 %v8770_v51, %v3037_v10  ;;  %v6896_v38 = vadd.f32 %v6056_v7, %v8708_v47  ;;  %3801 = vmatmul.mubr.bf16.gmra.mrb[204].mxu0 %v9079_v24  ;;  %6695 = vmatmul.mubr.bf16.gmra.mrb[124].mxu1 %v9087_v36  ;;  %vm3106_vm10 = vcmp.ge.f32.partialorder %v3074_v21, 0.0 }
 0x2fd   : > { %v6059_v19 = vadd.f32 %v6058_v35, %v6057_v16  ;;  %3808 = vmatprep.mubr.bf16.mxu0 %v9083_v55  ;;  %v3301_v50 = vshrl.u32 %v9083_v55, 16  ;;  %v3304_v40 = vshll.u32 %v9083_v55, 16 }
 0x2fe   : > { %vm3107_vm11 = vcmp.ge.f32.partialorder %v3075_v2, 0.0  ;;  %v3139_v15 = vmul.f32 0.05, %v3075_v2  ;;  %v6897_v53 = vadd.f32 %v6896_v38, %v8862_v42  ;;  %v3170_v45 = vsel %vm3106_vm10, %v3074_v21, %v3138_v30 }
 0x2ff   : > { %v6904_v27 = vadd.f32 %v6059_v19, %v8715_v25  ;;  %v3303_v37 = vrot.slane %v3301_v50, 7  ;;  %v3417_v47 = vrot.slane %v3304_v40, 1 }
 0x300   : > { %v3038_v18 = vmul.f32 %v6897_v53, %v8764_v54  ;;  %v6060_v6 = vpop.f32.mrb[156].mxu0  ;;  %v3171_v12 = vsel %vm3107_vm11, %v3075_v2, %v3139_v15 }
 0x301   : > { %v6905_v61 = vadd.f32 %v6904_v27, %v8880_v48  ;;  %v6061_v44 = vpop.f32.mrb[157].mxu0  ;;  %v3306_v4 = vor.u32 %v3304_v40, %v3303_v37  ;;  %v3418_v52 = vor.u32 %v3417_v47, %v3301_v50  ;;  %v9100_v57 = vpack.c.bf16 %v3171_v12, %v3170_v45 }
 0x302   : > { %v3076_v49 = vadd.f32 %v8770_v51, %v3038_v18  ;;  %v6062_v28 = vadd.f32 %v6061_v44, %v6060_v6  ;;  %v6063_v42 = vpop.f32.mrb[158].mxu0 }
 0x303   : > { %v3039_v25 = vmul.f32 %v6905_v61, %v8764_v54  ;;  %v9106_v39 = vsel %vm7623_vm2, 0, %v3306_v4  ;;  %v9110_v21 = vsel %vm8205_vm5, %v3418_v52, 0  ;;  %v6064_v48 = vpop.f32.mrb[159].mxu0  ;;  %v3308_v10 = vshrl.u32 %v9100_v57, 16 }
 0x304   : > { %v6892_v7 = vadd.f32 %v6062_v28, %v8704_v34  ;;  %3809 = vmatmul.mubr.bf16.gmra.mrb[208].mxu0 %v9106_v39  ;;  %6698 = vmatprep.mubr.bf16.mxu1 %v9110_v21  ;;  %v6065_v16 = vadd.f32 %v6064_v48, %v6063_v42  ;;  %v3140_v35 = vmul.f32 0.05, %v3076_v49  ;;  %v3311_v38 = vshll.u32 %v9100_v57, 16 }
 0x305   : > { %v3077_v30 = vadd.f32 %v8770_v51, %v3039_v25  ;;  %3816 = vmatprep.mubr.bf16.mxu0 %v9100_v57  ;;  %v3310_v2 = vrot.slane %v3308_v10, 7  ;;  %vm3108_vm12 = vcmp.ge.f32.partialorder %v3076_v49, 0.0 }
 0x306   : > { %v6893_v19 = vadd.f32 %v6892_v7, %v8854_v22  ;;  %v6900_v50 = vadd.f32 %v6065_v16, %v8712_v13  ;;  %v3419_v15 = vrot.slane %v3311_v38, 1  ;;  %v3172_v45 = vsel %vm3108_vm12, %v3076_v49, %v3140_v35 }
 0x307   : > { %vm3109_vm13 = vcmp.ge.f32.partialorder %v3077_v30, 0.0  ;;  %v3141_v34 = vmul.f32 0.05, %v3077_v30  ;;  %v3313_v40 = vor.u32 %v3311_v38, %v3310_v2 }
 0x308   : > { %v3040_v53 = vmul.f32 %v6893_v19, %v8764_v54  ;;  %v6901_v27 = vadd.f32 %v6900_v50, %v8876_v43  ;;  %v6066_v37 = vpop.f32.mrb[160].mxu0  ;;  %v3420_v6 = vor.u32 %v3419_v15, %v3308_v10 }
 0x309   : > { %v6067_v47 = vpop.f32.mrb[161].mxu0  ;;  %v9125_v18 = vsel %vm7623_vm2, 0, %v3313_v40  ;;  %v3173_v12 = vsel %vm3109_vm13, %v3077_v30, %v3141_v34 }
 0x30a   : > { %v3078_v22 = vadd.f32 %v8770_v51, %v3040_v53  ;;  %v3041_v13 = vmul.f32 %v6901_v27, %v8764_v54  ;;  %v6068_v61 = vadd.f32 %v6067_v47, %v6066_v37  ;;  %v6069_v44 = vpop.f32.mrb[162].mxu0  ;;  %v9129_v4 = vpack.c.bf16 %v3173_v12, %v3172_v45 }
 0x30b   : > { %v9133_v43 = vsel %vm8205_vm5, %v3420_v6, 0  ;;  %v6070_v52 = vpop.f32.mrb[163].mxu0 }
 0x30c   : > { %v3142_v28 = vmul.f32 0.05, %v3078_v22  ;;  %v3079_v42 = vadd.f32 %v8770_v51, %v3041_v13  ;;  %v6912_v25 = vadd.f32 %v6068_v61, %v8724_v23  ;;  %3817 = vmatmul.mubr.bf16.gmra.mrb[212].mxu0 %v9125_v18  ;;  %6699 = vmatmul.mubr.bf16.gmra.mrb[128].mxu1 %v9133_v43  ;;  %vm3110_vm14 = vcmp.ge.f32.partialorder %v3078_v22, 0.0 }
 0x30d   : > { %v6071_v49 = vadd.f32 %v6070_v52, %v6069_v44  ;;  %3824 = vmatprep.mubr.bf16.mxu0 %v9129_v4  ;;  %v3315_v48 = vshrl.u32 %v9129_v4, 16  ;;  %v3318_v10 = vshll.u32 %v9129_v4, 16 }
 0x30e   : > { %vm3111_vm15 = vcmp.ge.f32.partialorder %v3079_v42, 0.0  ;;  %v3143_v7 = vmul.f32 0.05, %v3079_v42  ;;  %v6913_v16 = vadd.f32 %v6912_v25, %v8909_v62  ;;  %v3174_v19 = vsel %vm3110_vm14, %v3078_v22, %v3142_v28 }
 0x30f   : > { %v6920_v35 = vadd.f32 %v6071_v49, %v8731_v11  ;;  %v3317_v30 = vrot.slane %v3315_v48, 7  ;;  %v3421_v23 = vrot.slane %v3318_v10, 1 }
 0x310   : > { %v3042_v2 = vmul.f32 %v6913_v16, %v8764_v54  ;;  %v6072_v38 = vpop.f32.mrb[164].mxu0  ;;  %v3175_v50 = vsel %vm3111_vm15, %v3079_v42, %v3143_v7 }
 0x311   : > { %v6921_v34 = vadd.f32 %v6920_v35, %v8931_v17  ;;  %v6073_v40 = vpop.f32.mrb[165].mxu0  ;;  %v3320_v15 = vor.u32 %v3318_v10, %v3317_v30  ;;  %v3422_v53 = vor.u32 %v3421_v23, %v3315_v48  ;;  %v9146_v27 = vpack.c.bf16 %v3175_v50, %v3174_v19 }
 0x312   : > { %v3080_v37 = vadd.f32 %v8770_v51, %v3042_v2  ;;  %v6074_v47 = vadd.f32 %v6073_v40, %v6072_v38  ;;  %v6075_v62 = vpop.f32.mrb[166].mxu0 }
 0x313   : > { %v3043_v11 = vmul.f32 %v6921_v34, %v8764_v54  ;;  %v9152_v6 = vsel %vm7623_vm2, 0, %v3320_v15  ;;  %v9156_v45 = vsel %vm8205_vm5, %v3422_v53, 0  ;;  %v6076_v17 = vpop.f32.mrb[167].mxu0  ;;  %v3322_v12 = vshrl.u32 %v9146_v27, 16 }
 0x314   : > { %v6908_v22 = vadd.f32 %v6074_v47, %v8720_v9  ;;  %3825 = vmatmul.mubr.bf16.gmra.mrb[216].mxu0 %v9152_v6  ;;  %6702 = vmatprep.mubr.bf16.mxu1 %v9156_v45  ;;  %v6077_v13 = vadd.f32 %v6076_v17, %v6075_v62  ;;  %v3144_v61 = vmul.f32 0.05, %v3080_v37  ;;  %v3325_v28 = vshll.u32 %v9146_v27, 16 }
 0x315   : > { %v3081_v44 = vadd.f32 %v8770_v51, %v3043_v11  ;;  %3832 = vmatprep.mubr.bf16.mxu0 %v9146_v27  ;;  %v3324_v52 = vrot.slane %v3322_v12, 7  ;;  %vm3112_vm0 = vcmp.ge.f32.partialorder %v3080_v37, 0.0 }
 0x316   : > { %v6909_v42 = vadd.f32 %v6908_v22, %v8905_v0  ;;  %v6916_v25 = vadd.f32 %v6077_v13, %v8728_v29  ;;  %v3423_v48 = vrot.slane %v3325_v28, 1  ;;  %v3176_v2 = vsel %vm3112_vm0, %v3080_v37, %v3144_v61  ;;  %v9949_v22 = vld [vmem:[#allocation8_spill] sm:$0xff] }
 0x317   : > { %vm3113_vm1 = vcmp.ge.f32.partialorder %v3081_v44, 0.0  ;;  %v3145_v9 = vmul.f32 0.05, %v3081_v44  ;;  %v3327_v49 = vor.u32 %v3325_v28, %v3324_v52 }
 0x318   : > { %v3044_v10 = vmul.f32 %v6909_v42, %v8764_v54  ;;  %v6917_v7 = vadd.f32 %v6916_v25, %v8917_v33  ;;  %v6078_v16 = vpop.f32.mrb[168].mxu0  ;;  %v3424_v23 = vor.u32 %v3423_v48, %v3322_v12 }
 0x319   : > { %v6079_v35 = vpop.f32.mrb[169].mxu0  ;;  %v9171_v30 = vsel %vm7623_vm2, 0, %v3327_v49  ;;  %v3177_v38 = vsel %vm3113_vm1, %v3081_v44, %v3145_v9 }
 0x31a   : > { %v3082_v0 = vadd.f32 %v8770_v51, %v3044_v10  ;;  %v3045_v29 = vmul.f32 %v6917_v7, %v8764_v54  ;;  %v6080_v19 = vadd.f32 %v6079_v35, %v6078_v16  ;;  %v6081_v50 = vpop.f32.mrb[170].mxu0  ;;  %v9175_v34 = vpack.c.bf16 %v3177_v38, %v3176_v2 }
 0x31b   : > { %v9179_v33 = vsel %vm8205_vm5, %v3424_v23, 0  ;;  %v6082_v40 = vpop.f32.mrb[171].mxu0 }
 0x31c   : > { %v3146_v15 = vmul.f32 0.05, %v3082_v0  ;;  %v3083_v53 = vadd.f32 %v8770_v51, %v3045_v29  ;;  %v6928_v47 = vadd.f32 %v6080_v19, %v8740_v1  ;;  %3833 = vmatmul.mubr.bf16.gmra.mrb[220].mxu0 %v9171_v30  ;;  %6703 = vmatmul.mubr.bf16.gmra.mrb[132].mxu1 %v9179_v33  ;;  %vm3114_vm3 = vcmp.ge.f32.partialorder %v3082_v0, 0.0 }
 0x31d   : > { %v6083_v37 = vadd.f32 %v6082_v40, %v6081_v50  ;;  %3840 = vmatprep.mubr.bf16.mxu0 %v9175_v34  ;;  %v3329_v62 = vshrl.u32 %v9175_v34, 16  ;;  %v3332_v11 = vshll.u32 %v9175_v34, 16 }
 0x31e   : > { %vm3115_vm4 = vcmp.ge.f32.partialorder %v3083_v53, 0.0  ;;  %v3147_v17 = vmul.f32 0.05, %v3083_v53  ;;  %v6929_v12 = vadd.f32 %v6928_v47, %v8958_v46  ;;  %v3178_v52 = vsel %vm3114_vm3, %v3082_v0, %v3146_v15  ;;  %v7332_v46 = vld [vmem:[%s9832_s6] ss:$0 sm:$0xff]  ;;  %v9950_v0 = vld [vmem:[#allocation9_spill] sm:$0xff] }
 0x31f   : > { %v6936_v51 = vadd.f32 %v6083_v37, %v9949_v22  ;;  %v3331_v13 = vrot.slane %v3329_v62, 7  ;;  %v3425_v1 = vrot.slane %v3332_v11, 1  ;;  %v9951_v37 = vld [vmem:[#allocation10_spill] sm:$0xff] }
 0x320   : > { %v3046_v61 = vmul.f32 %v6929_v12, %v8764_v54  ;;  %v6084_v44 = vpop.f32.mrb[172].mxu0  ;;  %v3179_v28 = vsel %vm3115_vm4, %v3083_v53, %v3147_v17  ;;  %v7333_v54 = vld [vmem:[%s9831_s5] ss:$0 sm:$0xff] }
 0x321   : > { %v6937_v42 = vadd.f32 %v6936_v51, %v8982_v14  ;;  %v6085_v25 = vpop.f32.mrb[173].mxu0  ;;  %v3334_v9 = vor.u32 %v3332_v11, %v3331_v13  ;;  %v3426_v49 = vor.u32 %v3425_v1, %v3329_v62  ;;  %v9192_v48 = vpack.c.bf16 %v3179_v28, %v3178_v52 }
 0x322   : > { %v3084_v10 = vadd.f32 %v7332_v46, %v3046_v61  ;;  %v6086_v7 = vadd.f32 %v6085_v25, %v6084_v44  ;;  %v6087_v16 = vpop.f32.mrb[174].mxu0 }
 0x323   : > { %v3047_v35 = vmul.f32 %v7333_v54, %v6937_v42  ;;  %v9202_v14 = vsel %vm7623_vm2, 0, %v3334_v9  ;;  %v9206_v23 = vsel %vm8205_vm5, %v3426_v49, 0  ;;  %v6088_v2 = vpop.f32.mrb[175].mxu0  ;;  %v3336_v38 = vshrl.u32 %v9192_v48, 16 }
 0x324   : > { %v6924_v29 = vadd.f32 %v6086_v7, %v9950_v0  ;;  %3841 = vmatmul.mubr.bf16.gmra.mrb[224].mxu0 %v9202_v14  ;;  %6706 = vmatprep.mubr.bf16.mxu1 %v9206_v23  ;;  %v6089_v19 = vadd.f32 %v6088_v2, %v6087_v16  ;;  %v3148_v50 = vmul.f32 0.05, %v3084_v10  ;;  %v3339_v53 = vshll.u32 %v9192_v48, 16 }
 0x325   : > { %v3085_v40 = vadd.f32 %v7332_v46, %v3047_v35  ;;  %3848 = vmatprep.mubr.bf16.mxu0 %v9192_v48  ;;  %v3338_v15 = vrot.slane %v3336_v38, 7  ;;  %vm3116_vm6 = vcmp.ge.f32.partialorder %v3084_v10, 0.0 }
 0x326   : > { %v6925_v47 = vadd.f32 %v6924_v29, %v8956_v58  ;;  %v6932_v62 = vadd.f32 %v6089_v19, %v9951_v37  ;;  %v3427_v12 = vrot.slane %v3339_v53, 1  ;;  %v3180_v61 = vsel %vm3116_vm6, %v3084_v10, %v3148_v50 }
 0x327   : > { %vm3117_vm7 = vcmp.ge.f32.partialorder %v3085_v40, 0.0  ;;  %v3149_v11 = vmul.f32 0.05, %v3085_v40  ;;  %v3341_v17 = vor.u32 %v3339_v53, %v3338_v15 }
 0x328   : > { %v3048_v22 = vmul.f32 %v7333_v54, %v6925_v47  ;;  %v6933_v51 = vadd.f32 %v6932_v62, %v8971_v32  ;;  %v3428_v1 = vor.u32 %v3427_v12, %v3336_v38  ;;  %v7309_v12 = vld [vmem:[%s9833_s7 + $0x180] sm:$0xff]  }
 0x329   : > { %v9219_v13 = vsel %vm7623_vm2, 0, %v3341_v17  ;;  %v3181_v44 = vsel %vm3117_vm7, %v3085_v40, %v3149_v11  ;;  %v9952_v11 = vld [vmem:[#allocation7_spill] sm:$0xff]  ;;  %v9953_v17 = vmov 0  }
 0x32a   : > { %v3086_v52 = vadd.f32 %v7332_v46, %v3048_v22  ;;  %v3049_v28 = vmul.f32 %v7333_v54, %v6933_v51  ;;  %v9221_v42 = vpack.c.bf16 %v3181_v44, %v3180_v61  ;;  %v9225_v58 = vsel %vm8205_vm5, %v3428_v1, 0  ;;  %v9954_v22 = vld [vmem:[#allocation14_spill] sm:$0xff]  ;;  %v7311_v51 = vld [vmem:[%s9833_s7 + $0x188] sm:$0xff]  }
 0x32b   : > { %6707 = vmatmul.mubr.bf16.gmra.mrb[136].mxu1 %v9225_v58  ;;  %v9956_v1 = vld [vmem:[#allocation5_spill] sm:$0xff]  ;;  %v7312_v61 = vld [vmem:[%s9833_s7 + $0x1d0] sm:$0xff]  }
 0x32c   : > { %v3087_v25 = vadd.f32 %v7332_v46, %v3049_v28  ;;  %3849 = vmatmul.mubr.bf16.gmra.mrb[228].mxu0 %v9219_v13  ;;  %v3343_v32 = vshrl.u32 %v9221_v42, 16  ;;  %v3346_v9 = vshll.u32 %v9221_v42, 16  ;;  %vm3118_vm8 = vcmp.ge.f32.partialorder %v3086_v52, 0.0  ;;  %v9957_v44 = vld [vmem:[#allocation17_spill] sm:$0xff]  ;;  %v7314_v28 = vld [vmem:[%s9833_s7 + $0x1d8] sm:$0xff]  }
 0x32d   : > { %3856 = vmatprep.mubr.bf16.mxu0 %v9221_v42  ;;  %v3150_v49 = vmul.f32 0.05, %v3086_v52 }
 0x32e   : > { %v3345_v10 = vrot.slane %v3343_v32, 7  ;;  %v3429_v7 = vrot.slane %v3346_v9, 1  ;;  %vm3119_vm9 = vcmp.ge.f32.partialorder %v3087_v25, 0.0  ;;  %v3151_v16 = vmul.f32 0.05, %v3087_v25 }
 0x32f   : > { %v3182_v2 = vsel %vm3118_vm8, %v3086_v52, %v3150_v49  ;;  %v7313_v52 = vld [vmem:[%s9833_s7 + $0x190] sm:$0xff]   ;;  %v9960_v49 = vld [vmem:[#allocation13_spill] sm:$0xff] }
 0x330   : > { %v3348_v54 = vor.u32 %v3346_v9, %v3345_v10  ;;  %v3430_v35 = vor.u32 %v3429_v7, %v3343_v32  ;;  %v3183_v46 = vsel %vm3119_vm9, %v3087_v25, %v3151_v16  ;;  %v9958_v25 = vld [vmem:[#allocation19_spill] sm:$0xff]  ;;  %v9959_v32 = vld [vmem:[#allocation21_spill] sm:$0xff]  ;;  %v7316_v10 = vld [vmem:[%s9833_s7 + $0x1e0] sm:$0xff]  }
 0x331   : > { %v9232_v38 = vpack.c.bf16 %v3183_v46, %v3182_v2  ;;  %v7315_v9 = vld [vmem:[%s9833_s7 + $0x198] sm:$0xff]   ;;  %v7317_v16 = vld [vmem:[%s9833_s7 + $0x1a0] sm:$0xff]   ;;  %v7320_v46 = vld [vmem:[%s9833_s7 + $0x1f0] sm:$0xff]  }
 0x332   : > { %v9236_v0 = vsel %vm7623_vm2, 0, %v3348_v54  ;;  %v9240_v29 = vsel %vm8205_vm5, %v3430_v35, 0  ;;  %v9961_v7 = vld [vmem:[#allocation11_spill] sm:$0xff]  ;;  %v7318_v54 = vld [vmem:[%s9833_s7 + $0x1e8] sm:$0xff]  }
 0x333   : > { %6710 = vmatprep.mubr.bf16.mxu1 %v9240_v29  ;;  %v3350_v19 = vshrl.u32 %v9232_v38, 16  ;;  %v3353_v50 = vshll.u32 %v9232_v38, 16  ;;  %v7319_v35 = vld [vmem:[%s9833_s7 + $0x1a8] sm:$0xff]   ;;  %v9962_v2 = vld [vmem:[#allocation15_spill] sm:$0xff] }
 0x334   : > { %3857 = vmatmul.mubr.bf16.gmra.mrb[232].mxu0 %v9236_v0 }
 0x335   : > { %3864 = vmatprep.mubr.bf16.mxu0 %v9232_v38  ;;  %v3352_v40 = vrot.slane %v3350_v19, 7  ;;  %v3431_v15 = vrot.slane %v3353_v50, 1 }
 0x337   : > { %v3355_v53 = vor.u32 %v3353_v50, %v3352_v40  ;;  %v3432_v47 = vor.u32 %v3431_v15, %v3350_v19  ;;  %v9963_v19 = vld [vmem:[#allocation12_spill] sm:$0xff]  ;;  %v7321_v50 = vld [vmem:[%s9833_s7 + $0x1b0] sm:$0xff]   ;;  %v7322_v40 = vld [vmem:[%s9833_s7 + $0x1f8] sm:$0xff]  }
 0x338   : > { %v7323_v15 = vld [vmem:[%s9833_s7 + $0x1b8] sm:$0xff]  }
 0x339   : > { %v9249_v37 = vsel %vm7623_vm2, 0, %v3355_v53  ;;  %v9253_v62 = vsel %vm8205_vm5, %v3432_v47, 0  ;;  %v9964_v53 = vld [vmem:[#allocation18_spill] sm:$0xff]  ;;  %v7324_v47 = vld [vmem:[%s9833_s7 + $0x200] sm:$0xff]  }
 0x33a   : > { %6711 = vmatmul.mubr.bf16.gmra.mrb[140].mxu1 %v9253_v62 }
 0x33b   : > { %6730 = vmatprep.mubr.bf16.mxu1 %v9952_v11 }
 0x33c   : > { %3865 = vmatmul.mubr.bf16.gmra.mrb[236].mxu0 %v9249_v37 }
 0x33d   : > { %4210 = vmatprep.mubr.bf16.mxu0 %v9953_v17 }
 0x342   : > { %6731 = vmatmul.mubr.bf16.vlgmr.msra.gmra.mrb[112].mxu1 %v9954_v22  ;;  %v9967_v22 = vld [vmem:[#allocation6_spill] sm:$0xff] }
 0x343   : > { %6387 = vmatpush3.bf16.msra.mxu1 %v7309_v12  ;;  %6734 = vmatprep.mubr.bf16.mxu1 %v9955_v56  ;;  %v9965_v12 = vld [vmem:[#allocation20_spill] sm:$0xff] }
 0x344   : > { %4211 = vmatmul.mubr.bf16.vlgmr.msra.gmra.mrb[240].mxu0 %v9956_v1  ;;  %6388 = vmatprep.subr.bf16.mxu1 %v7310_v8  ;;  %v9966_v8 = vld [vmem:[#allocation4_spill] sm:$0xff] }
 0x345   : > { %4218 = vmatprep.mubr.bf16.mxu0 %v9957_v44  ;;  %v7327_v44 = vld [vmem:[%s9833_s7 + $0x218] sm:$0xff]  }
 0x347   : > { %6389 = vmatpush3.bf16.msra.mxu1 %v7311_v51  ;;  %v7325_v51 = vld [vmem:[%s9833_s7 + $0x208] sm:$0xff]  }
 0x348   : > { %6390 = vmatprep.subr.bf16.mxu1 %v7312_v61  ;;  %v7326_v61 = vld [vmem:[%s9833_s7 + $0x210] sm:$0xff]  }
 0x34a   : > { %6735 = vmatmul.mubr.bf16.gmra.mrb[116].mxu1 %v9958_v25 }
 0x34b   : > { %6738 = vmatprep.mubr.bf16.mxu1 %v9959_v32  ;;  %6391 = vmatpush3.bf16.msra.mxu1 %v7313_v52  ;;  %v7328_v52 = vld [vmem:[%s9833_s7 + $0x220] sm:$0xff]  }
 0x34c   : > { %4219 = vmatmul.mubr.bf16.gmra.mrb[244].mxu0 %v9960_v49  ;;  %6392 = vmatprep.subr.bf16.mxu1 %v7314_v28  ;;  %v7329_v28 = vld [vmem:[%s9833_s7 + $0x228] sm:$0xff]  }
 0x34d   : > { %4226 = vmatprep.mubr.bf16.mxu0 %v9961_v7 }
 0x34f   : > { %6393 = vmatpush3.bf16.msra.mxu1 %v7315_v9  ;;  %v7330_v9 = vld [vmem:[%s9833_s7 + $0x230] sm:$0xff]  }
 0x350   : > { %6394 = vmatprep.subr.bf16.mxu1 %v7316_v10 }
 0x352   : > { %6739 = vmatmul.mubr.bf16.gmra.mrb[120].mxu1 %v9015_v41 }
 0x353   : > { %6742 = vmatprep.mubr.bf16.mxu1 %v9041_v60  ;;  %6395 = vmatpush3.bf16.msra.mxu1 %v7317_v16 }
 0x354   : > { %4227 = vmatmul.mubr.bf16.gmra.mrb[248].mxu0 %v9962_v2  ;;  %6396 = vmatprep.subr.bf16.mxu1 %v7318_v54 }
 0x355   : > { %4234 = vmatprep.mubr.bf16.mxu0 %v9963_v19 }
 0x357   : > { %6397 = vmatpush3.bf16.msra.mxu1 %v7319_v35  ;;  %v7331_v35 = vld [vmem:[%s9833_s7 + $0x238] sm:$0xff]  }
 0x358   : > { %6398 = vmatprep.subr.bf16.mxu1 %v7320_v46 }
 0x35a   : > { %6743 = vmatmul.mubr.bf16.gmra.mrb[124].mxu1 %v9064_v31 }
 0x35b   : > { %6746 = vmatprep.mubr.bf16.mxu1 %v9087_v36  ;;  %6399 = vmatpush3.bf16.msra.mxu1 %v7321_v50 }
 0x35c   : > { %4235 = vmatmul.mubr.bf16.gmra.mrb[252].mxu0 %v9964_v53  ;;  %6400 = vmatprep.subr.bf16.mxu1 %v7322_v40 }
 0x35d   : > { %4242 = vmatprep.mubr.bf16.mxu0 %v9965_v12 }
 0x35f   : > { %6401 = vmatpush3.bf16.msra.mxu1 %v7323_v15 }
 0x360   : > { %6762 = vmatprep.subr.bf16.mxu1 %v7324_v47 }
 0x362   : > { %6747 = vmatmul.mubr.bf16.gmra.mrb[128].mxu1 %v9110_v21 }
 0x363   : > { %6750 = vmatprep.mubr.bf16.mxu1 %v9133_v43 }
 0x364   : > { %4243 = vmatmul.mubr.bf16.gmra.mrb[0].mxu0 %v9966_v8 }
 0x365   : > { %4250 = vmatprep.mubr.bf16.mxu0 %v9967_v22 }
 0x36a   : > { %6751 = vmatmul.mubr.bf16.gmra.mrb[132].mxu1 %v9156_v45 }
 0x36b   : > { %6754 = vmatprep.mubr.bf16.mxu1 %v9179_v33 }
 0x36c   : > { %4251 = vmatmul.mubr.bf16.gmra.mrb[4].mxu0 %v9011_v26 }
 0x36d   : > { %4258 = vmatprep.mubr.bf16.mxu0 %v9002_v3 }
 0x372   : > { %6755 = vmatmul.mubr.bf16.gmra.mrb[136].mxu1 %v9206_v23 }
 0x373   : > { %6758 = vmatprep.mubr.bf16.mxu1 %v9225_v58 }
 0x374   : > { %4259 = vmatmul.mubr.bf16.gmra.mrb[8].mxu0 %v9033_v63 }
 0x375   : > { %4266 = vmatprep.mubr.bf16.mxu0 %v9037_v20 }
 0x37a   : > { %6759 = vmatmul.mubr.bf16.gmra.mrb[140].mxu1 %v9240_v29 }
 0x37b   : > { %4725 = vmatprep.mubr.bf16.mxu1 %v9961_v7 }
 0x37c   : > { %4267 = vmatmul.mubr.bf16.gmra.mrb[12].mxu0 %v9060_v59 }
 0x37d   : > { %4274 = vmatprep.mubr.bf16.mxu0 %v9054_v5 }
 0x382   : > { %4726 = vmatmul.mubr.bf16.vlgmr.msra.gmra.mrb[144].mxu1 %v9962_v2 }
 0x383   : > { %6763 = vmatpush3.bf16.msra.mxu1 %v7324_v47  ;;  %4733 = vmatprep.mubr.bf16.mxu1 %v9963_v19 }
 0x384   : > { %4275 = vmatmul.mubr.bf16.gmra.mrb[16].mxu0 %v9079_v24  ;;  %6764 = vmatprep.subr.bf16.mxu1 %v7325_v51 }
 0x385   : > { %4282 = vmatprep.mubr.bf16.mxu0 %v9083_v55 }
 0x387   : > { %6765 = vmatpush3.bf16.msra.mxu1 %v7325_v51 }
 0x388   : > { %6766 = vmatprep.subr.bf16.mxu1 %v7326_v61 }
 0x38a   : > { %4734 = vmatmul.mubr.bf16.gmra.mrb[148].mxu1 %v9964_v53 }
 0x38b   : > { %4741 = vmatprep.mubr.bf16.mxu1 %v9965_v12  ;;  %6767 = vmatpush3.bf16.msra.mxu1 %v7326_v61 }
 0x38c   : > { %4283 = vmatmul.mubr.bf16.gmra.mrb[20].mxu0 %v9106_v39  ;;  %6768 = vmatprep.subr.bf16.mxu1 %v7327_v44 }
 0x38d   : > { %4290 = vmatprep.mubr.bf16.mxu0 %v9100_v57 }
 0x38f   : > { %6769 = vmatpush3.bf16.msra.mxu1 %v7327_v44 }
 0x390   : > { %6770 = vmatprep.subr.bf16.mxu1 %v7328_v52 }
 0x392   : > { %4742 = vmatmul.mubr.bf16.gmra.mrb[152].mxu1 %v9966_v8 }
 0x393   : > { %4749 = vmatprep.mubr.bf16.mxu1 %v9967_v22  ;;  %6771 = vmatpush3.bf16.msra.mxu1 %v7328_v52 }
 0x394   : > { %4291 = vmatmul.mubr.bf16.gmra.mrb[24].mxu0 %v9125_v18  ;;  %6772 = vmatprep.subr.bf16.mxu1 %v7329_v28 }
 0x395   : > { %4298 = vmatprep.mubr.bf16.mxu0 %v9129_v4  ;;  %v6130_v49 = vpop.f32.mrb[176].mxu0 }
 0x396   : > { %v6131_v10 = vpop.f32.mrb[177].mxu0 }
 0x397   : > { %v9369_v7 = vadd.f32 %v6131_v10, %v6130_v49  ;;  %v6133_v16 = vpop.f32.mrb[178].mxu0  ;;  %6773 = vmatpush3.bf16.msra.mxu1 %v7329_v28 }
 0x398   : > { %v6134_v54 = vpop.f32.mrb[179].mxu0  ;;  %6774 = vmatprep.subr.bf16.mxu1 %v7330_v9 }
 0x399   : > { %v9374_v2 = vadd.f32 %v6134_v54, %v6133_v16 }
 0x39a   : > { %4750 = vmatmul.mubr.bf16.gmra.mrb[156].mxu1 %v9011_v26 }
 0x39b   : > { %4757 = vmatprep.mubr.bf16.mxu1 %v9002_v3  ;;  %6775 = vmatpush3.bf16.msra.mxu1 %v7330_v9 }
 0x39c   : > { %4299 = vmatmul.mubr.bf16.gmra.mrb[28].mxu0 %v9152_v6  ;;  %6776 = vmatprep.subr.bf16.mxu1 %v7331_v35 }
 0x39d   : > { %4306 = vmatprep.mubr.bf16.mxu0 %v9146_v27  ;;  %v6136_v46 = vpop.f32.mrb[180].mxu0 }
 0x39e   : > { %v6137_v19 = vpop.f32.mrb[181].mxu0 }
 0x39f   : > { %v9380_v50 = vadd.f32 %v6137_v19, %v6136_v46  ;;  %v6139_v40 = vpop.f32.mrb[182].mxu0  ;;  %6777 = vmatpush3.bf16.msra.mxu1 %v7331_v35 }
 0x3a0   : > { %v6140_v15 = vpop.f32.mrb[183].mxu0 }
 0x3a1   : > { %v9382_v53 = vadd.f32 %v6140_v15, %v6139_v40 }
 0x3a2   : > { %4758 = vmatmul.mubr.bf16.gmra.mrb[160].mxu1 %v9033_v63 }
 0x3a3   : > { %4765 = vmatprep.mubr.bf16.mxu1 %v9037_v20 }
 0x3a4   : > { %4307 = vmatmul.mubr.bf16.gmra.mrb[32].mxu0 %v9171_v30 }
 0x3a5   : > { %4314 = vmatprep.mubr.bf16.mxu0 %v9175_v34 }
 0x3a7   : > { %v6142_v3 = vpop.f32.mrb[184].mxu0 }
 0x3a8   : > { %v6143_v26 = vpop.f32.mrb[185].mxu0 }
 0x3a9   : > { %v9388_v47 = vadd.f32 %v6143_v26, %v6142_v3  ;;  %v6145_v12 = vpop.f32.mrb[186].mxu0 }
 0x3aa   : > { %v6146_v8 = vpop.f32.mrb[187].mxu0  ;;  %4766 = vmatmul.mubr.bf16.gmra.mrb[164].mxu1 %v9060_v59 }
 0x3ab   : > { %v9391_v22 = vadd.f32 %v6146_v8, %v6145_v12  ;;  %4773 = vmatprep.mubr.bf16.mxu1 %v9054_v5 }
 0x3ac   : > { %4315 = vmatmul.mubr.bf16.gmra.mrb[36].mxu0 %v9202_v14 }
 0x3ad   : > { %4322 = vmatprep.mubr.bf16.mxu0 %v9192_v48 }
 0x3af   : > { %v6148_v63 = vpop.f32.mrb[188].mxu0 }
 0x3b0   : > { %v6149_v20 = vpop.f32.mrb[189].mxu0 }
 0x3b1   : > { %v9396_v51 = vadd.f32 %v6149_v20, %v6148_v63  ;;  %v6151_v61 = vpop.f32.mrb[190].mxu0 }
 0x3b2   : > { %v6152_v44 = vpop.f32.mrb[191].mxu0  ;;  %4774 = vmatmul.mubr.bf16.gmra.mrb[168].mxu1 %v9079_v24 }
 0x3b3   : > { %v9399_v52 = vadd.f32 %v6152_v44, %v6151_v61  ;;  %4781 = vmatprep.mubr.bf16.mxu1 %v9083_v55 }
 0x3b4   : > { %4323 = vmatmul.mubr.bf16.gmra.mrb[40].mxu0 %v9219_v13 }
 0x3b5   : > { %4330 = vmatprep.mubr.bf16.mxu0 %v9221_v42 }
 0x3b7   : > { %v6154_v5 = vpop.f32.mrb[192].mxu0 }
 0x3b8   : > { %v6155_v59 = vpop.f32.mrb[193].mxu0 }
 0x3b9   : > { %v9404_v28 = vadd.f32 %v6155_v59, %v6154_v5  ;;  %v6157_v9 = vpop.f32.mrb[194].mxu0 }
 0x3ba   : > { %v6158_v49 = vpop.f32.mrb[195].mxu0  ;;  %4782 = vmatmul.mubr.bf16.gmra.mrb[172].mxu1 %v9106_v39 }
 0x3bb   : > { %v9407_v10 = vadd.f32 %v6158_v49, %v6157_v9  ;;  %4789 = vmatprep.mubr.bf16.mxu1 %v9100_v57 }
 0x3bc   : > { %4331 = vmatmul.mubr.bf16.gmra.mrb[44].mxu0 %v9236_v0 }
 0x3bf   : > { %v6160_v24 = vpop.f32.mrb[196].mxu0 }
 0x3c0   : > { %v6161_v55 = vpop.f32.mrb[197].mxu0 }
 0x3c1   : > { %v9411_v16 = vadd.f32 %v6161_v55, %v6160_v24  ;;  %v6163_v54 = vpop.f32.mrb[198].mxu0 }
 0x3c2   : > { %v6164_v35 = vpop.f32.mrb[199].mxu0  ;;  %4790 = vmatmul.mubr.bf16.gmra.mrb[176].mxu1 %v9125_v18 }
 0x3c3   : > { %v9414_v46 = vadd.f32 %v6164_v35, %v6163_v54  ;;  %4797 = vmatprep.mubr.bf16.mxu1 %v9129_v4 }
 0x3c7   : > { %v6166_v19 = vpop.f32.mrb[200].mxu0 }
 0x3c8   : > { %v6167_v39 = vpop.f32.mrb[201].mxu0 }
 0x3c9   : > { %v9417_v40 = vadd.f32 %v6167_v39, %v6166_v19  ;;  %v6169_v15 = vpop.f32.mrb[202].mxu0 }
 0x3ca   : > { %v6170_v57 = vpop.f32.mrb[203].mxu0  ;;  %4798 = vmatmul.mubr.bf16.gmra.mrb[180].mxu1 %v9152_v6 }
 0x3cb   : > { %v9420_v3 = vadd.f32 %v6170_v57, %v6169_v15  ;;  %4805 = vmatprep.mubr.bf16.mxu1 %v9146_v27 }
 0x3cf   : > { %v6172_v26 = vpop.f32.mrb[204].mxu0 }
 0x3d0   : > { %v6173_v12 = vpop.f32.mrb[205].mxu0 }
 0x3d1   : > { %v9423_v8 = vadd.f32 %v6173_v12, %v6172_v26  ;;  %v6175_v18 = vpop.f32.mrb[206].mxu0 }
 0x3d2   : > { %v6176_v63 = vpop.f32.mrb[207].mxu0  ;;  %4806 = vmatmul.mubr.bf16.gmra.mrb[184].mxu1 %v9171_v30 }
 0x3d3   : > { %v9426_v4 = vadd.f32 %v6176_v63, %v6175_v18  ;;  %4813 = vmatprep.mubr.bf16.mxu1 %v9175_v34 }
 0x3d7   : > { %v6178_v20 = vpop.f32.mrb[208].mxu0 }
 0x3d8   : > { %v6179_v61 = vpop.f32.mrb[209].mxu0 }
 0x3d9   : > { %v9429_v44 = vadd.f32 %v6179_v61, %v6178_v20  ;;  %v6181_v6 = vpop.f32.mrb[210].mxu0 }
 0x3da   : > { %v6182_v5 = vpop.f32.mrb[211].mxu0  ;;  %4814 = vmatmul.mubr.bf16.gmra.mrb[188].mxu1 %v9202_v14 }
 0x3db   : > { %v9432_v27 = vadd.f32 %v6182_v5, %v6181_v6  ;;  %4821 = vmatprep.mubr.bf16.mxu1 %v9192_v48 }
 0x3df   : > { %v6184_v59 = vpop.f32.mrb[212].mxu0 }
 0x3e0   : > { %v6185_v9 = vpop.f32.mrb[213].mxu0 }
 0x3e1   : > { %v9435_v49 = vadd.f32 %v6185_v9, %v6184_v59  ;;  %v6187_v30 = vpop.f32.mrb[214].mxu0 }
 0x3e2   : > { %v6188_v24 = vpop.f32.mrb[215].mxu0  ;;  %4822 = vmatmul.mubr.bf16.gmra.mrb[192].mxu1 %v9219_v13 }
 0x3e3   : > { %v9438_v34 = vadd.f32 %v6188_v24, %v6187_v30  ;;  %4829 = vmatprep.mubr.bf16.mxu1 %v9221_v42 }
 0x3e7   : > { %v6190_v55 = vpop.f32.mrb[216].mxu0 }
 0x3e8   : > { %v6191_v54 = vpop.f32.mrb[217].mxu0 }
 0x3e9   : > { %v9441_v35 = vadd.f32 %v6191_v54, %v6190_v55  ;;  %v6193_v14 = vpop.f32.mrb[218].mxu0 }
 0x3ea   : > { %v6194_v19 = vpop.f32.mrb[219].mxu0  ;;  %4830 = vmatmul.mubr.bf16.gmra.mrb[196].mxu1 %v9236_v0 }
 0x3eb   : > { %v9444_v48 = vadd.f32 %v6194_v19, %v6193_v14  ;;  %4837 = vmatprep.mubr.bf16.mxu1 %v9232_v38 }
 0x3ef   : > { %v6196_v39 = vpop.f32.mrb[220].mxu0 }
 0x3f0   : > { %v6197_v15 = vpop.f32.mrb[221].mxu0 }
 0x3f1   : > { %v9447_v57 = vadd.f32 %v6197_v15, %v6196_v39  ;;  %v6199_v13 = vpop.f32.mrb[222].mxu0 }
 0x3f2   : > { %v6200_v26 = vpop.f32.mrb[223].mxu0  ;;  %4838 = vmatmul.mubr.bf16.gmra.mrb[200].mxu1 %v9249_v37 }
 0x3f3   : > { %v9450_v42 = vadd.f32 %v6200_v26, %v6199_v13  ;;  %4845 = vmatprep.mubr.bf16.mxu1 %v9953_v17 }
 0x3f7   : > { %v6202_v12 = vpop.f32.mrb[224].mxu0 }
 0x3f8   : > { %v6203_v18 = vpop.f32.mrb[225].mxu0 }
 0x3f9   : > { %v9453_v63 = vadd.f32 %v6203_v18, %v6202_v12  ;;  %v6205_v0 = vpop.f32.mrb[226].mxu0 }
 0x3fa   : > { %v6206_v20 = vpop.f32.mrb[227].mxu0  ;;  %4846 = vmatmul.mubr.bf16.gmra.mrb[204].mxu1 %v9956_v1 }
 0x3fb   : > { %v9456_v38 = vadd.f32 %v6206_v20, %v6205_v0  ;;  %6778 = vmatprep.mubr.bf16.mxu1 %v9955_v56 }
 0x3ff   : > { %v6208_v61 = vpop.f32.mrb[228].mxu0 }
 0x400   : > { %v6209_v6 = vpop.f32.mrb[229].mxu0 }
 0x401   : > { %v9459_v5 = vadd.f32 %v6209_v6, %v6208_v61  ;;  %v6211_v37 = vpop.f32.mrb[230].mxu0 }
 0x402   : > { %v6212_v59 = vpop.f32.mrb[231].mxu0  ;;  %6779 = vmatmul.mubr.bf16.vlgmr.msra.gmra.mrb[112].mxu1 %v9958_v25 }
 0x403   : > { %v9462_v17 = vadd.f32 %v6212_v59, %v6211_v37  ;;  %6782 = vmatprep.mubr.bf16.mxu1 %v9959_v32 }
 0x407   : > { %v6214_v9 = vpop.f32.mrb[232].mxu0 }
 0x408   : > { %v6215_v30 = vpop.f32.mrb[233].mxu0 }
 0x409   : > { %v9465_v24 = vadd.f32 %v6215_v30, %v6214_v9  ;;  %v6217_v1 = vpop.f32.mrb[234].mxu0 }
 0x40a   : > { %v6218_v55 = vpop.f32.mrb[235].mxu0  ;;  %6783 = vmatmul.mubr.bf16.gmra.mrb[116].mxu1 %v9015_v41 }
 0x40b   : > { %v9468_v56 = vadd.f32 %v6218_v55, %v6217_v1  ;;  %6786 = vmatprep.mubr.bf16.mxu1 %v9041_v60 }
 0x40f   : > { %v6220_v54 = vpop.f32.mrb[236].mxu0 }
 0x410   : > { %v6221_v14 = vpop.f32.mrb[237].mxu0 }
 0x411   : > { %v9471_v19 = vadd.f32 %v6221_v14, %v6220_v54  ;;  %v6223_v25 = vpop.f32.mrb[238].mxu0 }
 0x412   : > { %v6224_v39 = vpop.f32.mrb[239].mxu0  ;;  %6787 = vmatmul.mubr.bf16.gmra.mrb[120].mxu1 %v9064_v31 }
 0x413   : > { %v9474_v32 = vadd.f32 %v6224_v39, %v6223_v25  ;;  %6790 = vmatprep.mubr.bf16.mxu1 %v9087_v36 }
 0x417   : > { %v6266_v15 = vpop.f32.mrb[240].mxu0 }
 0x418   : > { %v6267_v13 = vpop.f32.mrb[241].mxu0 }
 0x419   : > { %v6268_v26 = vadd.f32 %v6267_v13, %v6266_v15  ;;  %v6269_v41 = vpop.f32.mrb[242].mxu0 }
 0x41a   : > { %v6270_v12 = vpop.f32.mrb[243].mxu0  ;;  %6791 = vmatmul.mubr.bf16.gmra.mrb[124].mxu1 %v9110_v21 }
 0x41b   : > { %v9479_v60 = vadd.f32 %v6268_v26, %v9369_v7  ;;  %v6271_v18 = vadd.f32 %v6270_v12, %v6269_v41  ;;  %6794 = vmatprep.mubr.bf16.mxu1 %v9133_v43 }
 0x41d   : > { %v9483_v0 = vadd.f32 %v6271_v18, %v9374_v2 }
 0x41f   : > { %v6272_v31 = vpop.f32.mrb[244].mxu0 }
 0x420   : > { %v6273_v20 = vpop.f32.mrb[245].mxu0 }
 0x421   : > { %v6274_v61 = vadd.f32 %v6273_v20, %v6272_v31  ;;  %v6275_v36 = vpop.f32.mrb[246].mxu0 }
 0x422   : > { %v6276_v6 = vpop.f32.mrb[247].mxu0  ;;  %6795 = vmatmul.mubr.bf16.gmra.mrb[128].mxu1 %v9156_v45 }
 0x423   : > { %v9487_v37 = vadd.f32 %v6274_v61, %v9380_v50  ;;  %v6277_v21 = vadd.f32 %v6276_v6, %v6275_v36  ;;  %6798 = vmatprep.mubr.bf16.mxu1 %v9179_v33 }
 0x425   : > { %v9491_v7 = vadd.f32 %v6277_v21, %v9382_v53 }
 0x427   : > { %v6278_v43 = vpop.f32.mrb[248].mxu0 }
 0x428   : > { %v6279_v59 = vpop.f32.mrb[249].mxu0 }
 0x429   : > { %v6280_v2 = vadd.f32 %v6279_v59, %v6278_v43  ;;  %v6281_v9 = vpop.f32.mrb[250].mxu0 }
 0x42a   : > { %v6282_v30 = vpop.f32.mrb[251].mxu0  ;;  %6799 = vmatmul.mubr.bf16.gmra.mrb[132].mxu1 %v9206_v23 }
 0x42b   : > { %v9495_v1 = vadd.f32 %v6280_v2, %v9388_v47  ;;  %v6283_v45 = vadd.f32 %v6282_v30, %v6281_v9  ;;  %6802 = vmatprep.mubr.bf16.mxu1 %v9225_v58 }
 0x42d   : > { %v9499_v50 = vadd.f32 %v6283_v45, %v9391_v22 }
 0x42f   : > { %v6284_v33 = vpop.f32.mrb[252].mxu0 }
 0x430   : > { %v6285_v55 = vpop.f32.mrb[253].mxu0 }
 0x431   : > { %v6286_v53 = vadd.f32 %v6285_v55, %v6284_v33  ;;  %v6287_v54 = vpop.f32.mrb[254].mxu0 }
 0x432   : > { %v6288_v14 = vpop.f32.mrb[255].mxu0  ;;  %6803 = vmatmul.mubr.bf16.gmra.mrb[136].mxu1 %v9240_v29 }
 0x433   : > { %v9503_v25 = vadd.f32 %v6286_v53, %v9396_v51  ;;  %v6289_v23 = vadd.f32 %v6288_v14, %v6287_v54  ;;  %6806 = vmatprep.mubr.bf16.mxu1 %v9253_v62 }
 0x435   : > { %v9507_v47 = vadd.f32 %v6289_v23, %v9399_v52 }
 0x437   : > { %v6290_v58 = vpop.f32.mrb[0].mxu0 }
 0x438   : > { %v6291_v39 = vpop.f32.mrb[1].mxu0 }
 0x439   : > { %v6292_v22 = vadd.f32 %v6291_v39, %v6290_v58  ;;  %v6293_v15 = vpop.f32.mrb[2].mxu0 }
 0x43a   : > { %v6294_v13 = vpop.f32.mrb[3].mxu0  ;;  %6807 = vmatmul.mubr.bf16.gmra.mrb[140].mxu1 %v9952_v11 }
 0x43b   : > { %v9511_v26 = vadd.f32 %v6292_v22, %v9404_v28  ;;  %v6295_v29 = vadd.f32 %v6294_v13, %v6293_v15 }
 0x43d   : > { %v9514_v51 = vadd.f32 %v6295_v29, %v9407_v10 }
 0x43f   : > { %v6296_v41 = vpop.f32.mrb[4].mxu0 }
 0x440   : > { %v6297_v12 = vpop.f32.mrb[5].mxu0 }
 0x441   : > { %v6298_v62 = vadd.f32 %v6297_v12, %v6296_v41  ;;  %v6299_v18 = vpop.f32.mrb[6].mxu0 }
 0x442   : > { %v6300_v52 = vpop.f32.mrb[7].mxu0 }
 0x443   : > { %v9517_v31 = vadd.f32 %v6298_v62, %v9411_v16  ;;  %v6301_v20 = vadd.f32 %v6300_v52, %v6299_v18 }
 0x445   : > { %v9520_v61 = vadd.f32 %v6301_v20, %v9414_v46 }
 0x447   : > { %v6302_v11 = vpop.f32.mrb[8].mxu0 }
 0x448   : > { %v6303_v36 = vpop.f32.mrb[9].mxu0 }
 0x449   : > { %v6304_v28 = vadd.f32 %v6303_v36, %v6302_v11  ;;  %v6305_v6 = vpop.f32.mrb[10].mxu0 }
 0x44a   : > { %v6306_v21 = vpop.f32.mrb[11].mxu0 }
 0x44b   : > { %v9523_v10 = vadd.f32 %v6304_v28, %v9417_v40  ;;  %v6307_v43 = vadd.f32 %v6306_v21, %v6305_v6 }
 0x44d   : > { %v9526_v59 = vadd.f32 %v6307_v43, %v9420_v3 }
 0x44f   : > { %v6308_v2 = vpop.f32.mrb[12].mxu0 }
 0x450   : > { %v6309_v9 = vpop.f32.mrb[13].mxu0 }
 0x451   : > { %v6310_v16 = vadd.f32 %v6309_v9, %v6308_v2  ;;  %v6311_v30 = vpop.f32.mrb[14].mxu0 }
 0x452   : > { %v6312_v45 = vpop.f32.mrb[15].mxu0 }
 0x453   : > { %v9529_v46 = vadd.f32 %v6310_v16, %v9423_v8  ;;  %v6313_v33 = vadd.f32 %v6312_v45, %v6311_v30 }
 0x455   : > { %v9532_v55 = vadd.f32 %v6313_v33, %v9426_v4  ;;  %v6402_v53 = vpop.f32.mrb[144].mxu1 }
 0x456   : > { %v6403_v54 = vpop.f32.mrb[145].mxu1 }
 0x457   : > { %v6314_v40 = vpop.f32.mrb[16].mxu0  ;;  %v6404_v14 = vadd.f32 %v6403_v54, %v6402_v53  ;;  %v6405_v23 = vpop.f32.mrb[146].mxu1 }
 0x458   : > { %v6315_v58 = vpop.f32.mrb[17].mxu0  ;;  %v6406_v3 = vpop.f32.mrb[147].mxu1 }
 0x459   : > { %v6316_v39 = vadd.f32 %v6315_v58, %v6314_v40  ;;  %v6317_v22 = vpop.f32.mrb[18].mxu0  ;;  %v6407_v15 = vadd.f32 %v6406_v3, %v6405_v23  ;;  %v9535_v13 = vadd.f32 %v9479_v60, %v6404_v14 }
 0x45a   : > { %v6318_v29 = vpop.f32.mrb[19].mxu0 }
 0x45b   : > { %v9538_v8 = vadd.f32 %v6316_v39, %v9429_v44  ;;  %v6319_v41 = vadd.f32 %v6318_v29, %v6317_v22  ;;  %v9541_v4 = vadd.f32 %v9483_v0, %v6407_v15 }
 0x45d   : > { %v9544_v12 = vadd.f32 %v6319_v41, %v9432_v27  ;;  %v6408_v62 = vpop.f32.mrb[148].mxu1 }
 0x45e   : > { %v6409_v18 = vpop.f32.mrb[149].mxu1 }
 0x45f   : > { %v6320_v52 = vpop.f32.mrb[20].mxu0  ;;  %v6410_v20 = vadd.f32 %v6409_v18, %v6408_v62  ;;  %v6411_v11 = vpop.f32.mrb[150].mxu1 }
 0x460   : > { %v6321_v36 = vpop.f32.mrb[21].mxu0  ;;  %v6412_v28 = vpop.f32.mrb[151].mxu1 }
 0x461   : > { %v6322_v60 = vadd.f32 %v6321_v36, %v6320_v52  ;;  %v6323_v6 = vpop.f32.mrb[22].mxu0  ;;  %v6413_v21 = vadd.f32 %v6412_v28, %v6411_v11  ;;  %v9547_v44 = vadd.f32 %v9487_v37, %v6410_v20 }
 0x462   : > { %v6324_v43 = vpop.f32.mrb[23].mxu0 }
 0x463   : > { %v9550_v0 = vadd.f32 %v6322_v60, %v9435_v49  ;;  %v6325_v2 = vadd.f32 %v6324_v43, %v6323_v6  ;;  %v9553_v27 = vadd.f32 %v9491_v7, %v6413_v21 }
 0x465   : > { %v9556_v9 = vadd.f32 %v6325_v2, %v9438_v34  ;;  %v6414_v16 = vpop.f32.mrb[152].mxu1 }
 0x466   : > { %v6415_v30 = vpop.f32.mrb[153].mxu1 }
 0x467   : > { %v6326_v45 = vpop.f32.mrb[24].mxu0  ;;  %v6416_v33 = vadd.f32 %v6415_v30, %v6414_v16  ;;  %v6417_v53 = vpop.f32.mrb[154].mxu1 }
 0x468   : > { %v6327_v54 = vpop.f32.mrb[25].mxu0  ;;  %v6418_v40 = vpop.f32.mrb[155].mxu1 }
 0x469   : > { %v6328_v37 = vadd.f32 %v6327_v54, %v6326_v45  ;;  %v6329_v14 = vpop.f32.mrb[26].mxu0  ;;  %v6419_v23 = vadd.f32 %v6418_v40, %v6417_v53  ;;  %v9559_v49 = vadd.f32 %v9495_v1, %v6416_v33 }
 0x46a   : > { %v6330_v58 = vpop.f32.mrb[27].mxu0 }
 0x46b   : > { %v9562_v7 = vadd.f32 %v6328_v37, %v9441_v35  ;;  %v6331_v3 = vadd.f32 %v6330_v58, %v6329_v14  ;;  %v9565_v34 = vadd.f32 %v9499_v50, %v6419_v23 }
 0x46d   : > { %v9568_v39 = vadd.f32 %v6331_v3, %v9444_v48  ;;  %v6420_v22 = vpop.f32.mrb[156].mxu1 }
 0x46e   : > { %v6421_v15 = vpop.f32.mrb[157].mxu1 }
 0x46f   : > { %v6332_v29 = vpop.f32.mrb[28].mxu0  ;;  %v6422_v41 = vadd.f32 %v6421_v15, %v6420_v22  ;;  %v6423_v62 = vpop.f32.mrb[158].mxu1 }
 0x470   : > { %v6333_v18 = vpop.f32.mrb[29].mxu0  ;;  %v6424_v52 = vpop.f32.mrb[159].mxu1 }
 0x471   : > { %v6334_v1 = vadd.f32 %v6333_v18, %v6332_v29  ;;  %v6335_v20 = vpop.f32.mrb[30].mxu0  ;;  %v6425_v11 = vadd.f32 %v6424_v52, %v6423_v62  ;;  %v9571_v35 = vadd.f32 %v9503_v25, %v6422_v41 }
 0x472   : > { %v6336_v36 = vpop.f32.mrb[31].mxu0 }
 0x473   : > { %v9574_v50 = vadd.f32 %v6334_v1, %v9447_v57  ;;  %v6337_v28 = vadd.f32 %v6336_v36, %v6335_v20  ;;  %v9577_v48 = vadd.f32 %v9507_v47, %v6425_v11 }
 0x475   : > { %v9580_v60 = vadd.f32 %v6337_v28, %v9450_v42  ;;  %v6426_v6 = vpop.f32.mrb[160].mxu1 }
 0x476   : > { %v6427_v21 = vpop.f32.mrb[161].mxu1 }
 0x477   : > { %v6338_v43 = vpop.f32.mrb[32].mxu0  ;;  %v6428_v2 = vadd.f32 %v6427_v21, %v6426_v6  ;;  %v6429_v16 = vpop.f32.mrb[162].mxu1 }
 0x478   : > { %v6339_v30 = vpop.f32.mrb[33].mxu0  ;;  %v6430_v45 = vpop.f32.mrb[163].mxu1 }
 0x479   : > { %v6340_v25 = vadd.f32 %v6339_v30, %v6338_v43  ;;  %v6341_v33 = vpop.f32.mrb[34].mxu0  ;;  %v6431_v53 = vadd.f32 %v6430_v45, %v6429_v16  ;;  %v9583_v57 = vadd.f32 %v9511_v26, %v6428_v2 }
 0x47a   : > { %v6342_v54 = vpop.f32.mrb[35].mxu0 }
 0x47b   : > { %v9586_v47 = vadd.f32 %v6340_v25, %v9453_v63  ;;  %v6343_v40 = vadd.f32 %v6342_v54, %v6341_v33  ;;  %v9589_v42 = vadd.f32 %v9514_v51, %v6431_v53 }
 0x47d   : > { %v9592_v37 = vadd.f32 %v6343_v40, %v9456_v38  ;;  %v6432_v14 = vpop.f32.mrb[164].mxu1 }
 0x47e   : > { %v6433_v23 = vpop.f32.mrb[165].mxu1 }
 0x47f   : > { %v6344_v58 = vpop.f32.mrb[36].mxu0  ;;  %v6434_v3 = vadd.f32 %v6433_v23, %v6432_v14  ;;  %v6435_v22 = vpop.f32.mrb[166].mxu1 }
 0x480   : > { %v6345_v15 = vpop.f32.mrb[37].mxu0  ;;  %v6436_v29 = vpop.f32.mrb[167].mxu1 }
 0x481   : > { %v6346_v26 = vadd.f32 %v6345_v15, %v6344_v58  ;;  %v6347_v41 = vpop.f32.mrb[38].mxu0  ;;  %v6437_v62 = vadd.f32 %v6436_v29, %v6435_v22  ;;  %v9595_v63 = vadd.f32 %v9517_v31, %v6434_v3 }
 0x482   : > { %v6348_v18 = vpop.f32.mrb[39].mxu0 }
 0x483   : > { %v9598_v51 = vadd.f32 %v6346_v26, %v9459_v5  ;;  %v6349_v52 = vadd.f32 %v6348_v18, %v6347_v41  ;;  %v9601_v38 = vadd.f32 %v9520_v61, %v6437_v62 }
 0x485   : > { %v9604_v1 = vadd.f32 %v6349_v52, %v9462_v17  ;;  %v6438_v20 = vpop.f32.mrb[168].mxu1 }
 0x486   : > { %v6439_v11 = vpop.f32.mrb[169].mxu1 }
 0x487   : > { %v6350_v36 = vpop.f32.mrb[40].mxu0  ;;  %v6440_v28 = vadd.f32 %v6439_v11, %v6438_v20  ;;  %v6441_v6 = vpop.f32.mrb[170].mxu1 }
 0x488   : > { %v6351_v21 = vpop.f32.mrb[41].mxu0  ;;  %v6442_v43 = vpop.f32.mrb[171].mxu1 }
 0x489   : > { %v6352_v31 = vadd.f32 %v6351_v21, %v6350_v36  ;;  %v6353_v2 = vpop.f32.mrb[42].mxu0  ;;  %v6443_v16 = vadd.f32 %v6442_v43, %v6441_v6  ;;  %v9607_v5 = vadd.f32 %v9523_v10, %v6440_v28 }
 0x48a   : > { %v6354_v30 = vpop.f32.mrb[43].mxu0 }
 0x48b   : > { %v9610_v61 = vadd.f32 %v6352_v31, %v9465_v24  ;;  %v6355_v45 = vadd.f32 %v6354_v30, %v6353_v2  ;;  %v9613_v17 = vadd.f32 %v9526_v59, %v6443_v16 }
 0x48d   : > { %v9616_v25 = vadd.f32 %v6355_v45, %v9468_v56  ;;  %v6444_v33 = vpop.f32.mrb[172].mxu1 }
 0x48e   : > { %v6445_v53 = vpop.f32.mrb[173].mxu1 }
 0x48f   : > { %v6356_v54 = vpop.f32.mrb[44].mxu0  ;;  %v6446_v40 = vadd.f32 %v6445_v53, %v6444_v33  ;;  %v6447_v14 = vpop.f32.mrb[174].mxu1 }
 0x490   : > { %v6357_v23 = vpop.f32.mrb[45].mxu0  ;;  %v6448_v58 = vpop.f32.mrb[175].mxu1 }
 0x491   : > { %v6358_v10 = vadd.f32 %v6357_v23, %v6356_v54  ;;  %v6359_v3 = vpop.f32.mrb[46].mxu0  ;;  %v6449_v22 = vadd.f32 %v6448_v58, %v6447_v14  ;;  %v9619_v24 = vadd.f32 %v9529_v46, %v6446_v40 }
 0x492   : > { %v6360_v15 = vpop.f32.mrb[47].mxu0 }
 0x493   : > { %v9622_v59 = vadd.f32 %v6358_v10, %v9471_v19  ;;  %v6361_v29 = vadd.f32 %v6360_v15, %v6359_v3  ;;  %v9625_v56 = vadd.f32 %v9532_v55, %v6449_v22 }
 0x495   : > { %v9628_v26 = vadd.f32 %v6361_v29, %v9474_v32  ;;  %v6450_v41 = vpop.f32.mrb[176].mxu1 }
 0x496   : > { %v6451_v62 = vpop.f32.mrb[177].mxu1 }
 0x497   : > { %v6452_v18 = vadd.f32 %v6451_v62, %v6450_v41  ;;  %v6453_v52 = vpop.f32.mrb[178].mxu1 }
 0x498   : > { %v6454_v20 = vpop.f32.mrb[179].mxu1 }
 0x499   : > { %v6455_v11 = vadd.f32 %v6454_v20, %v6453_v52  ;;  %v9631_v46 = vadd.f32 %v9538_v8, %v6452_v18 }
 0x49b   : > { %v9634_v36 = vadd.f32 %v9544_v12, %v6455_v11 }
 0x49d   : > { %v6456_v19 = vpop.f32.mrb[180].mxu1 }
 0x49e   : > { %v6457_v28 = vpop.f32.mrb[181].mxu1 }
 0x49f   : > { %v6458_v6 = vadd.f32 %v6457_v28, %v6456_v19  ;;  %v6459_v55 = vpop.f32.mrb[182].mxu1 }
 0x4a0   : > { %v6460_v21 = vpop.f32.mrb[183].mxu1 }
 0x4a1   : > { %v6461_v43 = vadd.f32 %v6460_v21, %v6459_v55  ;;  %v9637_v32 = vadd.f32 %v9550_v0, %v6458_v6 }
 0x4a3   : > { %v9640_v31 = vadd.f32 %v9556_v9, %v6461_v43 }
 0x4a5   : > { %v6462_v2 = vpop.f32.mrb[184].mxu1 }
 0x4a6   : > { %v6463_v16 = vpop.f32.mrb[185].mxu1 }
 0x4a7   : > { %v6464_v30 = vadd.f32 %v6463_v16, %v6462_v2  ;;  %v6465_v8 = vpop.f32.mrb[186].mxu1 }
 0x4a8   : > { %v6466_v45 = vpop.f32.mrb[187].mxu1 }
 0x4a9   : > { %v6467_v33 = vadd.f32 %v6466_v45, %v6465_v8  ;;  %v9643_v12 = vadd.f32 %v9562_v7, %v6464_v30 }
 0x4ab   : > { %v9646_v53 = vadd.f32 %v9568_v39, %v6467_v33 }
 0x4ad   : > { %v6468_v54 = vpop.f32.mrb[188].mxu1 }
 0x4ae   : > { %v6469_v40 = vpop.f32.mrb[189].mxu1 }
 0x4af   : > { %v6470_v14 = vadd.f32 %v6469_v40, %v6468_v54  ;;  %v6471_v0 = vpop.f32.mrb[190].mxu1 }
 0x4b0   : > { %v6472_v23 = vpop.f32.mrb[191].mxu1 }
 0x4b1   : > { %v6473_v58 = vadd.f32 %v6472_v23, %v6471_v0  ;;  %v9649_v9 = vadd.f32 %v9574_v50, %v6470_v14  ;;  %v9687_v23 = vld [vmem:[%s9835_s9] ss:$0 sm:$0xff] }
 0x4b3   : > { %v9652_v10 = vadd.f32 %v9580_v60, %v6473_v58 }
 0x4b5   : > { %v6474_v3 = vpop.f32.mrb[192].mxu1 }
 0x4b6   : > { %v6475_v22 = vpop.f32.mrb[193].mxu1 }
 0x4b7   : > { %v6476_v15 = vadd.f32 %v6475_v22, %v6474_v3  ;;  %v6477_v7 = vpop.f32.mrb[194].mxu1 }
 0x4b8   : > { %v6478_v29 = vpop.f32.mrb[195].mxu1 }
 0x4b9   : > { %v6479_v41 = vadd.f32 %v6478_v29, %v6477_v7  ;;  %v9655_v39 = vadd.f32 %v9586_v47, %v6476_v15 }
 0x4bb   : > { %v9658_v62 = vadd.f32 %v9592_v37, %v6479_v41 }
 0x4bd   : > { %v6480_v18 = vpop.f32.mrb[196].mxu1 }
 0x4be   : > { %v6481_v52 = vpop.f32.mrb[197].mxu1 }
 0x4bf   : > { %v6482_v20 = vadd.f32 %v6481_v52, %v6480_v18  ;;  %v6483_v50 = vpop.f32.mrb[198].mxu1 }
 0x4c0   : > { %v6484_v11 = vpop.f32.mrb[199].mxu1 }
 0x4c1   : > { %v6485_v19 = vadd.f32 %v6484_v11, %v6483_v50  ;;  %v9661_v60 = vadd.f32 %v9598_v51, %v6482_v20 }
 0x4c3   : > { %v9664_v28 = vadd.f32 %v9604_v1, %v6485_v19 }
 0x4c5   : > { %v6486_v6 = vpop.f32.mrb[200].mxu1 }
 0x4c6   : > { %v6487_v55 = vpop.f32.mrb[201].mxu1 }
 0x4c7   : > { %v6488_v21 = vadd.f32 %v6487_v55, %v6486_v6  ;;  %v6489_v47 = vpop.f32.mrb[202].mxu1 }
 0x4c8   : > { %v6490_v43 = vpop.f32.mrb[203].mxu1 }
 0x4c9   : > { %v6491_v2 = vadd.f32 %v6490_v43, %v6489_v47  ;;  %v9667_v37 = vadd.f32 %v9610_v61, %v6488_v21  ;;  %v9681_v61 = vld [vmem:[%s9834_s8] ss:$0 sm:$0xff] }
 0x4cb   : > { %v9670_v16 = vadd.f32 %v9616_v25, %v6491_v2 }
 0x4cd   : > { %v6492_v30 = vpop.f32.mrb[204].mxu1 }
 0x4ce   : > { %v6493_v8 = vpop.f32.mrb[205].mxu1 }
 0x4cf   : > { %v6494_v45 = vadd.f32 %v6493_v8, %v6492_v30  ;;  %v6495_v51 = vpop.f32.mrb[206].mxu1 }
 0x4d0   : > { %v6496_v33 = vpop.f32.mrb[207].mxu1 }
 0x4d1   : > { %v6497_v54 = vadd.f32 %v6496_v33, %v6495_v51  ;;  %v9673_v1 = vadd.f32 %v9622_v59, %v6494_v45 }
 0x4d3   : > { %v9676_v40 = vadd.f32 %v9628_v26, %v6497_v54 }
 0x4d5   : > { %v6780_v25 = vpop.f32.mrb[112].mxu1 }
 0x4d6   : > { %v6940_v14 = vadd.f32 %v9547_v44, %v6780_v25  ;;  %v4888_v0 = vpop.f32.mrb[113].mxu1 }
 0x4d7   : > { %v6943_v59 = vadd.f32 %v9535_v13, %v4888_v0  ;;  %v6781_v58 = vpop.f32.mrb[114].mxu1 }
 0x4d8   : > { %v5055_v26 = vmul.f32 %v6940_v14, %v9681_v61  ;;  %v6946_v3 = vadd.f32 %v9553_v27, %v6781_v58  ;;  %v4891_v22 = vpop.f32.mrb[115].mxu1 }
 0x4d9   : > { %v5053_v15 = vmul.f32 %v6943_v59, %v9681_v61  ;;  %v6949_v7 = vadd.f32 %v9541_v4, %v4891_v22 }
 0x4da   : > { %v5093_v44 = vadd.f32 %v9687_v23, %v5055_v26  ;;  %v5056_v29 = vmul.f32 %v6946_v3, %v9681_v61 }
 0x4db   : > { %v5091_v41 = vadd.f32 %v9687_v23, %v5053_v15  ;;  %v5054_v18 = vmul.f32 %v6949_v7, %v9681_v61 }
 0x4dc   : > { %vm5125_vm2 = vcmp.ge.f32.partialorder %v5093_v44, 0.0  ;;  %v5157_v13 = vmul.f32 0.05, %v5093_v44  ;;  %v5094_v27 = vadd.f32 %v9687_v23, %v5056_v29 }
 0x4dd   : > { %vm5123_vm5 = vcmp.ge.f32.partialorder %v5091_v41, 0.0  ;;  %v5155_v4 = vmul.f32 0.05, %v5091_v41  ;;  %v5092_v52 = vadd.f32 %v9687_v23, %v5054_v18  ;;  %v6784_v20 = vpop.f32.mrb[116].mxu1 }
 0x4de   : > { %v5189_v50 = vsel %vm5125_vm2, %v5093_v44, %v5157_v13  ;;  %vm5126_vm10 = vcmp.ge.f32.partialorder %v5094_v27, 0.0  ;;  %v5158_v11 = vmul.f32 0.05, %v5094_v27  ;;  %v6952_v19 = vadd.f32 %v9571_v35, %v6784_v20  ;;  %v4904_v6 = vpop.f32.mrb[117].mxu1 }
 0x4df   : > { %5221 = vst [vmem:[%s9703_s29 + $0x10] sm:$0xff] %v5189_v50  ;;  %v5187_v55 = vsel %vm5123_vm5, %v5091_v41, %v5155_v4  ;;  %vm5124_vm11 = vcmp.ge.f32.partialorder %v5092_v52, 0.0  ;;  %v5156_v21 = vmul.f32 0.05, %v5092_v52  ;;  %v6955_v47 = vadd.f32 %v9559_v49, %v4904_v6  ;;  %v6785_v43 = vpop.f32.mrb[118].mxu1 }
 0x4e0   : > { %5219 = vst [vmem:[%s9703_s29] sm:$0xff] %v5187_v55  ;;  %v5190_v2 = vsel %vm5126_vm10, %v5094_v27, %v5158_v11  ;;  %v5059_v30 = vmul.f32 %v6952_v19, %v9681_v61  ;;  %v6958_v8 = vadd.f32 %v9577_v48, %v6785_v43  ;;  %v4907_v45 = vpop.f32.mrb[119].mxu1 }
 0x4e1   : > { %5222 = vst [vmem:[%s9703_s29 + $0x18] sm:$0xff] %v5190_v2  ;;  %v5188_v51 = vsel %vm5124_vm11, %v5092_v52, %v5156_v21  ;;  %v5057_v35 = vmul.f32 %v6955_v47, %v9681_v61  ;;  %v6961_v33 = vadd.f32 %v9565_v34, %v4907_v45 }
 0x4e2   : > { %5220 = vst [vmem:[%s9703_s29 + $0x8] sm:$0xff] %v5188_v51  ;;  %v5097_v54 = vadd.f32 %v9687_v23, %v5059_v30  ;;  %v5060_v49 = vmul.f32 %v6958_v8, %v9681_v61 }
 0x4e3   : > { %v5095_v25 = vadd.f32 %v9687_v23, %v5057_v35  ;;  %v5058_v14 = vmul.f32 %v6961_v33, %v9681_v61 }
 0x4e4   : > { %vm5129_vm12 = vcmp.ge.f32.partialorder %v5097_v54, 0.0  ;;  %v5161_v0 = vmul.f32 0.05, %v5097_v54  ;;  %v5098_v48 = vadd.f32 %v9687_v23, %v5060_v49 }
 0x4e5   : > { %vm5127_vm13 = vcmp.ge.f32.partialorder %v5095_v25, 0.0  ;;  %v5159_v59 = vmul.f32 0.05, %v5095_v25  ;;  %v5096_v58 = vadd.f32 %v9687_v23, %v5058_v14  ;;  %v6788_v34 = vpop.f32.mrb[120].mxu1 }
 0x4e6   : > { %v5193_v26 = vsel %vm5129_vm12, %v5097_v54, %v5161_v0  ;;  %vm5130_vm14 = vcmp.ge.f32.partialorder %v5098_v48, 0.0  ;;  %v5162_v3 = vmul.f32 0.05, %v5098_v48  ;;  %v6964_v22 = vadd.f32 %v9595_v63, %v6788_v34  ;;  %v4920_v15 = vpop.f32.mrb[121].mxu1 }
 0x4e7   : > { %5225 = vst [vmem:[%s9703_s29 + $0x30] sm:$0xff] %v5193_v26  ;;  %v5191_v7 = vsel %vm5127_vm13, %v5095_v25, %v5159_v59  ;;  %vm5128_vm15 = vcmp.ge.f32.partialorder %v5096_v58, 0.0  ;;  %v5160_v44 = vmul.f32 0.05, %v5096_v58  ;;  %v6967_v29 = vadd.f32 %v9583_v57, %v4920_v15  ;;  %v6789_v41 = vpop.f32.mrb[122].mxu1 }
 0x4e8   : > { %5223 = vst [vmem:[%s9703_s29 + $0x20] sm:$0xff] %v5191_v7  ;;  %v5194_v18 = vsel %vm5130_vm14, %v5098_v48, %v5162_v3  ;;  %v5063_v13 = vmul.f32 %v6964_v22, %v9681_v61  ;;  %v6970_v27 = vadd.f32 %v9601_v38, %v6789_v41  ;;  %v4923_v4 = vpop.f32.mrb[123].mxu1 }
 0x4e9   : > { %5226 = vst [vmem:[%s9703_s29 + $0x38] sm:$0xff] %v5194_v18  ;;  %v5192_v52 = vsel %vm5128_vm15, %v5096_v58, %v5160_v44  ;;  %v5061_v63 = vmul.f32 %v6967_v29, %v9681_v61  ;;  %v6973_v20 = vadd.f32 %v9589_v42, %v4923_v4 }
 0x4ea   : > { %5224 = vst [vmem:[%s9703_s29 + $0x28] sm:$0xff] %v5192_v52  ;;  %v5101_v50 = vadd.f32 %v9687_v23, %v5063_v13  ;;  %v5064_v57 = vmul.f32 %v6970_v27, %v9681_v61 }
 0x4eb   : > { %v5099_v11 = vadd.f32 %v9687_v23, %v5061_v63  ;;  %v5062_v19 = vmul.f32 %v6973_v20, %v9681_v61 }
 0x4ec   : > { %vm5133_vm0 = vcmp.ge.f32.partialorder %v5101_v50, 0.0  ;;  %v5165_v6 = vmul.f32 0.05, %v5101_v50  ;;  %v5102_v38 = vadd.f32 %v9687_v23, %v5064_v57 }
 0x4ed   : > { %vm5131_vm1 = vcmp.ge.f32.partialorder %v5099_v11, 0.0  ;;  %v5163_v55 = vmul.f32 0.05, %v5099_v11  ;;  %v5100_v21 = vadd.f32 %v9687_v23, %v5062_v19  ;;  %v6792_v42 = vpop.f32.mrb[124].mxu1 }
 0x4ee   : > { %v5197_v47 = vsel %vm5133_vm0, %v5101_v50, %v5165_v6  ;;  %vm5134_vm3 = vcmp.ge.f32.partialorder %v5102_v38, 0.0  ;;  %v5166_v43 = vmul.f32 0.05, %v5102_v38  ;;  %v6976_v2 = vadd.f32 %v9619_v24, %v6792_v42  ;;  %v4936_v30 = vpop.f32.mrb[125].mxu1 }
 0x4ef   : > { %5229 = vst [vmem:[%s9703_s29 + $0x50] sm:$0xff] %v5197_v47  ;;  %v5195_v8 = vsel %vm5131_vm1, %v5099_v11, %v5163_v55  ;;  %vm5132_vm4 = vcmp.ge.f32.partialorder %v5100_v21, 0.0  ;;  %v5164_v45 = vmul.f32 0.05, %v5100_v21  ;;  %v6979_v51 = vadd.f32 %v9607_v5, %v4936_v30  ;;  %v6793_v35 = vpop.f32.mrb[126].mxu1 }
 0x4f0   : > { %5227 = vst [vmem:[%s9703_s29 + $0x40] sm:$0xff] %v5195_v8  ;;  %v5198_v33 = vsel %vm5134_vm3, %v5102_v38, %v5166_v43  ;;  %v5067_v54 = vmul.f32 %v6976_v2, %v9681_v61  ;;  %v6982_v49 = vadd.f32 %v9625_v56, %v6793_v35  ;;  %v4939_v25 = vpop.f32.mrb[127].mxu1 }
 0x4f1   : > { %5230 = vst [vmem:[%s9703_s29 + $0x58] sm:$0xff] %v5198_v33  ;;  %v5196_v14 = vsel %vm5132_vm4, %v5100_v21, %v5164_v45  ;;  %v5065_v24 = vmul.f32 %v6979_v51, %v9681_v61  ;;  %v6985_v0 = vadd.f32 %v9613_v17, %v4939_v25 }
 0x4f2   : > { %5228 = vst [vmem:[%s9703_s29 + $0x48] sm:$0xff] %v5196_v14  ;;  %v5105_v48 = vadd.f32 %v9687_v23, %v5067_v54  ;;  %v5068_v5 = vmul.f32 %v6982_v49, %v9681_v61 }
 0x4f3   : > { %v5103_v59 = vadd.f32 %v9687_v23, %v5065_v24  ;;  %v5066_v58 = vmul.f32 %v6985_v0, %v9681_v61 }
 0x4f4   : > { %vm5137_vm6 = vcmp.ge.f32.partialorder %v5105_v48, 0.0  ;;  %v5169_v34 = vmul.f32 0.05, %v5105_v48  ;;  %v5106_v56 = vadd.f32 %v9687_v23, %v5068_v5 }
 0x4f5   : > { %vm5135_vm7 = vcmp.ge.f32.partialorder %v5103_v59, 0.0  ;;  %v5167_v26 = vmul.f32 0.05, %v5103_v59  ;;  %v5104_v3 = vadd.f32 %v9687_v23, %v5066_v58  ;;  %v6796_v17 = vpop.f32.mrb[128].mxu1 }
 0x4f6   : > { %v5201_v22 = vsel %vm5137_vm6, %v5105_v48, %v5169_v34  ;;  %vm5138_vm8 = vcmp.ge.f32.partialorder %v5106_v56, 0.0  ;;  %v5170_v15 = vmul.f32 0.05, %v5106_v56  ;;  %v6988_v7 = vadd.f32 %v9637_v32, %v6796_v17  ;;  %v4952_v44 = vpop.f32.mrb[129].mxu1 }
 0x4f7   : > { %5233 = vst [vmem:[%s9703_s29 + $0x70] sm:$0xff] %v5201_v22  ;;  %v5199_v29 = vsel %vm5135_vm7, %v5103_v59, %v5167_v26  ;;  %vm5136_vm9 = vcmp.ge.f32.partialorder %v5104_v3, 0.0  ;;  %v5168_v41 = vmul.f32 0.05, %v5104_v3  ;;  %v6991_v18 = vadd.f32 %v9631_v46, %v4952_v44  ;;  %v6797_v13 = vpop.f32.mrb[130].mxu1 }
 0x4f8   : > { %5231 = vst [vmem:[%s9703_s29 + $0x60] sm:$0xff] %v5199_v29  ;;  %v5202_v27 = vsel %vm5138_vm8, %v5106_v56, %v5170_v15  ;;  %v5071_v4 = vmul.f32 %v6988_v7, %v9681_v61  ;;  %v6994_v52 = vadd.f32 %v9640_v31, %v6797_v13  ;;  %v4955_v63 = vpop.f32.mrb[131].mxu1 }
 0x4f9   : > { %5234 = vst [vmem:[%s9703_s29 + $0x78] sm:$0xff] %v5202_v27  ;;  %v5200_v20 = vsel %vm5136_vm9, %v5104_v3, %v5168_v41  ;;  %v5069_v32 = vmul.f32 %v6991_v18, %v9681_v61  ;;  %v6997_v50 = vadd.f32 %v9634_v36, %v4955_v63 }
 0x4fa   : > { %5232 = vst [vmem:[%s9703_s29 + $0x68] sm:$0xff] %v5200_v20  ;;  %v5109_v57 = vadd.f32 %v9687_v23, %v5071_v4  ;;  %v5072_v46 = vmul.f32 %v6994_v52, %v9681_v61 }
 0x4fb   : > { %v5107_v11 = vadd.f32 %v9687_v23, %v5069_v32  ;;  %v5070_v19 = vmul.f32 %v6997_v50, %v9681_v61 }
 0x4fc   : > { %vm5141_vm2 = vcmp.ge.f32.partialorder %v5109_v57, 0.0  ;;  %v5173_v6 = vmul.f32 0.05, %v5109_v57  ;;  %v5110_v31 = vadd.f32 %v9687_v23, %v5072_v46 }
 0x4fd   : > { %vm5139_vm5 = vcmp.ge.f32.partialorder %v5107_v11, 0.0  ;;  %v5171_v38 = vmul.f32 0.05, %v5107_v11  ;;  %v5108_v55 = vadd.f32 %v9687_v23, %v5070_v19  ;;  %v6800_v36 = vpop.f32.mrb[132].mxu1 }
 0x4fe   : > { %v5205_v21 = vsel %vm5141_vm2, %v5109_v57, %v5173_v6  ;;  %vm5142_vm10 = vcmp.ge.f32.partialorder %v5110_v31, 0.0  ;;  %v5174_v42 = vmul.f32 0.05, %v5110_v31  ;;  %v7000_v47 = vadd.f32 %v9649_v9, %v6800_v36  ;;  %v4968_v43 = vpop.f32.mrb[133].mxu1 }
 0x4ff   : > { %5237 = vst [vmem:[%s9703_s29 + $0x90] sm:$0xff] %v5205_v21  ;;  %v5203_v2 = vsel %vm5139_vm5, %v5107_v11, %v5171_v38  ;;  %vm5140_vm11 = vcmp.ge.f32.partialorder %v5108_v55, 0.0  ;;  %v5172_v30 = vmul.f32 0.05, %v5108_v55  ;;  %v7003_v8 = vadd.f32 %v9643_v12, %v4968_v43  ;;  %v6801_v45 = vpop.f32.mrb[134].mxu1 }
 0x500   : > { %5235 = vst [vmem:[%s9703_s29 + $0x80] sm:$0xff] %v5203_v2  ;;  %v5206_v51 = vsel %vm5142_vm10, %v5110_v31, %v5174_v42  ;;  %v5075_v35 = vmul.f32 %v7000_v47, %v9681_v61  ;;  %v7006_v33 = vadd.f32 %v9652_v10, %v6801_v45  ;;  %v4971_v54 = vpop.f32.mrb[135].mxu1 }
 0x501   : > { %5238 = vst [vmem:[%s9703_s29 + $0x98] sm:$0xff] %v5206_v51  ;;  %v5204_v49 = vsel %vm5140_vm11, %v5108_v55, %v5172_v30  ;;  %v5073_v9 = vmul.f32 %v7003_v8, %v9681_v61  ;;  %v7009_v25 = vadd.f32 %v9646_v53, %v4971_v54 }
 0x502   : > { %5236 = vst [vmem:[%s9703_s29 + $0x88] sm:$0xff] %v5204_v49  ;;  %v5113_v14 = vadd.f32 %v9687_v23, %v5075_v35  ;;  %v5076_v12 = vmul.f32 %v7006_v33, %v9681_v61 }
 0x503   : > { %v5111_v24 = vadd.f32 %v9687_v23, %v5073_v9  ;;  %v5074_v0 = vmul.f32 %v7009_v25, %v9681_v61 }
 0x504   : > { %vm5145_vm12 = vcmp.ge.f32.partialorder %v5113_v14, 0.0  ;;  %v5177_v48 = vmul.f32 0.05, %v5113_v14  ;;  %v5114_v10 = vadd.f32 %v9687_v23, %v5076_v12 }
 0x505   : > { %vm5143_vm13 = vcmp.ge.f32.partialorder %v5111_v24, 0.0  ;;  %v5175_v5 = vmul.f32 0.05, %v5111_v24  ;;  %v5112_v59 = vadd.f32 %v9687_v23, %v5074_v0  ;;  %v6804_v53 = vpop.f32.mrb[136].mxu1 }
 0x506   : > { %v5209_v58 = vsel %vm5145_vm12, %v5113_v14, %v5177_v48  ;;  %vm5146_vm14 = vcmp.ge.f32.partialorder %v5114_v10, 0.0  ;;  %v5178_v34 = vmul.f32 0.05, %v5114_v10  ;;  %v7012_v56 = vadd.f32 %v9661_v60, %v6804_v53  ;;  %v4984_v26 = vpop.f32.mrb[137].mxu1 }
 0x507   : > { %5241 = vst [vmem:[%s9703_s29 + $0xb0] sm:$0xff] %v5209_v58  ;;  %v5207_v3 = vsel %vm5143_vm13, %v5111_v24, %v5175_v5  ;;  %vm5144_vm15 = vcmp.ge.f32.partialorder %v5112_v59, 0.0  ;;  %v5176_v17 = vmul.f32 0.05, %v5112_v59  ;;  %v7015_v22 = vadd.f32 %v9655_v39, %v4984_v26  ;;  %v6805_v15 = vpop.f32.mrb[138].mxu1 }
 0x508   : > { %5239 = vst [vmem:[%s9703_s29 + $0xa0] sm:$0xff] %v5207_v3  ;;  %v5210_v7 = vsel %vm5146_vm14, %v5114_v10, %v5178_v34  ;;  %v5079_v44 = vmul.f32 %v7012_v56, %v9681_v61  ;;  %v7018_v29 = vadd.f32 %v9664_v28, %v6805_v15  ;;  %v4987_v41 = vpop.f32.mrb[139].mxu1 }
 0x509   : > { %5242 = vst [vmem:[%s9703_s29 + $0xb8] sm:$0xff] %v5210_v7  ;;  %v5208_v18 = vsel %vm5144_vm15, %v5112_v59, %v5176_v17  ;;  %v5077_v60 = vmul.f32 %v7015_v22, %v9681_v61  ;;  %v7021_v13 = vadd.f32 %v9658_v62, %v4987_v41 }
 0x50a   : > { %5240 = vst [vmem:[%s9703_s29 + $0xa8] sm:$0xff] %v5208_v18  ;;  %v5117_v27 = vadd.f32 %v9687_v23, %v5079_v44  ;;  %v5080_v39 = vmul.f32 %v7018_v29, %v9681_v61 }
 0x50b   : > { %v5115_v4 = vadd.f32 %v9687_v23, %v5077_v60  ;;  %v5078_v52 = vmul.f32 %v7021_v13, %v9681_v61 }
 0x50c   : > { %vm5149_vm0 = vcmp.ge.f32.partialorder %v5117_v27, 0.0  ;;  %v5181_v63 = vmul.f32 0.05, %v5117_v27  ;;  %v5118_v28 = vadd.f32 %v9687_v23, %v5080_v39 }
 0x50d   : > { %vm5147_vm1 = vcmp.ge.f32.partialorder %v5115_v4, 0.0  ;;  %v5179_v20 = vmul.f32 0.05, %v5115_v4  ;;  %v5116_v32 = vadd.f32 %v9687_v23, %v5078_v52  ;;  %v6808_v62 = vpop.f32.mrb[140].mxu1 }
 0x50e   : > { %v5213_v50 = vsel %vm5149_vm0, %v5117_v27, %v5181_v63  ;;  %vm5150_vm3 = vcmp.ge.f32.partialorder %v5118_v28, 0.0  ;;  %v5182_v57 = vmul.f32 0.05, %v5118_v28  ;;  %v7024_v46 = vadd.f32 %v9673_v1, %v6808_v62  ;;  %v5000_v11 = vpop.f32.mrb[141].mxu1 }
 0x50f   : > { %5245 = vst [vmem:[%s9703_s29 + $0xd0] sm:$0xff] %v5213_v50  ;;  %v5211_v19 = vsel %vm5147_vm1, %v5115_v4, %v5179_v20  ;;  %vm5148_vm4 = vcmp.ge.f32.partialorder %v5116_v32, 0.0  ;;  %v5180_v6 = vmul.f32 0.05, %v5116_v32  ;;  %v7027_v31 = vadd.f32 %v9667_v37, %v5000_v11  ;;  %v6809_v38 = vpop.f32.mrb[142].mxu1 }
 0x510   : > { %5243 = vst [vmem:[%s9703_s29 + $0xc0] sm:$0xff] %v5211_v19  ;;  %v5214_v55 = vsel %vm5150_vm3, %v5118_v28, %v5182_v57  ;;  %v5083_v36 = vmul.f32 %v7024_v46, %v9681_v61  ;;  %v7030_v21 = vadd.f32 %v9676_v40, %v6809_v38  ;;  %v5003_v42 = vpop.f32.mrb[143].mxu1 }
 0x511   : > { %5246 = vst [vmem:[%s9703_s29 + $0xd8] sm:$0xff] %v5214_v55  ;;  %v5212_v47 = vsel %vm5148_vm4, %v5116_v32, %v5180_v6  ;;  %v5081_v1 = vmul.f32 %v7027_v31, %v9681_v61  ;;  %v7033_v43 = vadd.f32 %v9670_v16, %v5003_v42 }
 0x512   : > { %5244 = vst [vmem:[%s9703_s29 + $0xc8] sm:$0xff] %v5212_v47  ;;  %v5121_v2 = vadd.f32 %v9687_v23, %v5083_v36  ;;  %v5084_v37 = vmul.f32 %v7030_v21, %v9681_v61 }
 0x513   : > { %v5119_v30 = vadd.f32 %v9687_v23, %v5081_v1  ;;  %v5082_v8 = vmul.f32 %v7033_v43, %v9681_v61 }
 0x514   : > { %vm5153_vm6 = vcmp.ge.f32.partialorder %v5121_v2, 0.0  ;;  %v5185_v40 = vmul.f32 0.05, %v5121_v2  ;;  %v5122_v45 = vadd.f32 %v9687_v23, %v5084_v37 }
 0x515   : > { %vm5151_vm7 = vcmp.ge.f32.partialorder %v5119_v30, 0.0  ;;  %v5183_v51 = vmul.f32 0.05, %v5119_v30  ;;  %v5120_v16 = vadd.f32 %v9687_v23, %v5082_v8 }
 0x516   : > { %v5217_v35 = vsel %vm5153_vm6, %v5121_v2, %v5185_v40  ;;  %vm5154_vm8 = vcmp.ge.f32.partialorder %v5122_v45, 0.0  ;;  %v5186_v33 = vmul.f32 0.05, %v5122_v45 }
 0x517   : > { %5249 = vst [vmem:[%s9703_s29 + $0xf0] sm:$0xff] %v5217_v35  ;;  %v5215_v54 = vsel %vm5151_vm7, %v5119_v30, %v5183_v51  ;;  %vm5152_vm9 = vcmp.ge.f32.partialorder %v5120_v16, 0.0  ;;  %v5184_v49 = vmul.f32 0.05, %v5120_v16 }
 0x518   : > { %5247 = vst [vmem:[%s9703_s29 + $0xe0] sm:$0xff] %v5215_v54  ;;  %v5218_v9 = vsel %vm5154_vm8, %v5122_v45, %v5186_v33 }
 0x519   : > { %5250 = vst [vmem:[%s9703_s29 + $0xf8] sm:$0xff] %v5218_v9  ;;  %v5216_v61 = vsel %vm5152_vm9, %v5120_v16, %v5184_v49 }
 0x51a   : > { %5248 = vst [vmem:[%s9703_s29 + $0xe8] sm:$0xff] %v5216_v61 }
 0x51b PF: > { %s20_s13 = sadd.s32 1, %s7340_s13  }
 0x51c   : > { %p17_p4 = scmp.ge.s32.totalorder %s20_s13, 4  }
 0x51e   :  { %19 = sbr.rel (!%p17_p4) target bundleno = 1 (0x1), region = 101 }

</bundles_post_ra>
